<compile_context>
chip_gen: v6e
topology: v6e:2x2x1
jax: 0.10.0
libtpu: 0.0.40
codegen_flags: <defaults>
</compile_context>

<pallas_src>
import math
import functools

import jax
import jax.numpy as jnp
from jax.experimental import pallas as pl
from jax.experimental.pallas import tpu as pltpu


# ---------------------------------------------------------------------------
# Fused decoder-stack kernel (one grid step == one DecoderBlock)
# ---------------------------------------------------------------------------

def _layernorm(s, g, b, eps):
    mu = jnp.mean(s, axis=-1, keepdims=True)
    var = jnp.mean(jnp.square(s - mu), axis=-1, keepdims=True)  # biased, like torch LN
    return (s - mu) * jax.lax.rsqrt(var + eps) * g + b


def _decoder_stack_kernel(
    x_ref, enc_ref, tmask_ref, smask_ref,
    wq_s_ref, bq_s_ref, wk_s_ref, bk_s_ref, wv_s_ref, bv_s_ref, wo_s_ref, bo_s_ref,
    wq_c_ref, bq_c_ref, wk_c_ref, bk_c_ref, wv_c_ref, bv_c_ref, wo_c_ref, bo_c_ref,
    w1_ref, b1_ref, w2_ref, b2_ref,
    ln1_g_ref, ln1_b_ref, ln2_g_ref, ln2_b_ref, ln3_g_ref, ln3_b_ref,
    lnf_g_ref, lnf_b_ref,
    out_ref,                # [B*T, D] final output (written on last grid step)
    x_sc,                   # VMEM scratch: activation carried across layers
    *, B, T, S, H, Dh, eps):

    l = pl.program_id(0)
    n_layers = pl.num_programs(0)
    scale = 1.0 / math.sqrt(Dh)

    # Initialize the VMEM-resident activation carry with the input embeddings.
    @pl.when(l == 0)
    def _():
        x_sc[...] = x_ref[...].astype(jnp.float32)

    x = x_sc[...]                                   # [B*T, D]
    enc = enc_ref[...].astype(jnp.float32)          # [B*S, D]

    def mha(x_q, x_kv, Tq, Tk, amask,
            wq_r, bq_r, wk_r, bk_r, wv_r, bv_r, wo_r, bo_r):
        # Heads run as an unrolled in-kernel loop; the output projection is
        # accumulated per head so the result is emitted lane-dense as [B*Tq, D].
        acc = bo_r[0]                               # [1, D] -> broadcasts on first add
        for h in range(H):
            q = (jnp.dot(x_q, wq_r[0, h], preferred_element_type=jnp.float32)
                 + bq_r[0, h]).reshape(B, Tq, Dh)
            k = (jnp.dot(x_kv, wk_r[0, h], preferred_element_type=jnp.float32)
                 + bk_r[0, h]).reshape(B, Tk, Dh)
            v = (jnp.dot(x_kv, wv_r[0, h], preferred_element_type=jnp.float32)
                 + bv_r[0, h]).reshape(B, Tk, Dh)
            s = jnp.einsum("bqd,bkd->bqk", q, k,
                           preferred_element_type=jnp.float32) * scale
            s = s + amask                           # additive mask (0 / -1e9)
            s = s - jnp.max(s, axis=-1, keepdims=True)
            p = jnp.exp(s)
            p = p * pl.reciprocal(jnp.sum(p, axis=-1, keepdims=True), approx=True)
            o = jnp.einsum("bqk,bkd->bqd", p, v,
                           preferred_element_type=jnp.float32)   # [B, Tq, Dh]
            acc = acc + jnp.dot(o.reshape(B * Tq, Dh), wo_r[0, h],
                                preferred_element_type=jnp.float32)
        return acc                                  # [B*Tq, D]

    # ---- self-attention + add & norm -------------------------------------
    sa = mha(x, x, T, T, tmask_ref[...],
             wq_s_ref, bq_s_ref, wk_s_ref, bk_s_ref, wv_s_ref, bv_s_ref,
             wo_s_ref, bo_s_ref)
    x = _layernorm(x + sa, ln1_g_ref[0], ln1_b_ref[0], eps)

    # ---- cross-attention + add & norm -------------------------------------
    ca = mha(x, enc, T, S, smask_ref[...],
             wq_c_ref, bq_c_ref, wk_c_ref, bk_c_ref, wv_c_ref, bv_c_ref,
             wo_c_ref, bo_c_ref)
    x = _layernorm(x + ca, ln2_g_ref[0], ln2_b_ref[0], eps)

    # ---- feed-forward + add & norm -----------------------------------------
    hdn = jnp.dot(x, w1_ref[0], preferred_element_type=jnp.float32) + b1_ref[0]
    hdn = jnp.maximum(hdn, 0.0)
    ff = jnp.dot(hdn, w2_ref[0], preferred_element_type=jnp.float32) + b2_ref[0]
    x = _layernorm(x + ff, ln3_g_ref[0], ln3_b_ref[0], eps)

    # Carry the activation to the next layer.
    x_sc[...] = x

    # Final decoder LayerNorm fused into the last grid step (no zero-add).
    @pl.when(l == n_layers - 1)
    def _():
        out_ref[...] = _layernorm(x, lnf_g_ref[...], lnf_b_ref[...],
                                  eps).astype(out_ref.dtype)


# ---------------------------------------------------------------------------
# Wrapper: parameter plumbing + single pallas_call
# ---------------------------------------------------------------------------

def decoder_forward(x, enc_out, tgt_mask, src_mask, params, num_heads, eps=1e-5):
    B, T, D = x.shape
    S = enc_out.shape[1]
    H = num_heads
    Dh = D // H
    L = params["wq_s"].shape[0]
    BT, BS = B * T, B * S

    def split_w(w):      # [L, D, D] -> [L, H, D, Dh]   (per-head output columns)
        return w.reshape(L, D, H, Dh).transpose(0, 2, 1, 3)

    def split_b(b):      # [L, D]    -> [L, H, 1, Dh]
        return b.reshape(L, H, Dh)[:, :, None, :]

    def split_wo(w):     # [L, D, D] -> [L, H, Dh, D]   (per-head input rows)
        return w.reshape(L, H, Dh, D)

    def row(b):          # [L, N]    -> [L, 1, N]
        return b[:, None, :]

    operands = [
        x.reshape(BT, D),
        enc_out.reshape(BS, D),
        (tgt_mask.astype(jnp.float32) - 1.0) * 1e9,   # additive: 0 attend / -1e9 masked
        (src_mask.astype(jnp.float32) - 1.0) * 1e9,
        split_w(params["wq_s"]), split_b(params["bq_s"]),
        split_w(params["wk_s"]), split_b(params["bk_s"]),
        split_w(params["wv_s"]), split_b(params["bv_s"]),
        split_wo(params["wo_s"]), row(params["bo_s"]),
        split_w(params["wq_c"]), split_b(params["bq_c"]),
        split_w(params["wk_c"]), split_b(params["bk_c"]),
        split_w(params["wv_c"]), split_b(params["bv_c"]),
        split_wo(params["wo_c"]), row(params["bo_c"]),
        params["w1"], row(params["b1"]),
        params["w2"], row(params["b2"]),
        row(params["ln1_g"]), row(params["ln1_b"]),
        row(params["ln2_g"]), row(params["ln2_b"]),
        row(params["ln3_g"]), row(params["ln3_b"]),
        params["lnf_g"][None, :], params["lnf_b"][None, :],
    ]

    def layer_spec(a):   # leading dim is the layer axis -> block index l
        nd = a.ndim
        return pl.BlockSpec((1,) + tuple(a.shape[1:]),
                            lambda l, _n=nd: (l,) + (0,) * (_n - 1))

    def const_spec(a):   # same (whole-array) block for every layer
        nd = a.ndim
        return pl.BlockSpec(tuple(a.shape), lambda l, _n=nd: (0,) * _n)

    in_specs = [const_spec(a) for a in operands[:4]]
    in_specs += [layer_spec(a) for a in operands[4:-2]]
    in_specs += [const_spec(a) for a in operands[-2:]]

    out2d = pl.pallas_call(
        functools.partial(_decoder_stack_kernel,
                          B=B, T=T, S=S, H=H, Dh=Dh, eps=eps),
        out_shape=jax.ShapeDtypeStruct((BT, D), x.dtype),
        grid=(L,),
        in_specs=in_specs,
        out_specs=pl.BlockSpec((BT, D), lambda l: (0, 0)),
        scratch_shapes=[pltpu.VMEM((BT, D), jnp.float32)],   # activation carry
        compiler_params=pltpu.CompilerParams(
            dimension_semantics=("arbitrary",)),             # sequential layer carry
    )(*operands)
    return out2d.reshape(B, T, D)


# ---------------------------------------------------------------------------
# Deterministic parameter init (per-layer weights stacked along a leading axis)
# ---------------------------------------------------------------------------

def init_decoder_params(key, num_layers, d_model, d_ff):
    L, D, F = num_layers, d_model, d_ff
    ks = jax.random.split(key, 10)

    def w(k, *shape):
        return 0.05 * jax.random.normal(k, shape, jnp.float32)

    zeros = lambda *shape: jnp.zeros(shape, jnp.float32)
    ones = lambda *shape: jnp.ones(shape, jnp.float32)

    return {
        # self-attention
        "wq_s": w(ks[0], L, D, D), "bq_s": zeros(L, D),
        "wk_s": w(ks[1], L, D, D), "bk_s": zeros(L, D),
        "wv_s": w(ks[2], L, D, D), "bv_s": zeros(L, D),
        "wo_s": w(ks[3], L, D, D), "bo_s": zeros(L, D),
        # cross-attention
        "wq_c": w(ks[4], L, D, D), "bq_c": zeros(L, D),
        "wk_c": w(ks[5], L, D, D), "bk_c": zeros(L, D),
        "wv_c": w(ks[6], L, D, D), "bv_c": zeros(L, D),
        "wo_c": w(ks[7], L, D, D), "bo_c": zeros(L, D),
        # feed-forward
        "w1": w(ks[8], L, D, F), "b1": zeros(L, F),
        "w2": w(ks[9], L, F, D), "b2": zeros(L, D),
        # per-block LayerNorms
        "ln1_g": ones(L, D), "ln1_b": zeros(L, D),
        "ln2_g": ones(L, D), "ln2_b": zeros(L, D),
        "ln3_g": ones(L, D), "ln3_b": zeros(L, D),
        # final LayerNorm
        "lnf_g": ones(D), "lnf_b": zeros(D),
    }


# ---------------------------------------------------------------------------
# Main
# ---------------------------------------------------------------------------

if __name__ == "__main__":
    B, T, S = 2, 8, 8          # batch, target seq len, source seq len
    D, H, DFF = 32, 4, 64      # d_model, heads, d_ff
    NUM_LAYERS = 2

    root = jax.random.PRNGKey(0)
    k_param, k_x, k_enc = jax.random.split(root, 3)

    params = init_decoder_params(k_param, NUM_LAYERS, D, DFF)

    x = jax.random.normal(k_x, (B, T, D), jnp.float32)
    enc_out = jax.random.normal(k_enc, (B, S, D), jnp.float32)

    # causal mask for self-attention: [B, T, T], 1 = attend
    tgt_mask = jnp.broadcast_to(jnp.tril(jnp.ones((T, T), jnp.float32)), (B, T, T))
    # source validity mask: [B, T, S]; batch 1 has last two source tokens padded
    src_lens = jnp.array([S, S - 2], jnp.int32)
    src_valid = (jnp.arange(S)[None, :] < src_lens[:, None]).astype(jnp.float32)
    src_mask = jnp.broadcast_to(src_valid[:, None, :], (B, T, S))

    fwd = jax.jit(functools.partial(decoder_forward, num_heads=H))
    out = fwd(x, enc_out, tgt_mask, src_mask, params)
    out = jax.block_until_ready(out)

    assert out.shape == (B, T, D) and out.dtype == jnp.float32
    assert bool(jnp.all(jnp.isfinite(out)))
    print("KERNEL_OK")
</pallas_src>

<mosaic_0001>
module attributes {stable_mosaic.version = 11 : i64} {
  func.func @_decoder_stack_kernel(%arg0: i32, %arg1: memref<16x32xf32, #tpu.memory_space<vmem>>, %arg2: memref<16x32xf32, #tpu.memory_space<vmem>>, %arg3: memref<2x8x8xf32, #tpu.memory_space<vmem>>, %arg4: memref<2x8x8xf32, #tpu.memory_space<vmem>>, %arg5: memref<1x4x32x8xf32, #tpu.memory_space<vmem>>, %arg6: memref<1x4x1x8xf32, #tpu.memory_space<vmem>>, %arg7: memref<1x4x32x8xf32, #tpu.memory_space<vmem>>, %arg8: memref<1x4x1x8xf32, #tpu.memory_space<vmem>>, %arg9: memref<1x4x32x8xf32, #tpu.memory_space<vmem>>, %arg10: memref<1x4x1x8xf32, #tpu.memory_space<vmem>>, %arg11: memref<1x4x8x32xf32, #tpu.memory_space<vmem>>, %arg12: memref<1x1x32xf32, #tpu.memory_space<vmem>>, %arg13: memref<1x4x32x8xf32, #tpu.memory_space<vmem>>, %arg14: memref<1x4x1x8xf32, #tpu.memory_space<vmem>>, %arg15: memref<1x4x32x8xf32, #tpu.memory_space<vmem>>, %arg16: memref<1x4x1x8xf32, #tpu.memory_space<vmem>>, %arg17: memref<1x4x32x8xf32, #tpu.memory_space<vmem>>, %arg18: memref<1x4x1x8xf32, #tpu.memory_space<vmem>>, %arg19: memref<1x4x8x32xf32, #tpu.memory_space<vmem>>, %arg20: memref<1x1x32xf32, #tpu.memory_space<vmem>>, %arg21: memref<1x32x64xf32, #tpu.memory_space<vmem>>, %arg22: memref<1x1x64xf32, #tpu.memory_space<vmem>>, %arg23: memref<1x64x32xf32, #tpu.memory_space<vmem>>, %arg24: memref<1x1x32xf32, #tpu.memory_space<vmem>>, %arg25: memref<1x1x32xf32, #tpu.memory_space<vmem>>, %arg26: memref<1x1x32xf32, #tpu.memory_space<vmem>>, %arg27: memref<1x1x32xf32, #tpu.memory_space<vmem>>, %arg28: memref<1x1x32xf32, #tpu.memory_space<vmem>>, %arg29: memref<1x1x32xf32, #tpu.memory_space<vmem>>, %arg30: memref<1x1x32xf32, #tpu.memory_space<vmem>>, %arg31: memref<1x32xf32, #tpu.memory_space<vmem>>, %arg32: memref<1x32xf32, #tpu.memory_space<vmem>>, %arg33: memref<16x32xf32, #tpu.memory_space<vmem>>, %arg34: memref<16x32xf32, #tpu.memory_space<vmem>>) attributes {dimension_semantics = [#tpu.dimension_semantics<arbitrary>], iteration_bounds = array<i64: 2>, scalar_prefetch = 0 : i64, scratch_operands = 1 : i64, tpu.core_type = #tpu.core_type<tc>, window_params = [{pipeline_mode = #tpu.pipeline_mode<synchronous>, transform_indices = @transform_0, window_bounds = array<i64: 16, 32>}, {pipeline_mode = #tpu.pipeline_mode<synchronous>, transform_indices = @transform_1, window_bounds = array<i64: 16, 32>}, {pipeline_mode = #tpu.pipeline_mode<synchronous>, transform_indices = @transform_2, window_bounds = array<i64: 2, 8, 8>}, {pipeline_mode = #tpu.pipeline_mode<synchronous>, transform_indices = @transform_3, window_bounds = array<i64: 2, 8, 8>}, {transform_indices = @transform_4, window_bounds = array<i64: 1, 4, 32, 8>}, {transform_indices = @transform_5, window_bounds = array<i64: 1, 4, 1, 8>}, {transform_indices = @transform_6, window_bounds = array<i64: 1, 4, 32, 8>}, {transform_indices = @transform_7, window_bounds = array<i64: 1, 4, 1, 8>}, {transform_indices = @transform_8, window_bounds = array<i64: 1, 4, 32, 8>}, {transform_indices = @transform_9, window_bounds = array<i64: 1, 4, 1, 8>}, {transform_indices = @transform_10, window_bounds = array<i64: 1, 4, 8, 32>}, {transform_indices = @transform_11, window_bounds = array<i64: 1, 1, 32>}, {transform_indices = @transform_12, window_bounds = array<i64: 1, 4, 32, 8>}, {transform_indices = @transform_13, window_bounds = array<i64: 1, 4, 1, 8>}, {transform_indices = @transform_14, window_bounds = array<i64: 1, 4, 32, 8>}, {transform_indices = @transform_15, window_bounds = array<i64: 1, 4, 1, 8>}, {transform_indices = @transform_16, window_bounds = array<i64: 1, 4, 32, 8>}, {transform_indices = @transform_17, window_bounds = array<i64: 1, 4, 1, 8>}, {transform_indices = @transform_18, window_bounds = array<i64: 1, 4, 8, 32>}, {transform_indices = @transform_19, window_bounds = array<i64: 1, 1, 32>}, {transform_indices = @transform_20, window_bounds = array<i64: 1, 32, 64>}, {transform_indices = @transform_21, window_bounds = array<i64: 1, 1, 64>}, {transform_indices = @transform_22, window_bounds = array<i64: 1, 64, 32>}, {transform_indices = @transform_23, window_bounds = array<i64: 1, 1, 32>}, {transform_indices = @transform_24, window_bounds = array<i64: 1, 1, 32>}, {transform_indices = @transform_25, window_bounds = array<i64: 1, 1, 32>}, {transform_indices = @transform_26, window_bounds = array<i64: 1, 1, 32>}, {transform_indices = @transform_27, window_bounds = array<i64: 1, 1, 32>}, {transform_indices = @transform_28, window_bounds = array<i64: 1, 1, 32>}, {transform_indices = @transform_29, window_bounds = array<i64: 1, 1, 32>}, {pipeline_mode = #tpu.pipeline_mode<synchronous>, transform_indices = @transform_30, window_bounds = array<i64: 1, 32>}, {pipeline_mode = #tpu.pipeline_mode<synchronous>, transform_indices = @transform_31, window_bounds = array<i64: 1, 32>}, {pipeline_mode = #tpu.pipeline_mode<synchronous>, transform_indices = @transform_32, window_bounds = array<i64: 16, 32>}]} {
    %c0_i32 = arith.constant 0 : i32
    %0 = arith.cmpi eq, %arg0, %c0_i32 : i32
    %1 = arith.extui %0 : i1 to i32
    %c0_i32_0 = arith.constant 0 : i32
    %2 = arith.cmpi ne, %1, %c0_i32_0 : i32
    scf.if %2 {
      %c0_359 = arith.constant 0 : index
      %c0_360 = arith.constant 0 : index
      %466 = vector.load %arg1[%c0_359, %c0_360] : memref<16x32xf32, #tpu.memory_space<vmem>>, vector<16x32xf32>
      %c0_361 = arith.constant 0 : index
      %c0_362 = arith.constant 0 : index
      %467 = vector.load %arg34[%c0_361, %c0_362] : memref<16x32xf32, #tpu.memory_space<vmem>>, vector<16x32xf32>
      tpu.vector_store %arg34[%c0_361, %c0_362], %466 {strides = array<i32>} : memref<16x32xf32, #tpu.memory_space<vmem>>, vector<16x32xf32>,
    } else {
    }
    %c0 = arith.constant 0 : index
    %c0_1 = arith.constant 0 : index
    %3 = vector.load %arg34[%c0, %c0_1] : memref<16x32xf32, #tpu.memory_space<vmem>>, vector<16x32xf32>
    %c0_2 = arith.constant 0 : index
    %c0_3 = arith.constant 0 : index
    %4 = vector.load %arg2[%c0_2, %c0_3] : memref<16x32xf32, #tpu.memory_space<vmem>>, vector<16x32xf32>
    %c0_4 = arith.constant 0 : index
    %c0_5 = arith.constant 0 : index
    %c0_6 = arith.constant 0 : index
    %5 = vector.load %arg3[%c0_4, %c0_5, %c0_6] : memref<2x8x8xf32, #tpu.memory_space<vmem>>, vector<2x8x8xf32>
    %c0_7 = arith.constant 0 : index
    %c0_8 = arith.constant 0 : index
    %c0_9 = arith.constant 0 : index
    %6 = vector.load %arg12[%c0_7, %c0_8, %c0_9] : memref<1x1x32xf32, #tpu.memory_space<vmem>>, vector<1x1x32xf32>
    %7 = vector.shape_cast %6 : vector<1x1x32xf32> to vector<1x32xf32>
    %c0_10 = arith.constant 0 : index
    %c0_11 = arith.constant 0 : index
    %c0_12 = arith.constant 0 : index
    %c0_13 = arith.constant 0 : index
    %8 = vector.load %arg5[%c0_10, %c0_11, %c0_12, %c0_13] : memref<1x4x32x8xf32, #tpu.memory_space<vmem>>, vector<1x1x32x8xf32>
    %9 = vector.shape_cast %8 : vector<1x1x32x8xf32> to vector<32x8xf32>
    %cst = arith.constant dense<0.000000e+00> : vector<16x8xf32>
    %10 = tpu.matmul %3, %9, %cst {dimension_numbers = #tpu.dot_dimension_numbers<[1], [0], [0], [1], [0, 0, 1, 1], [], []>} : vector<16x32xf32>, vector<32x8xf32>, vector<16x8xf32> -> vector<16x8xf32>
    %c0_14 = arith.constant 0 : index
    %c0_15 = arith.constant 0 : index
    %c0_16 = arith.constant 0 : index
    %c0_17 = arith.constant 0 : index
    %11 = vector.load %arg6[%c0_14, %c0_15, %c0_16, %c0_17] : memref<1x4x1x8xf32, #tpu.memory_space<vmem>>, vector<1x1x1x8xf32>
    %12 = vector.shape_cast %11 : vector<1x1x1x8xf32> to vector<1x8xf32>
    %13 = vector.broadcast %12 : vector<1x8xf32> to vector<16x8xf32>
    %14 = arith.addf %10, %13 : vector<16x8xf32>
    %15 = vector.shape_cast %14 : vector<16x8xf32> to vector<2x8x8xf32>
    %c0_18 = arith.constant 0 : index
    %c0_19 = arith.constant 0 : index
    %c0_20 = arith.constant 0 : index
    %c0_21 = arith.constant 0 : index
    %16 = vector.load %arg7[%c0_18, %c0_19, %c0_20, %c0_21] : memref<1x4x32x8xf32, #tpu.memory_space<vmem>>, vector<1x1x32x8xf32>
    %17 = vector.shape_cast %16 : vector<1x1x32x8xf32> to vector<32x8xf32>
    %cst_22 = arith.constant dense<0.000000e+00> : vector<16x8xf32>
    %18 = tpu.matmul %3, %17, %cst_22 {dimension_numbers = #tpu.dot_dimension_numbers<[1], [0], [0], [1], [0, 0, 1, 1], [], []>} : vector<16x32xf32>, vector<32x8xf32>, vector<16x8xf32> -> vector<16x8xf32>
    %c0_23 = arith.constant 0 : index
    %c0_24 = arith.constant 0 : index
    %c0_25 = arith.constant 0 : index
    %c0_26 = arith.constant 0 : index
    %19 = vector.load %arg8[%c0_23, %c0_24, %c0_25, %c0_26] : memref<1x4x1x8xf32, #tpu.memory_space<vmem>>, vector<1x1x1x8xf32>
    %20 = vector.shape_cast %19 : vector<1x1x1x8xf32> to vector<1x8xf32>
    %21 = vector.broadcast %20 : vector<1x8xf32> to vector<16x8xf32>
    %22 = arith.addf %18, %21 : vector<16x8xf32>
    %23 = vector.shape_cast %22 : vector<16x8xf32> to vector<2x8x8xf32>
    %c0_27 = arith.constant 0 : index
    %c0_28 = arith.constant 0 : index
    %c0_29 = arith.constant 0 : index
    %c0_30 = arith.constant 0 : index
    %24 = vector.load %arg9[%c0_27, %c0_28, %c0_29, %c0_30] : memref<1x4x32x8xf32, #tpu.memory_space<vmem>>, vector<1x1x32x8xf32>
    %25 = vector.shape_cast %24 : vector<1x1x32x8xf32> to vector<32x8xf32>
    %cst_31 = arith.constant dense<0.000000e+00> : vector<16x8xf32>
    %26 = tpu.matmul %3, %25, %cst_31 {dimension_numbers = #tpu.dot_dimension_numbers<[1], [0], [0], [1], [0, 0, 1, 1], [], []>} : vector<16x32xf32>, vector<32x8xf32>, vector<16x8xf32> -> vector<16x8xf32>
    %c0_32 = arith.constant 0 : index
    %c0_33 = arith.constant 0 : index
    %c0_34 = arith.constant 0 : index
    %c0_35 = arith.constant 0 : index
    %27 = vector.load %arg10[%c0_32, %c0_33, %c0_34, %c0_35] : memref<1x4x1x8xf32, #tpu.memory_space<vmem>>, vector<1x1x1x8xf32>
    %28 = vector.shape_cast %27 : vector<1x1x1x8xf32> to vector<1x8xf32>
    %29 = vector.broadcast %28 : vector<1x8xf32> to vector<16x8xf32>
    %30 = arith.addf %26, %29 : vector<16x8xf32>
    %31 = vector.shape_cast %30 : vector<16x8xf32> to vector<2x8x8xf32>
    "tpu.trace_start"() <{level = 10 : i32, message = "bqd,bkd->bqk"}> : () -> ()
    %cst_36 = arith.constant dense<0.000000e+00> : vector<2x8x8xf32>
    %32 = tpu.matmul %15, %23, %cst_36 {dimension_numbers = #tpu.dot_dimension_numbers<[2], [2], [1], [1], [0, 0, 0, 1, 1, 1], [0], [0]>} : vector<2x8x8xf32>, vector<2x8x8xf32>, vector<2x8x8xf32> -> vector<2x8x8xf32>
    "tpu.trace_stop"() : () -> ()
    %cst_37 = arith.constant 0.353553385 : f32
    %33 = vector.broadcast %cst_37 : f32 to vector<2x8x8xf32>
    %34 = arith.mulf %32, %33 : vector<2x8x8xf32>
    %35 = arith.addf %34, %5 : vector<2x8x8xf32>
    %cst_38 = arith.constant dense<0xFF800000> : vector<2x8xf32>
    %36 = vector.multi_reduction <maximumf>, %35, %cst_38 [2] : vector<2x8x8xf32> to vector<2x8xf32>
    %37 = vector.shape_cast %36 : vector<2x8xf32> to vector<2x8x1xf32>
    %38 = vector.broadcast %37 : vector<2x8x1xf32> to vector<2x8x8xf32>
    %39 = arith.subf %35, %38 : vector<2x8x8xf32>
    %40 = math.exp %39 : vector<2x8x8xf32>
    %cst_39 = arith.constant dense<0.000000e+00> : vector<2x8xf32>
    %41 = vector.multi_reduction <add>, %40, %cst_39 [2] : vector<2x8x8xf32> to vector<2x8xf32>
    %42 = vector.shape_cast %41 : vector<2x8xf32> to vector<2x8x1xf32>
    %43 = tpu.reciprocal %42 {approx = true} : vector<2x8x1xf32> -> vector<2x8x1xf32>
    %44 = vector.broadcast %43 : vector<2x8x1xf32> to vector<2x8x8xf32>
    %45 = arith.mulf %40, %44 : vector<2x8x8xf32>
    "tpu.trace_start"() <{level = 10 : i32, message = "bqk,bkd->bqd"}> : () -> ()
    %cst_40 = arith.constant dense<0.000000e+00> : vector<2x8x8xf32>
    %46 = tpu.matmul %45, %31, %cst_40 {dimension_numbers = #tpu.dot_dimension_numbers<[2], [1], [1], [2], [0, 0, 0, 1, 1, 2], [0], [0]>} : vector<2x8x8xf32>, vector<2x8x8xf32>, vector<2x8x8xf32> -> vector<2x8x8xf32>
    "tpu.trace_stop"() : () -> ()
    %47 = vector.shape_cast %46 : vector<2x8x8xf32> to vector<16x8xf32>
    %c0_41 = arith.constant 0 : index
    %c0_42 = arith.constant 0 : index
    %c0_43 = arith.constant 0 : index
    %c0_44 = arith.constant 0 : index
    %48 = vector.load %arg11[%c0_41, %c0_42, %c0_43, %c0_44] : memref<1x4x8x32xf32, #tpu.memory_space<vmem>>, vector<1x1x8x32xf32>
    %49 = vector.shape_cast %48 : vector<1x1x8x32xf32> to vector<8x32xf32>
    %cst_45 = arith.constant dense<0.000000e+00> : vector<16x32xf32>
    %50 = tpu.matmul %47, %49, %cst_45 {dimension_numbers = #tpu.dot_dimension_numbers<[1], [0], [0], [1], [0, 0, 1, 1], [], []>} : vector<16x8xf32>, vector<8x32xf32>, vector<16x32xf32> -> vector<16x32xf32>
    %51 = vector.broadcast %7 : vector<1x32xf32> to vector<16x32xf32>
    %52 = arith.addf %51, %50 : vector<16x32xf32>
    %c0_46 = arith.constant 0 : index
    %c1 = arith.constant 1 : index
    %c0_47 = arith.constant 0 : index
    %c0_48 = arith.constant 0 : index
    %53 = vector.load %arg5[%c0_46, %c1, %c0_47, %c0_48] : memref<1x4x32x8xf32, #tpu.memory_space<vmem>>, vector<1x1x32x8xf32>
    %54 = vector.shape_cast %53 : vector<1x1x32x8xf32> to vector<32x8xf32>
    %cst_49 = arith.constant dense<0.000000e+00> : vector<16x8xf32>
    %55 = tpu.matmul %3, %54, %cst_49 {dimension_numbers = #tpu.dot_dimension_numbers<[1], [0], [0], [1], [0, 0, 1, 1], [], []>} : vector<16x32xf32>, vector<32x8xf32>, vector<16x8xf32> -> vector<16x8xf32>
    %c0_50 = arith.constant 0 : index
    %c1_51 = arith.constant 1 : index
    %c0_52 = arith.constant 0 : index
    %c0_53 = arith.constant 0 : index
    %56 = vector.load %arg6[%c0_50, %c1_51, %c0_52, %c0_53] : memref<1x4x1x8xf32, #tpu.memory_space<vmem>>, vector<1x1x1x8xf32>
    %57 = vector.shape_cast %56 : vector<1x1x1x8xf32> to vector<1x8xf32>
    %58 = vector.broadcast %57 : vector<1x8xf32> to vector<16x8xf32>
    %59 = arith.addf %55, %58 : vector<16x8xf32>
    %60 = vector.shape_cast %59 : vector<16x8xf32> to vector<2x8x8xf32>
    %c0_54 = arith.constant 0 : index
    %c1_55 = arith.constant 1 : index
    %c0_56 = arith.constant 0 : index
    %c0_57 = arith.constant 0 : index
    %61 = vector.load %arg7[%c0_54, %c1_55, %c0_56, %c0_57] : memref<1x4x32x8xf32, #tpu.memory_space<vmem>>, vector<1x1x32x8xf32>
    %62 = vector.shape_cast %61 : vector<1x1x32x8xf32> to vector<32x8xf32>
    %cst_58 = arith.constant dense<0.000000e+00> : vector<16x8xf32>
    %63 = tpu.matmul %3, %62, %cst_58 {dimension_numbers = #tpu.dot_dimension_numbers<[1], [0], [0], [1], [0, 0, 1, 1], [], []>} : vector<16x32xf32>, vector<32x8xf32>, vector<16x8xf32> -> vector<16x8xf32>
    %c0_59 = arith.constant 0 : index
    %c1_60 = arith.constant 1 : index
    %c0_61 = arith.constant 0 : index
    %c0_62 = arith.constant 0 : index
    %64 = vector.load %arg8[%c0_59, %c1_60, %c0_61, %c0_62] : memref<1x4x1x8xf32, #tpu.memory_space<vmem>>, vector<1x1x1x8xf32>
    %65 = vector.shape_cast %64 : vector<1x1x1x8xf32> to vector<1x8xf32>
    %66 = vector.broadcast %65 : vector<1x8xf32> to vector<16x8xf32>
    %67 = arith.addf %63, %66 : vector<16x8xf32>
    %68 = vector.shape_cast %67 : vector<16x8xf32> to vector<2x8x8xf32>
    %c0_63 = arith.constant 0 : index
    %c1_64 = arith.constant 1 : index
    %c0_65 = arith.constant 0 : index
    %c0_66 = arith.constant 0 : index
    %69 = vector.load %arg9[%c0_63, %c1_64, %c0_65, %c0_66] : memref<1x4x32x8xf32, #tpu.memory_space<vmem>>, vector<1x1x32x8xf32>
    %70 = vector.shape_cast %69 : vector<1x1x32x8xf32> to vector<32x8xf32>
    %cst_67 = arith.constant dense<0.000000e+00> : vector<16x8xf32>
    %71 = tpu.matmul %3, %70, %cst_67 {dimension_numbers = #tpu.dot_dimension_numbers<[1], [0], [0], [1], [0, 0, 1, 1], [], []>} : vector<16x32xf32>, vector<32x8xf32>, vector<16x8xf32> -> vector<16x8xf32>
    %c0_68 = arith.constant 0 : index
    %c1_69 = arith.constant 1 : index
    %c0_70 = arith.constant 0 : index
    %c0_71 = arith.constant 0 : index
    %72 = vector.load %arg10[%c0_68, %c1_69, %c0_70, %c0_71] : memref<1x4x1x8xf32, #tpu.memory_space<vmem>>, vector<1x1x1x8xf32>
    %73 = vector.shape_cast %72 : vector<1x1x1x8xf32> to vector<1x8xf32>
    %74 = vector.broadcast %73 : vector<1x8xf32> to vector<16x8xf32>
    %75 = arith.addf %71, %74 : vector<16x8xf32>
    %76 = vector.shape_cast %75 : vector<16x8xf32> to vector<2x8x8xf32>
    "tpu.trace_start"() <{level = 10 : i32, message = "bqd,bkd->bqk"}> : () -> ()
    %cst_72 = arith.constant dense<0.000000e+00> : vector<2x8x8xf32>
    %77 = tpu.matmul %60, %68, %cst_72 {dimension_numbers = #tpu.dot_dimension_numbers<[2], [2], [1], [1], [0, 0, 0, 1, 1, 1], [0], [0]>} : vector<2x8x8xf32>, vector<2x8x8xf32>, vector<2x8x8xf32> -> vector<2x8x8xf32>
    "tpu.trace_stop"() : () -> ()
    %cst_73 = arith.constant 0.353553385 : f32
    %78 = vector.broadcast %cst_73 : f32 to vector<2x8x8xf32>
    %79 = arith.mulf %77, %78 : vector<2x8x8xf32>
    %80 = arith.addf %79, %5 : vector<2x8x8xf32>
    %cst_74 = arith.constant dense<0xFF800000> : vector<2x8xf32>
    %81 = vector.multi_reduction <maximumf>, %80, %cst_74 [2] : vector<2x8x8xf32> to vector<2x8xf32>
    %82 = vector.shape_cast %81 : vector<2x8xf32> to vector<2x8x1xf32>
    %83 = vector.broadcast %82 : vector<2x8x1xf32> to vector<2x8x8xf32>
    %84 = arith.subf %80, %83 : vector<2x8x8xf32>
    %85 = math.exp %84 : vector<2x8x8xf32>
    %cst_75 = arith.constant dense<0.000000e+00> : vector<2x8xf32>
    %86 = vector.multi_reduction <add>, %85, %cst_75 [2] : vector<2x8x8xf32> to vector<2x8xf32>
    %87 = vector.shape_cast %86 : vector<2x8xf32> to vector<2x8x1xf32>
    %88 = tpu.reciprocal %87 {approx = true} : vector<2x8x1xf32> -> vector<2x8x1xf32>
    %89 = vector.broadcast %88 : vector<2x8x1xf32> to vector<2x8x8xf32>
    %90 = arith.mulf %85, %89 : vector<2x8x8xf32>
    "tpu.trace_start"() <{level = 10 : i32, message = "bqk,bkd->bqd"}> : () -> ()
    %cst_76 = arith.constant dense<0.000000e+00> : vector<2x8x8xf32>
    %91 = tpu.matmul %90, %76, %cst_76 {dimension_numbers = #tpu.dot_dimension_numbers<[2], [1], [1], [2], [0, 0, 0, 1, 1, 2], [0], [0]>} : vector<2x8x8xf32>, vector<2x8x8xf32>, vector<2x8x8xf32> -> vector<2x8x8xf32>
    "tpu.trace_stop"() : () -> ()
    %92 = vector.shape_cast %91 : vector<2x8x8xf32> to vector<16x8xf32>
    %c0_77 = arith.constant 0 : index
    %c1_78 = arith.constant 1 : index
    %c0_79 = arith.constant 0 : index
    %c0_80 = arith.constant 0 : index
    %93 = vector.load %arg11[%c0_77, %c1_78, %c0_79, %c0_80] : memref<1x4x8x32xf32, #tpu.memory_space<vmem>>, vector<1x1x8x32xf32>
    %94 = vector.shape_cast %93 : vector<1x1x8x32xf32> to vector<8x32xf32>
    %cst_81 = arith.constant dense<0.000000e+00> : vector<16x32xf32>
    %95 = tpu.matmul %92, %94, %cst_81 {dimension_numbers = #tpu.dot_dimension_numbers<[1], [0], [0], [1], [0, 0, 1, 1], [], []>} : vector<16x8xf32>, vector<8x32xf32>, vector<16x32xf32> -> vector<16x32xf32>
    %96 = arith.addf %52, %95 : vector<16x32xf32>
    %c0_82 = arith.constant 0 : index
    %c2 = arith.constant 2 : index
    %c0_83 = arith.constant 0 : index
    %c0_84 = arith.constant 0 : index
    %97 = vector.load %arg5[%c0_82, %c2, %c0_83, %c0_84] : memref<1x4x32x8xf32, #tpu.memory_space<vmem>>, vector<1x1x32x8xf32>
    %98 = vector.shape_cast %97 : vector<1x1x32x8xf32> to vector<32x8xf32>
    %cst_85 = arith.constant dense<0.000000e+00> : vector<16x8xf32>
    %99 = tpu.matmul %3, %98, %cst_85 {dimension_numbers = #tpu.dot_dimension_numbers<[1], [0], [0], [1], [0, 0, 1, 1], [], []>} : vector<16x32xf32>, vector<32x8xf32>, vector<16x8xf32> -> vector<16x8xf32>
    %c0_86 = arith.constant 0 : index
    %c2_87 = arith.constant 2 : index
    %c0_88 = arith.constant 0 : index
    %c0_89 = arith.constant 0 : index
    %100 = vector.load %arg6[%c0_86, %c2_87, %c0_88, %c0_89] : memref<1x4x1x8xf32, #tpu.memory_space<vmem>>, vector<1x1x1x8xf32>
    %101 = vector.shape_cast %100 : vector<1x1x1x8xf32> to vector<1x8xf32>
    %102 = vector.broadcast %101 : vector<1x8xf32> to vector<16x8xf32>
    %103 = arith.addf %99, %102 : vector<16x8xf32>
    %104 = vector.shape_cast %103 : vector<16x8xf32> to vector<2x8x8xf32>
    %c0_90 = arith.constant 0 : index
    %c2_91 = arith.constant 2 : index
    %c0_92 = arith.constant 0 : index
    %c0_93 = arith.constant 0 : index
    %105 = vector.load %arg7[%c0_90, %c2_91, %c0_92, %c0_93] : memref<1x4x32x8xf32, #tpu.memory_space<vmem>>, vector<1x1x32x8xf32>
    %106 = vector.shape_cast %105 : vector<1x1x32x8xf32> to vector<32x8xf32>
    %cst_94 = arith.constant dense<0.000000e+00> : vector<16x8xf32>
    %107 = tpu.matmul %3, %106, %cst_94 {dimension_numbers = #tpu.dot_dimension_numbers<[1], [0], [0], [1], [0, 0, 1, 1], [], []>} : vector<16x32xf32>, vector<32x8xf32>, vector<16x8xf32> -> vector<16x8xf32>
    %c0_95 = arith.constant 0 : index
    %c2_96 = arith.constant 2 : index
    %c0_97 = arith.constant 0 : index
    %c0_98 = arith.constant 0 : index
    %108 = vector.load %arg8[%c0_95, %c2_96, %c0_97, %c0_98] : memref<1x4x1x8xf32, #tpu.memory_space<vmem>>, vector<1x1x1x8xf32>
    %109 = vector.shape_cast %108 : vector<1x1x1x8xf32> to vector<1x8xf32>
    %110 = vector.broadcast %109 : vector<1x8xf32> to vector<16x8xf32>
    %111 = arith.addf %107, %110 : vector<16x8xf32>
    %112 = vector.shape_cast %111 : vector<16x8xf32> to vector<2x8x8xf32>
    %c0_99 = arith.constant 0 : index
    %c2_100 = arith.constant 2 : index
    %c0_101 = arith.constant 0 : index
    %c0_102 = arith.constant 0 : index
    %113 = vector.load %arg9[%c0_99, %c2_100, %c0_101, %c0_102] : memref<1x4x32x8xf32, #tpu.memory_space<vmem>>, vector<1x1x32x8xf32>
    %114 = vector.shape_cast %113 : vector<1x1x32x8xf32> to vector<32x8xf32>
    %cst_103 = arith.constant dense<0.000000e+00> : vector<16x8xf32>
    %115 = tpu.matmul %3, %114, %cst_103 {dimension_numbers = #tpu.dot_dimension_numbers<[1], [0], [0], [1], [0, 0, 1, 1], [], []>} : vector<16x32xf32>, vector<32x8xf32>, vector<16x8xf32> -> vector<16x8xf32>
    %c0_104 = arith.constant 0 : index
    %c2_105 = arith.constant 2 : index
    %c0_106 = arith.constant 0 : index
    %c0_107 = arith.constant 0 : index
    %116 = vector.load %arg10[%c0_104, %c2_105, %c0_106, %c0_107] : memref<1x4x1x8xf32, #tpu.memory_space<vmem>>, vector<1x1x1x8xf32>
    %117 = vector.shape_cast %116 : vector<1x1x1x8xf32> to vector<1x8xf32>
    %118 = vector.broadcast %117 : vector<1x8xf32> to vector<16x8xf32>
    %119 = arith.addf %115, %118 : vector<16x8xf32>
    %120 = vector.shape_cast %119 : vector<16x8xf32> to vector<2x8x8xf32>
    "tpu.trace_start"() <{level = 10 : i32, message = "bqd,bkd->bqk"}> : () -> ()
    %cst_108 = arith.constant dense<0.000000e+00> : vector<2x8x8xf32>
    %121 = tpu.matmul %104, %112, %cst_108 {dimension_numbers = #tpu.dot_dimension_numbers<[2], [2], [1], [1], [0, 0, 0, 1, 1, 1], [0], [0]>} : vector<2x8x8xf32>, vector<2x8x8xf32>, vector<2x8x8xf32> -> vector<2x8x8xf32>
    "tpu.trace_stop"() : () -> ()
    %cst_109 = arith.constant 0.353553385 : f32
    %122 = vector.broadcast %cst_109 : f32 to vector<2x8x8xf32>
    %123 = arith.mulf %121, %122 : vector<2x8x8xf32>
    %124 = arith.addf %123, %5 : vector<2x8x8xf32>
    %cst_110 = arith.constant dense<0xFF800000> : vector<2x8xf32>
    %125 = vector.multi_reduction <maximumf>, %124, %cst_110 [2] : vector<2x8x8xf32> to vector<2x8xf32>
    %126 = vector.shape_cast %125 : vector<2x8xf32> to vector<2x8x1xf32>
    %127 = vector.broadcast %126 : vector<2x8x1xf32> to vector<2x8x8xf32>
    %128 = arith.subf %124, %127 : vector<2x8x8xf32>
    %129 = math.exp %128 : vector<2x8x8xf32>
    %cst_111 = arith.constant dense<0.000000e+00> : vector<2x8xf32>
    %130 = vector.multi_reduction <add>, %129, %cst_111 [2] : vector<2x8x8xf32> to vector<2x8xf32>
    %131 = vector.shape_cast %130 : vector<2x8xf32> to vector<2x8x1xf32>
    %132 = tpu.reciprocal %131 {approx = true} : vector<2x8x1xf32> -> vector<2x8x1xf32>
    %133 = vector.broadcast %132 : vector<2x8x1xf32> to vector<2x8x8xf32>
    %134 = arith.mulf %129, %133 : vector<2x8x8xf32>
    "tpu.trace_start"() <{level = 10 : i32, message = "bqk,bkd->bqd"}> : () -> ()
    %cst_112 = arith.constant dense<0.000000e+00> : vector<2x8x8xf32>
    %135 = tpu.matmul %134, %120, %cst_112 {dimension_numbers = #tpu.dot_dimension_numbers<[2], [1], [1], [2], [0, 0, 0, 1, 1, 2], [0], [0]>} : vector<2x8x8xf32>, vector<2x8x8xf32>, vector<2x8x8xf32> -> vector<2x8x8xf32>
    "tpu.trace_stop"() : () -> ()
    %136 = vector.shape_cast %135 : vector<2x8x8xf32> to vector<16x8xf32>
    %c0_113 = arith.constant 0 : index
    %c2_114 = arith.constant 2 : index
    %c0_115 = arith.constant 0 : index
    %c0_116 = arith.constant 0 : index
    %137 = vector.load %arg11[%c0_113, %c2_114, %c0_115, %c0_116] : memref<1x4x8x32xf32, #tpu.memory_space<vmem>>, vector<1x1x8x32xf32>
    %138 = vector.shape_cast %137 : vector<1x1x8x32xf32> to vector<8x32xf32>
    %cst_117 = arith.constant dense<0.000000e+00> : vector<16x32xf32>
    %139 = tpu.matmul %136, %138, %cst_117 {dimension_numbers = #tpu.dot_dimension_numbers<[1], [0], [0], [1], [0, 0, 1, 1], [], []>} : vector<16x8xf32>, vector<8x32xf32>, vector<16x32xf32> -> vector<16x32xf32>
    %140 = arith.addf %96, %139 : vector<16x32xf32>
    %c0_118 = arith.constant 0 : index
    %c3 = arith.constant 3 : index
    %c0_119 = arith.constant 0 : index
    %c0_120 = arith.constant 0 : index
    %141 = vector.load %arg5[%c0_118, %c3, %c0_119, %c0_120] : memref<1x4x32x8xf32, #tpu.memory_space<vmem>>, vector<1x1x32x8xf32>
    %142 = vector.shape_cast %141 : vector<1x1x32x8xf32> to vector<32x8xf32>
    %cst_121 = arith.constant dense<0.000000e+00> : vector<16x8xf32>
    %143 = tpu.matmul %3, %142, %cst_121 {dimension_numbers = #tpu.dot_dimension_numbers<[1], [0], [0], [1], [0, 0, 1, 1], [], []>} : vector<16x32xf32>, vector<32x8xf32>, vector<16x8xf32> -> vector<16x8xf32>
    %c0_122 = arith.constant 0 : index
    %c3_123 = arith.constant 3 : index
    %c0_124 = arith.constant 0 : index
    %c0_125 = arith.constant 0 : index
    %144 = vector.load %arg6[%c0_122, %c3_123, %c0_124, %c0_125] : memref<1x4x1x8xf32, #tpu.memory_space<vmem>>, vector<1x1x1x8xf32>
    %145 = vector.shape_cast %144 : vector<1x1x1x8xf32> to vector<1x8xf32>
    %146 = vector.broadcast %145 : vector<1x8xf32> to vector<16x8xf32>
    %147 = arith.addf %143, %146 : vector<16x8xf32>
    %148 = vector.shape_cast %147 : vector<16x8xf32> to vector<2x8x8xf32>
    %c0_126 = arith.constant 0 : index
    %c3_127 = arith.constant 3 : index
    %c0_128 = arith.constant 0 : index
    %c0_129 = arith.constant 0 : index
    %149 = vector.load %arg7[%c0_126, %c3_127, %c0_128, %c0_129] : memref<1x4x32x8xf32, #tpu.memory_space<vmem>>, vector<1x1x32x8xf32>
    %150 = vector.shape_cast %149 : vector<1x1x32x8xf32> to vector<32x8xf32>
    %cst_130 = arith.constant dense<0.000000e+00> : vector<16x8xf32>
    %151 = tpu.matmul %3, %150, %cst_130 {dimension_numbers = #tpu.dot_dimension_numbers<[1], [0], [0], [1], [0, 0, 1, 1], [], []>} : vector<16x32xf32>, vector<32x8xf32>, vector<16x8xf32> -> vector<16x8xf32>
    %c0_131 = arith.constant 0 : index
    %c3_132 = arith.constant 3 : index
    %c0_133 = arith.constant 0 : index
    %c0_134 = arith.constant 0 : index
    %152 = vector.load %arg8[%c0_131, %c3_132, %c0_133, %c0_134] : memref<1x4x1x8xf32, #tpu.memory_space<vmem>>, vector<1x1x1x8xf32>
    %153 = vector.shape_cast %152 : vector<1x1x1x8xf32> to vector<1x8xf32>
    %154 = vector.broadcast %153 : vector<1x8xf32> to vector<16x8xf32>
    %155 = arith.addf %151, %154 : vector<16x8xf32>
    %156 = vector.shape_cast %155 : vector<16x8xf32> to vector<2x8x8xf32>
    %c0_135 = arith.constant 0 : index
    %c3_136 = arith.constant 3 : index
    %c0_137 = arith.constant 0 : index
    %c0_138 = arith.constant 0 : index
    %157 = vector.load %arg9[%c0_135, %c3_136, %c0_137, %c0_138] : memref<1x4x32x8xf32, #tpu.memory_space<vmem>>, vector<1x1x32x8xf32>
    %158 = vector.shape_cast %157 : vector<1x1x32x8xf32> to vector<32x8xf32>
    %cst_139 = arith.constant dense<0.000000e+00> : vector<16x8xf32>
    %159 = tpu.matmul %3, %158, %cst_139 {dimension_numbers = #tpu.dot_dimension_numbers<[1], [0], [0], [1], [0, 0, 1, 1], [], []>} : vector<16x32xf32>, vector<32x8xf32>, vector<16x8xf32> -> vector<16x8xf32>
    %c0_140 = arith.constant 0 : index
    %c3_141 = arith.constant 3 : index
    %c0_142 = arith.constant 0 : index
    %c0_143 = arith.constant 0 : index
    %160 = vector.load %arg10[%c0_140, %c3_141, %c0_142, %c0_143] : memref<1x4x1x8xf32, #tpu.memory_space<vmem>>, vector<1x1x1x8xf32>
    %161 = vector.shape_cast %160 : vector<1x1x1x8xf32> to vector<1x8xf32>
    %162 = vector.broadcast %161 : vector<1x8xf32> to vector<16x8xf32>
    %163 = arith.addf %159, %162 : vector<16x8xf32>
    %164 = vector.shape_cast %163 : vector<16x8xf32> to vector<2x8x8xf32>
    "tpu.trace_start"() <{level = 10 : i32, message = "bqd,bkd->bqk"}> : () -> ()
    %cst_144 = arith.constant dense<0.000000e+00> : vector<2x8x8xf32>
    %165 = tpu.matmul %148, %156, %cst_144 {dimension_numbers = #tpu.dot_dimension_numbers<[2], [2], [1], [1], [0, 0, 0, 1, 1, 1], [0], [0]>} : vector<2x8x8xf32>, vector<2x8x8xf32>, vector<2x8x8xf32> -> vector<2x8x8xf32>
    "tpu.trace_stop"() : () -> ()
    %cst_145 = arith.constant 0.353553385 : f32
    %166 = vector.broadcast %cst_145 : f32 to vector<2x8x8xf32>
    %167 = arith.mulf %165, %166 : vector<2x8x8xf32>
    %168 = arith.addf %167, %5 : vector<2x8x8xf32>
    %cst_146 = arith.constant dense<0xFF800000> : vector<2x8xf32>
    %169 = vector.multi_reduction <maximumf>, %168, %cst_146 [2] : vector<2x8x8xf32> to vector<2x8xf32>
    %170 = vector.shape_cast %169 : vector<2x8xf32> to vector<2x8x1xf32>
    %171 = vector.broadcast %170 : vector<2x8x1xf32> to vector<2x8x8xf32>
    %172 = arith.subf %168, %171 : vector<2x8x8xf32>
    %173 = math.exp %172 : vector<2x8x8xf32>
    %cst_147 = arith.constant dense<0.000000e+00> : vector<2x8xf32>
    %174 = vector.multi_reduction <add>, %173, %cst_147 [2] : vector<2x8x8xf32> to vector<2x8xf32>
    %175 = vector.shape_cast %174 : vector<2x8xf32> to vector<2x8x1xf32>
    %176 = tpu.reciprocal %175 {approx = true} : vector<2x8x1xf32> -> vector<2x8x1xf32>
    %177 = vector.broadcast %176 : vector<2x8x1xf32> to vector<2x8x8xf32>
    %178 = arith.mulf %173, %177 : vector<2x8x8xf32>
    "tpu.trace_start"() <{level = 10 : i32, message = "bqk,bkd->bqd"}> : () -> ()
    %cst_148 = arith.constant dense<0.000000e+00> : vector<2x8x8xf32>
    %179 = tpu.matmul %178, %164, %cst_148 {dimension_numbers = #tpu.dot_dimension_numbers<[2], [1], [1], [2], [0, 0, 0, 1, 1, 2], [0], [0]>} : vector<2x8x8xf32>, vector<2x8x8xf32>, vector<2x8x8xf32> -> vector<2x8x8xf32>
    "tpu.trace_stop"() : () -> ()
    %180 = vector.shape_cast %179 : vector<2x8x8xf32> to vector<16x8xf32>
    %c0_149 = arith.constant 0 : index
    %c3_150 = arith.constant 3 : index
    %c0_151 = arith.constant 0 : index
    %c0_152 = arith.constant 0 : index
    %181 = vector.load %arg11[%c0_149, %c3_150, %c0_151, %c0_152] : memref<1x4x8x32xf32, #tpu.memory_space<vmem>>, vector<1x1x8x32xf32>
    %182 = vector.shape_cast %181 : vector<1x1x8x32xf32> to vector<8x32xf32>
    %cst_153 = arith.constant dense<0.000000e+00> : vector<16x32xf32>
    %183 = tpu.matmul %180, %182, %cst_153 {dimension_numbers = #tpu.dot_dimension_numbers<[1], [0], [0], [1], [0, 0, 1, 1], [], []>} : vector<16x8xf32>, vector<8x32xf32>, vector<16x32xf32> -> vector<16x32xf32>
    %184 = arith.addf %140, %183 : vector<16x32xf32>
    %185 = arith.addf %3, %184 : vector<16x32xf32>
    %c0_154 = arith.constant 0 : index
    %c0_155 = arith.constant 0 : index
    %c0_156 = arith.constant 0 : index
    %186 = vector.load %arg25[%c0_154, %c0_155, %c0_156] : memref<1x1x32xf32, #tpu.memory_space<vmem>>, vector<1x1x32xf32>
    %187 = vector.shape_cast %186 : vector<1x1x32xf32> to vector<1x32xf32>
    %c0_157 = arith.constant 0 : index
    %c0_158 = arith.constant 0 : index
    %c0_159 = arith.constant 0 : index
    %188 = vector.load %arg26[%c0_157, %c0_158, %c0_159] : memref<1x1x32xf32, #tpu.memory_space<vmem>>, vector<1x1x32xf32>
    %189 = vector.shape_cast %188 : vector<1x1x32xf32> to vector<1x32xf32>
    %cst_160 = arith.constant dense<0.000000e+00> : vector<16xf32>
    %190 = vector.multi_reduction <add>, %185, %cst_160 [1] : vector<16x32xf32> to vector<16xf32>
    %191 = vector.shape_cast %190 : vector<16xf32> to vector<16x1xf32>
    %cst_161 = arith.constant 3.200000e+01 : f32
    %192 = vector.broadcast %cst_161 : f32 to vector<16x1xf32>
    %193 = arith.divf %191, %192 : vector<16x1xf32>
    %194 = vector.broadcast %193 : vector<16x1xf32> to vector<16x32xf32>
    %195 = arith.subf %185, %194 : vector<16x32xf32>
    %196 = arith.mulf %195, %195 : vector<16x32xf32>
    %cst_162 = arith.constant dense<0.000000e+00> : vector<16xf32>
    %197 = vector.multi_reduction <add>, %196, %cst_162 [1] : vector<16x32xf32> to vector<16xf32>
    %198 = vector.shape_cast %197 : vector<16xf32> to vector<16x1xf32>
    %cst_163 = arith.constant 3.200000e+01 : f32
    %199 = vector.broadcast %cst_163 : f32 to vector<16x1xf32>
    %200 = arith.divf %198, %199 : vector<16x1xf32>
    %201 = vector.broadcast %193 : vector<16x1xf32> to vector<16x32xf32>
    %202 = arith.subf %185, %201 : vector<16x32xf32>
    %cst_164 = arith.constant 9.99999974E-6 : f32
    %203 = vector.broadcast %cst_164 : f32 to vector<16x1xf32>
    %204 = arith.addf %200, %203 : vector<16x1xf32>
    %205 = math.rsqrt %204 : vector<16x1xf32>
    %206 = vector.broadcast %205 : vector<16x1xf32> to vector<16x32xf32>
    %207 = arith.mulf %202, %206 : vector<16x32xf32>
    %208 = vector.broadcast %187 : vector<1x32xf32> to vector<16x32xf32>
    %209 = arith.mulf %207, %208 : vector<16x32xf32>
    %210 = vector.broadcast %189 : vector<1x32xf32> to vector<16x32xf32>
    %211 = arith.addf %209, %210 : vector<16x32xf32>
    %c0_165 = arith.constant 0 : index
    %c0_166 = arith.constant 0 : index
    %c0_167 = arith.constant 0 : index
    %212 = vector.load %arg4[%c0_165, %c0_166, %c0_167] : memref<2x8x8xf32, #tpu.memory_space<vmem>>, vector<2x8x8xf32>
    %c0_168 = arith.constant 0 : index
    %c0_169 = arith.constant 0 : index
    %c0_170 = arith.constant 0 : index
    %213 = vector.load %arg20[%c0_168, %c0_169, %c0_170] : memref<1x1x32xf32, #tpu.memory_space<vmem>>, vector<1x1x32xf32>
    %214 = vector.shape_cast %213 : vector<1x1x32xf32> to vector<1x32xf32>
    %c0_171 = arith.constant 0 : index
    %c0_172 = arith.constant 0 : index
    %c0_173 = arith.constant 0 : index
    %c0_174 = arith.constant 0 : index
    %215 = vector.load %arg13[%c0_171, %c0_172, %c0_173, %c0_174] : memref<1x4x32x8xf32, #tpu.memory_space<vmem>>, vector<1x1x32x8xf32>
    %216 = vector.shape_cast %215 : vector<1x1x32x8xf32> to vector<32x8xf32>
    %cst_175 = arith.constant dense<0.000000e+00> : vector<16x8xf32>
    %217 = tpu.matmul %211, %216, %cst_175 {dimension_numbers = #tpu.dot_dimension_numbers<[1], [0], [0], [1], [0, 0, 1, 1], [], []>} : vector<16x32xf32>, vector<32x8xf32>, vector<16x8xf32> -> vector<16x8xf32>
    %c0_176 = arith.constant 0 : index
    %c0_177 = arith.constant 0 : index
    %c0_178 = arith.constant 0 : index
    %c0_179 = arith.constant 0 : index
    %218 = vector.load %arg14[%c0_176, %c0_177, %c0_178, %c0_179] : memref<1x4x1x8xf32, #tpu.memory_space<vmem>>, vector<1x1x1x8xf32>
    %219 = vector.shape_cast %218 : vector<1x1x1x8xf32> to vector<1x8xf32>
    %220 = vector.broadcast %219 : vector<1x8xf32> to vector<16x8xf32>
    %221 = arith.addf %217, %220 : vector<16x8xf32>
    %222 = vector.shape_cast %221 : vector<16x8xf32> to vector<2x8x8xf32>
    %c0_180 = arith.constant 0 : index
    %c0_181 = arith.constant 0 : index
    %c0_182 = arith.constant 0 : index
    %c0_183 = arith.constant 0 : index
    %223 = vector.load %arg15[%c0_180, %c0_181, %c0_182, %c0_183] : memref<1x4x32x8xf32, #tpu.memory_space<vmem>>, vector<1x1x32x8xf32>
    %224 = vector.shape_cast %223 : vector<1x1x32x8xf32> to vector<32x8xf32>
    %cst_184 = arith.constant dense<0.000000e+00> : vector<16x8xf32>
    %225 = tpu.matmul %4, %224, %cst_184 {dimension_numbers = #tpu.dot_dimension_numbers<[1], [0], [0], [1], [0, 0, 1, 1], [], []>} : vector<16x32xf32>, vector<32x8xf32>, vector<16x8xf32> -> vector<16x8xf32>
    %c0_185 = arith.constant 0 : index
    %c0_186 = arith.constant 0 : index
    %c0_187 = arith.constant 0 : index
    %c0_188 = arith.constant 0 : index
    %226 = vector.load %arg16[%c0_185, %c0_186, %c0_187, %c0_188] : memref<1x4x1x8xf32, #tpu.memory_space<vmem>>, vector<1x1x1x8xf32>
    %227 = vector.shape_cast %226 : vector<1x1x1x8xf32> to vector<1x8xf32>
    %228 = vector.broadcast %227 : vector<1x8xf32> to vector<16x8xf32>
    %229 = arith.addf %225, %228 : vector<16x8xf32>
    %230 = vector.shape_cast %229 : vector<16x8xf32> to vector<2x8x8xf32>
    %c0_189 = arith.constant 0 : index
    %c0_190 = arith.constant 0 : index
    %c0_191 = arith.constant 0 : index
    %c0_192 = arith.constant 0 : index
    %231 = vector.load %arg17[%c0_189, %c0_190, %c0_191, %c0_192] : memref<1x4x32x8xf32, #tpu.memory_space<vmem>>, vector<1x1x32x8xf32>
    %232 = vector.shape_cast %231 : vector<1x1x32x8xf32> to vector<32x8xf32>
    %cst_193 = arith.constant dense<0.000000e+00> : vector<16x8xf32>
    %233 = tpu.matmul %4, %232, %cst_193 {dimension_numbers = #tpu.dot_dimension_numbers<[1], [0], [0], [1], [0, 0, 1, 1], [], []>} : vector<16x32xf32>, vector<32x8xf32>, vector<16x8xf32> -> vector<16x8xf32>
    %c0_194 = arith.constant 0 : index
    %c0_195 = arith.constant 0 : index
    %c0_196 = arith.constant 0 : index
    %c0_197 = arith.constant 0 : index
    %234 = vector.load %arg18[%c0_194, %c0_195, %c0_196, %c0_197] : memref<1x4x1x8xf32, #tpu.memory_space<vmem>>, vector<1x1x1x8xf32>
    %235 = vector.shape_cast %234 : vector<1x1x1x8xf32> to vector<1x8xf32>
    %236 = vector.broadcast %235 : vector<1x8xf32> to vector<16x8xf32>
    %237 = arith.addf %233, %236 : vector<16x8xf32>
    %238 = vector.shape_cast %237 : vector<16x8xf32> to vector<2x8x8xf32>
    "tpu.trace_start"() <{level = 10 : i32, message = "bqd,bkd->bqk"}> : () -> ()
    %cst_198 = arith.constant dense<0.000000e+00> : vector<2x8x8xf32>
    %239 = tpu.matmul %222, %230, %cst_198 {dimension_numbers = #tpu.dot_dimension_numbers<[2], [2], [1], [1], [0, 0, 0, 1, 1, 1], [0], [0]>} : vector<2x8x8xf32>, vector<2x8x8xf32>, vector<2x8x8xf32> -> vector<2x8x8xf32>
    "tpu.trace_stop"() : () -> ()
    %cst_199 = arith.constant 0.353553385 : f32
    %240 = vector.broadcast %cst_199 : f32 to vector<2x8x8xf32>
    %241 = arith.mulf %239, %240 : vector<2x8x8xf32>
    %242 = arith.addf %241, %212 : vector<2x8x8xf32>
    %cst_200 = arith.constant dense<0xFF800000> : vector<2x8xf32>
    %243 = vector.multi_reduction <maximumf>, %242, %cst_200 [2] : vector<2x8x8xf32> to vector<2x8xf32>
    %244 = vector.shape_cast %243 : vector<2x8xf32> to vector<2x8x1xf32>
    %245 = vector.broadcast %244 : vector<2x8x1xf32> to vector<2x8x8xf32>
    %246 = arith.subf %242, %245 : vector<2x8x8xf32>
    %247 = math.exp %246 : vector<2x8x8xf32>
    %cst_201 = arith.constant dense<0.000000e+00> : vector<2x8xf32>
    %248 = vector.multi_reduction <add>, %247, %cst_201 [2] : vector<2x8x8xf32> to vector<2x8xf32>
    %249 = vector.shape_cast %248 : vector<2x8xf32> to vector<2x8x1xf32>
    %250 = tpu.reciprocal %249 {approx = true} : vector<2x8x1xf32> -> vector<2x8x1xf32>
    %251 = vector.broadcast %250 : vector<2x8x1xf32> to vector<2x8x8xf32>
    %252 = arith.mulf %247, %251 : vector<2x8x8xf32>
    "tpu.trace_start"() <{level = 10 : i32, message = "bqk,bkd->bqd"}> : () -> ()
    %cst_202 = arith.constant dense<0.000000e+00> : vector<2x8x8xf32>
    %253 = tpu.matmul %252, %238, %cst_202 {dimension_numbers = #tpu.dot_dimension_numbers<[2], [1], [1], [2], [0, 0, 0, 1, 1, 2], [0], [0]>} : vector<2x8x8xf32>, vector<2x8x8xf32>, vector<2x8x8xf32> -> vector<2x8x8xf32>
    "tpu.trace_stop"() : () -> ()
    %254 = vector.shape_cast %253 : vector<2x8x8xf32> to vector<16x8xf32>
    %c0_203 = arith.constant 0 : index
    %c0_204 = arith.constant 0 : index
    %c0_205 = arith.constant 0 : index
    %c0_206 = arith.constant 0 : index
    %255 = vector.load %arg19[%c0_203, %c0_204, %c0_205, %c0_206] : memref<1x4x8x32xf32, #tpu.memory_space<vmem>>, vector<1x1x8x32xf32>
    %256 = vector.shape_cast %255 : vector<1x1x8x32xf32> to vector<8x32xf32>
    %cst_207 = arith.constant dense<0.000000e+00> : vector<16x32xf32>
    %257 = tpu.matmul %254, %256, %cst_207 {dimension_numbers = #tpu.dot_dimension_numbers<[1], [0], [0], [1], [0, 0, 1, 1], [], []>} : vector<16x8xf32>, vector<8x32xf32>, vector<16x32xf32> -> vector<16x32xf32>
    %258 = vector.broadcast %214 : vector<1x32xf32> to vector<16x32xf32>
    %259 = arith.addf %258, %257 : vector<16x32xf32>
    %c0_208 = arith.constant 0 : index
    %c1_209 = arith.constant 1 : index
    %c0_210 = arith.constant 0 : index
    %c0_211 = arith.constant 0 : index
    %260 = vector.load %arg13[%c0_208, %c1_209, %c0_210, %c0_211] : memref<1x4x32x8xf32, #tpu.memory_space<vmem>>, vector<1x1x32x8xf32>
    %261 = vector.shape_cast %260 : vector<1x1x32x8xf32> to vector<32x8xf32>
    %cst_212 = arith.constant dense<0.000000e+00> : vector<16x8xf32>
    %262 = tpu.matmul %211, %261, %cst_212 {dimension_numbers = #tpu.dot_dimension_numbers<[1], [0], [0], [1], [0, 0, 1, 1], [], []>} : vector<16x32xf32>, vector<32x8xf32>, vector<16x8xf32> -> vector<16x8xf32>
    %c0_213 = arith.constant 0 : index
    %c1_214 = arith.constant 1 : index
    %c0_215 = arith.constant 0 : index
    %c0_216 = arith.constant 0 : index
    %263 = vector.load %arg14[%c0_213, %c1_214, %c0_215, %c0_216] : memref<1x4x1x8xf32, #tpu.memory_space<vmem>>, vector<1x1x1x8xf32>
    %264 = vector.shape_cast %263 : vector<1x1x1x8xf32> to vector<1x8xf32>
    %265 = vector.broadcast %264 : vector<1x8xf32> to vector<16x8xf32>
    %266 = arith.addf %262, %265 : vector<16x8xf32>
    %267 = vector.shape_cast %266 : vector<16x8xf32> to vector<2x8x8xf32>
    %c0_217 = arith.constant 0 : index
    %c1_218 = arith.constant 1 : index
    %c0_219 = arith.constant 0 : index
    %c0_220 = arith.constant 0 : index
    %268 = vector.load %arg15[%c0_217, %c1_218, %c0_219, %c0_220] : memref<1x4x32x8xf32, #tpu.memory_space<vmem>>, vector<1x1x32x8xf32>
    %269 = vector.shape_cast %268 : vector<1x1x32x8xf32> to vector<32x8xf32>
    %cst_221 = arith.constant dense<0.000000e+00> : vector<16x8xf32>
    %270 = tpu.matmul %4, %269, %cst_221 {dimension_numbers = #tpu.dot_dimension_numbers<[1], [0], [0], [1], [0, 0, 1, 1], [], []>} : vector<16x32xf32>, vector<32x8xf32>, vector<16x8xf32> -> vector<16x8xf32>
    %c0_222 = arith.constant 0 : index
    %c1_223 = arith.constant 1 : index
    %c0_224 = arith.constant 0 : index
    %c0_225 = arith.constant 0 : index
    %271 = vector.load %arg16[%c0_222, %c1_223, %c0_224, %c0_225] : memref<1x4x1x8xf32, #tpu.memory_space<vmem>>, vector<1x1x1x8xf32>
    %272 = vector.shape_cast %271 : vector<1x1x1x8xf32> to vector<1x8xf32>
    %273 = vector.broadcast %272 : vector<1x8xf32> to vector<16x8xf32>
    %274 = arith.addf %270, %273 : vector<16x8xf32>
    %275 = vector.shape_cast %274 : vector<16x8xf32> to vector<2x8x8xf32>
    %c0_226 = arith.constant 0 : index
    %c1_227 = arith.constant 1 : index
    %c0_228 = arith.constant 0 : index
    %c0_229 = arith.constant 0 : index
    %276 = vector.load %arg17[%c0_226, %c1_227, %c0_228, %c0_229] : memref<1x4x32x8xf32, #tpu.memory_space<vmem>>, vector<1x1x32x8xf32>
    %277 = vector.shape_cast %276 : vector<1x1x32x8xf32> to vector<32x8xf32>
    %cst_230 = arith.constant dense<0.000000e+00> : vector<16x8xf32>
    %278 = tpu.matmul %4, %277, %cst_230 {dimension_numbers = #tpu.dot_dimension_numbers<[1], [0], [0], [1], [0, 0, 1, 1], [], []>} : vector<16x32xf32>, vector<32x8xf32>, vector<16x8xf32> -> vector<16x8xf32>
    %c0_231 = arith.constant 0 : index
    %c1_232 = arith.constant 1 : index
    %c0_233 = arith.constant 0 : index
    %c0_234 = arith.constant 0 : index
    %279 = vector.load %arg18[%c0_231, %c1_232, %c0_233, %c0_234] : memref<1x4x1x8xf32, #tpu.memory_space<vmem>>, vector<1x1x1x8xf32>
    %280 = vector.shape_cast %279 : vector<1x1x1x8xf32> to vector<1x8xf32>
    %281 = vector.broadcast %280 : vector<1x8xf32> to vector<16x8xf32>
    %282 = arith.addf %278, %281 : vector<16x8xf32>
    %283 = vector.shape_cast %282 : vector<16x8xf32> to vector<2x8x8xf32>
    "tpu.trace_start"() <{level = 10 : i32, message = "bqd,bkd->bqk"}> : () -> ()
    %cst_235 = arith.constant dense<0.000000e+00> : vector<2x8x8xf32>
    %284 = tpu.matmul %267, %275, %cst_235 {dimension_numbers = #tpu.dot_dimension_numbers<[2], [2], [1], [1], [0, 0, 0, 1, 1, 1], [0], [0]>} : vector<2x8x8xf32>, vector<2x8x8xf32>, vector<2x8x8xf32> -> vector<2x8x8xf32>
    "tpu.trace_stop"() : () -> ()
    %cst_236 = arith.constant 0.353553385 : f32
    %285 = vector.broadcast %cst_236 : f32 to vector<2x8x8xf32>
    %286 = arith.mulf %284, %285 : vector<2x8x8xf32>
    %287 = arith.addf %286, %212 : vector<2x8x8xf32>
    %cst_237 = arith.constant dense<0xFF800000> : vector<2x8xf32>
    %288 = vector.multi_reduction <maximumf>, %287, %cst_237 [2] : vector<2x8x8xf32> to vector<2x8xf32>
    %289 = vector.shape_cast %288 : vector<2x8xf32> to vector<2x8x1xf32>
    %290 = vector.broadcast %289 : vector<2x8x1xf32> to vector<2x8x8xf32>
    %291 = arith.subf %287, %290 : vector<2x8x8xf32>
    %292 = math.exp %291 : vector<2x8x8xf32>
    %cst_238 = arith.constant dense<0.000000e+00> : vector<2x8xf32>
    %293 = vector.multi_reduction <add>, %292, %cst_238 [2] : vector<2x8x8xf32> to vector<2x8xf32>
    %294 = vector.shape_cast %293 : vector<2x8xf32> to vector<2x8x1xf32>
    %295 = tpu.reciprocal %294 {approx = true} : vector<2x8x1xf32> -> vector<2x8x1xf32>
    %296 = vector.broadcast %295 : vector<2x8x1xf32> to vector<2x8x8xf32>
    %297 = arith.mulf %292, %296 : vector<2x8x8xf32>
    "tpu.trace_start"() <{level = 10 : i32, message = "bqk,bkd->bqd"}> : () -> ()
    %cst_239 = arith.constant dense<0.000000e+00> : vector<2x8x8xf32>
    %298 = tpu.matmul %297, %283, %cst_239 {dimension_numbers = #tpu.dot_dimension_numbers<[2], [1], [1], [2], [0, 0, 0, 1, 1, 2], [0], [0]>} : vector<2x8x8xf32>, vector<2x8x8xf32>, vector<2x8x8xf32> -> vector<2x8x8xf32>
    "tpu.trace_stop"() : () -> ()
    %299 = vector.shape_cast %298 : vector<2x8x8xf32> to vector<16x8xf32>
    %c0_240 = arith.constant 0 : index
    %c1_241 = arith.constant 1 : index
    %c0_242 = arith.constant 0 : index
    %c0_243 = arith.constant 0 : index
    %300 = vector.load %arg19[%c0_240, %c1_241, %c0_242, %c0_243] : memref<1x4x8x32xf32, #tpu.memory_space<vmem>>, vector<1x1x8x32xf32>
    %301 = vector.shape_cast %300 : vector<1x1x8x32xf32> to vector<8x32xf32>
    %cst_244 = arith.constant dense<0.000000e+00> : vector<16x32xf32>
    %302 = tpu.matmul %299, %301, %cst_244 {dimension_numbers = #tpu.dot_dimension_numbers<[1], [0], [0], [1], [0, 0, 1, 1], [], []>} : vector<16x8xf32>, vector<8x32xf32>, vector<16x32xf32> -> vector<16x32xf32>
    %303 = arith.addf %259, %302 : vector<16x32xf32>
    %c0_245 = arith.constant 0 : index
    %c2_246 = arith.constant 2 : index
    %c0_247 = arith.constant 0 : index
    %c0_248 = arith.constant 0 : index
    %304 = vector.load %arg13[%c0_245, %c2_246, %c0_247, %c0_248] : memref<1x4x32x8xf32, #tpu.memory_space<vmem>>, vector<1x1x32x8xf32>
    %305 = vector.shape_cast %304 : vector<1x1x32x8xf32> to vector<32x8xf32>
    %cst_249 = arith.constant dense<0.000000e+00> : vector<16x8xf32>
    %306 = tpu.matmul %211, %305, %cst_249 {dimension_numbers = #tpu.dot_dimension_numbers<[1], [0], [0], [1], [0, 0, 1, 1], [], []>} : vector<16x32xf32>, vector<32x8xf32>, vector<16x8xf32> -> vector<16x8xf32>
    %c0_250 = arith.constant 0 : index
    %c2_251 = arith.constant 2 : index
    %c0_252 = arith.constant 0 : index
    %c0_253 = arith.constant 0 : index
    %307 = vector.load %arg14[%c0_250, %c2_251, %c0_252, %c0_253] : memref<1x4x1x8xf32, #tpu.memory_space<vmem>>, vector<1x1x1x8xf32>
    %308 = vector.shape_cast %307 : vector<1x1x1x8xf32> to vector<1x8xf32>
    %309 = vector.broadcast %308 : vector<1x8xf32> to vector<16x8xf32>
    %310 = arith.addf %306, %309 : vector<16x8xf32>
    %311 = vector.shape_cast %310 : vector<16x8xf32> to vector<2x8x8xf32>
    %c0_254 = arith.constant 0 : index
    %c2_255 = arith.constant 2 : index
    %c0_256 = arith.constant 0 : index
    %c0_257 = arith.constant 0 : index
    %312 = vector.load %arg15[%c0_254, %c2_255, %c0_256, %c0_257] : memref<1x4x32x8xf32, #tpu.memory_space<vmem>>, vector<1x1x32x8xf32>
    %313 = vector.shape_cast %312 : vector<1x1x32x8xf32> to vector<32x8xf32>
    %cst_258 = arith.constant dense<0.000000e+00> : vector<16x8xf32>
    %314 = tpu.matmul %4, %313, %cst_258 {dimension_numbers = #tpu.dot_dimension_numbers<[1], [0], [0], [1], [0, 0, 1, 1], [], []>} : vector<16x32xf32>, vector<32x8xf32>, vector<16x8xf32> -> vector<16x8xf32>
    %c0_259 = arith.constant 0 : index
    %c2_260 = arith.constant 2 : index
    %c0_261 = arith.constant 0 : index
    %c0_262 = arith.constant 0 : index
    %315 = vector.load %arg16[%c0_259, %c2_260, %c0_261, %c0_262] : memref<1x4x1x8xf32, #tpu.memory_space<vmem>>, vector<1x1x1x8xf32>
    %316 = vector.shape_cast %315 : vector<1x1x1x8xf32> to vector<1x8xf32>
    %317 = vector.broadcast %316 : vector<1x8xf32> to vector<16x8xf32>
    %318 = arith.addf %314, %317 : vector<16x8xf32>
    %319 = vector.shape_cast %318 : vector<16x8xf32> to vector<2x8x8xf32>
    %c0_263 = arith.constant 0 : index
    %c2_264 = arith.constant 2 : index
    %c0_265 = arith.constant 0 : index
    %c0_266 = arith.constant 0 : index
    %320 = vector.load %arg17[%c0_263, %c2_264, %c0_265, %c0_266] : memref<1x4x32x8xf32, #tpu.memory_space<vmem>>, vector<1x1x32x8xf32>
    %321 = vector.shape_cast %320 : vector<1x1x32x8xf32> to vector<32x8xf32>
    %cst_267 = arith.constant dense<0.000000e+00> : vector<16x8xf32>
    %322 = tpu.matmul %4, %321, %cst_267 {dimension_numbers = #tpu.dot_dimension_numbers<[1], [0], [0], [1], [0, 0, 1, 1], [], []>} : vector<16x32xf32>, vector<32x8xf32>, vector<16x8xf32> -> vector<16x8xf32>
    %c0_268 = arith.constant 0 : index
    %c2_269 = arith.constant 2 : index
    %c0_270 = arith.constant 0 : index
    %c0_271 = arith.constant 0 : index
    %323 = vector.load %arg18[%c0_268, %c2_269, %c0_270, %c0_271] : memref<1x4x1x8xf32, #tpu.memory_space<vmem>>, vector<1x1x1x8xf32>
    %324 = vector.shape_cast %323 : vector<1x1x1x8xf32> to vector<1x8xf32>
    %325 = vector.broadcast %324 : vector<1x8xf32> to vector<16x8xf32>
    %326 = arith.addf %322, %325 : vector<16x8xf32>
    %327 = vector.shape_cast %326 : vector<16x8xf32> to vector<2x8x8xf32>
    "tpu.trace_start"() <{level = 10 : i32, message = "bqd,bkd->bqk"}> : () -> ()
    %cst_272 = arith.constant dense<0.000000e+00> : vector<2x8x8xf32>
    %328 = tpu.matmul %311, %319, %cst_272 {dimension_numbers = #tpu.dot_dimension_numbers<[2], [2], [1], [1], [0, 0, 0, 1, 1, 1], [0], [0]>} : vector<2x8x8xf32>, vector<2x8x8xf32>, vector<2x8x8xf32> -> vector<2x8x8xf32>
    "tpu.trace_stop"() : () -> ()
    %cst_273 = arith.constant 0.353553385 : f32
    %329 = vector.broadcast %cst_273 : f32 to vector<2x8x8xf32>
    %330 = arith.mulf %328, %329 : vector<2x8x8xf32>
    %331 = arith.addf %330, %212 : vector<2x8x8xf32>
    %cst_274 = arith.constant dense<0xFF800000> : vector<2x8xf32>
    %332 = vector.multi_reduction <maximumf>, %331, %cst_274 [2] : vector<2x8x8xf32> to vector<2x8xf32>
    %333 = vector.shape_cast %332 : vector<2x8xf32> to vector<2x8x1xf32>
    %334 = vector.broadcast %333 : vector<2x8x1xf32> to vector<2x8x8xf32>
    %335 = arith.subf %331, %334 : vector<2x8x8xf32>
    %336 = math.exp %335 : vector<2x8x8xf32>
    %cst_275 = arith.constant dense<0.000000e+00> : vector<2x8xf32>
    %337 = vector.multi_reduction <add>, %336, %cst_275 [2] : vector<2x8x8xf32> to vector<2x8xf32>
    %338 = vector.shape_cast %337 : vector<2x8xf32> to vector<2x8x1xf32>
    %339 = tpu.reciprocal %338 {approx = true} : vector<2x8x1xf32> -> vector<2x8x1xf32>
    %340 = vector.broadcast %339 : vector<2x8x1xf32> to vector<2x8x8xf32>
    %341 = arith.mulf %336, %340 : vector<2x8x8xf32>
    "tpu.trace_start"() <{level = 10 : i32, message = "bqk,bkd->bqd"}> : () -> ()
    %cst_276 = arith.constant dense<0.000000e+00> : vector<2x8x8xf32>
    %342 = tpu.matmul %341, %327, %cst_276 {dimension_numbers = #tpu.dot_dimension_numbers<[2], [1], [1], [2], [0, 0, 0, 1, 1, 2], [0], [0]>} : vector<2x8x8xf32>, vector<2x8x8xf32>, vector<2x8x8xf32> -> vector<2x8x8xf32>
    "tpu.trace_stop"() : () -> ()
    %343 = vector.shape_cast %342 : vector<2x8x8xf32> to vector<16x8xf32>
    %c0_277 = arith.constant 0 : index
    %c2_278 = arith.constant 2 : index
    %c0_279 = arith.constant 0 : index
    %c0_280 = arith.constant 0 : index
    %344 = vector.load %arg19[%c0_277, %c2_278, %c0_279, %c0_280] : memref<1x4x8x32xf32, #tpu.memory_space<vmem>>, vector<1x1x8x32xf32>
    %345 = vector.shape_cast %344 : vector<1x1x8x32xf32> to vector<8x32xf32>
    %cst_281 = arith.constant dense<0.000000e+00> : vector<16x32xf32>
    %346 = tpu.matmul %343, %345, %cst_281 {dimension_numbers = #tpu.dot_dimension_numbers<[1], [0], [0], [1], [0, 0, 1, 1], [], []>} : vector<16x8xf32>, vector<8x32xf32>, vector<16x32xf32> -> vector<16x32xf32>
    %347 = arith.addf %303, %346 : vector<16x32xf32>
    %c0_282 = arith.constant 0 : index
    %c3_283 = arith.constant 3 : index
    %c0_284 = arith.constant 0 : index
    %c0_285 = arith.constant 0 : index
    %348 = vector.load %arg13[%c0_282, %c3_283, %c0_284, %c0_285] : memref<1x4x32x8xf32, #tpu.memory_space<vmem>>, vector<1x1x32x8xf32>
    %349 = vector.shape_cast %348 : vector<1x1x32x8xf32> to vector<32x8xf32>
    %cst_286 = arith.constant dense<0.000000e+00> : vector<16x8xf32>
    %350 = tpu.matmul %211, %349, %cst_286 {dimension_numbers = #tpu.dot_dimension_numbers<[1], [0], [0], [1], [0, 0, 1, 1], [], []>} : vector<16x32xf32>, vector<32x8xf32>, vector<16x8xf32> -> vector<16x8xf32>
    %c0_287 = arith.constant 0 : index
    %c3_288 = arith.constant 3 : index
    %c0_289 = arith.constant 0 : index
    %c0_290 = arith.constant 0 : index
    %351 = vector.load %arg14[%c0_287, %c3_288, %c0_289, %c0_290] : memref<1x4x1x8xf32, #tpu.memory_space<vmem>>, vector<1x1x1x8xf32>
    %352 = vector.shape_cast %351 : vector<1x1x1x8xf32> to vector<1x8xf32>
    %353 = vector.broadcast %352 : vector<1x8xf32> to vector<16x8xf32>
    %354 = arith.addf %350, %353 : vector<16x8xf32>
    %355 = vector.shape_cast %354 : vector<16x8xf32> to vector<2x8x8xf32>
    %c0_291 = arith.constant 0 : index
    %c3_292 = arith.constant 3 : index
    %c0_293 = arith.constant 0 : index
    %c0_294 = arith.constant 0 : index
    %356 = vector.load %arg15[%c0_291, %c3_292, %c0_293, %c0_294] : memref<1x4x32x8xf32, #tpu.memory_space<vmem>>, vector<1x1x32x8xf32>
    %357 = vector.shape_cast %356 : vector<1x1x32x8xf32> to vector<32x8xf32>
    %cst_295 = arith.constant dense<0.000000e+00> : vector<16x8xf32>
    %358 = tpu.matmul %4, %357, %cst_295 {dimension_numbers = #tpu.dot_dimension_numbers<[1], [0], [0], [1], [0, 0, 1, 1], [], []>} : vector<16x32xf32>, vector<32x8xf32>, vector<16x8xf32> -> vector<16x8xf32>
    %c0_296 = arith.constant 0 : index
    %c3_297 = arith.constant 3 : index
    %c0_298 = arith.constant 0 : index
    %c0_299 = arith.constant 0 : index
    %359 = vector.load %arg16[%c0_296, %c3_297, %c0_298, %c0_299] : memref<1x4x1x8xf32, #tpu.memory_space<vmem>>, vector<1x1x1x8xf32>
    %360 = vector.shape_cast %359 : vector<1x1x1x8xf32> to vector<1x8xf32>
    %361 = vector.broadcast %360 : vector<1x8xf32> to vector<16x8xf32>
    %362 = arith.addf %358, %361 : vector<16x8xf32>
    %363 = vector.shape_cast %362 : vector<16x8xf32> to vector<2x8x8xf32>
    %c0_300 = arith.constant 0 : index
    %c3_301 = arith.constant 3 : index
    %c0_302 = arith.constant 0 : index
    %c0_303 = arith.constant 0 : index
    %364 = vector.load %arg17[%c0_300, %c3_301, %c0_302, %c0_303] : memref<1x4x32x8xf32, #tpu.memory_space<vmem>>, vector<1x1x32x8xf32>
    %365 = vector.shape_cast %364 : vector<1x1x32x8xf32> to vector<32x8xf32>
    %cst_304 = arith.constant dense<0.000000e+00> : vector<16x8xf32>
    %366 = tpu.matmul %4, %365, %cst_304 {dimension_numbers = #tpu.dot_dimension_numbers<[1], [0], [0], [1], [0, 0, 1, 1], [], []>} : vector<16x32xf32>, vector<32x8xf32>, vector<16x8xf32> -> vector<16x8xf32>
    %c0_305 = arith.constant 0 : index
    %c3_306 = arith.constant 3 : index
    %c0_307 = arith.constant 0 : index
    %c0_308 = arith.constant 0 : index
    %367 = vector.load %arg18[%c0_305, %c3_306, %c0_307, %c0_308] : memref<1x4x1x8xf32, #tpu.memory_space<vmem>>, vector<1x1x1x8xf32>
    %368 = vector.shape_cast %367 : vector<1x1x1x8xf32> to vector<1x8xf32>
    %369 = vector.broadcast %368 : vector<1x8xf32> to vector<16x8xf32>
    %370 = arith.addf %366, %369 : vector<16x8xf32>
    %371 = vector.shape_cast %370 : vector<16x8xf32> to vector<2x8x8xf32>
    "tpu.trace_start"() <{level = 10 : i32, message = "bqd,bkd->bqk"}> : () -> ()
    %cst_309 = arith.constant dense<0.000000e+00> : vector<2x8x8xf32>
    %372 = tpu.matmul %355, %363, %cst_309 {dimension_numbers = #tpu.dot_dimension_numbers<[2], [2], [1], [1], [0, 0, 0, 1, 1, 1], [0], [0]>} : vector<2x8x8xf32>, vector<2x8x8xf32>, vector<2x8x8xf32> -> vector<2x8x8xf32>
    "tpu.trace_stop"() : () -> ()
    %cst_310 = arith.constant 0.353553385 : f32
    %373 = vector.broadcast %cst_310 : f32 to vector<2x8x8xf32>
    %374 = arith.mulf %372, %373 : vector<2x8x8xf32>
    %375 = arith.addf %374, %212 : vector<2x8x8xf32>
    %cst_311 = arith.constant dense<0xFF800000> : vector<2x8xf32>
    %376 = vector.multi_reduction <maximumf>, %375, %cst_311 [2] : vector<2x8x8xf32> to vector<2x8xf32>
    %377 = vector.shape_cast %376 : vector<2x8xf32> to vector<2x8x1xf32>
    %378 = vector.broadcast %377 : vector<2x8x1xf32> to vector<2x8x8xf32>
    %379 = arith.subf %375, %378 : vector<2x8x8xf32>
    %380 = math.exp %379 : vector<2x8x8xf32>
    %cst_312 = arith.constant dense<0.000000e+00> : vector<2x8xf32>
    %381 = vector.multi_reduction <add>, %380, %cst_312 [2] : vector<2x8x8xf32> to vector<2x8xf32>
    %382 = vector.shape_cast %381 : vector<2x8xf32> to vector<2x8x1xf32>
    %383 = tpu.reciprocal %382 {approx = true} : vector<2x8x1xf32> -> vector<2x8x1xf32>
    %384 = vector.broadcast %383 : vector<2x8x1xf32> to vector<2x8x8xf32>
    %385 = arith.mulf %380, %384 : vector<2x8x8xf32>
    "tpu.trace_start"() <{level = 10 : i32, message = "bqk,bkd->bqd"}> : () -> ()
    %cst_313 = arith.constant dense<0.000000e+00> : vector<2x8x8xf32>
    %386 = tpu.matmul %385, %371, %cst_313 {dimension_numbers = #tpu.dot_dimension_numbers<[2], [1], [1], [2], [0, 0, 0, 1, 1, 2], [0], [0]>} : vector<2x8x8xf32>, vector<2x8x8xf32>, vector<2x8x8xf32> -> vector<2x8x8xf32>
    "tpu.trace_stop"() : () -> ()
    %387 = vector.shape_cast %386 : vector<2x8x8xf32> to vector<16x8xf32>
    %c0_314 = arith.constant 0 : index
    %c3_315 = arith.constant 3 : index
    %c0_316 = arith.constant 0 : index
    %c0_317 = arith.constant 0 : index
    %388 = vector.load %arg19[%c0_314, %c3_315, %c0_316, %c0_317] : memref<1x4x8x32xf32, #tpu.memory_space<vmem>>, vector<1x1x8x32xf32>
    %389 = vector.shape_cast %388 : vector<1x1x8x32xf32> to vector<8x32xf32>
    %cst_318 = arith.constant dense<0.000000e+00> : vector<16x32xf32>
    %390 = tpu.matmul %387, %389, %cst_318 {dimension_numbers = #tpu.dot_dimension_numbers<[1], [0], [0], [1], [0, 0, 1, 1], [], []>} : vector<16x8xf32>, vector<8x32xf32>, vector<16x32xf32> -> vector<16x32xf32>
    %391 = arith.addf %347, %390 : vector<16x32xf32>
    %392 = arith.addf %211, %391 : vector<16x32xf32>
    %c0_319 = arith.constant 0 : index
    %c0_320 = arith.constant 0 : index
    %c0_321 = arith.constant 0 : index
    %393 = vector.load %arg27[%c0_319, %c0_320, %c0_321] : memref<1x1x32xf32, #tpu.memory_space<vmem>>, vector<1x1x32xf32>
    %394 = vector.shape_cast %393 : vector<1x1x32xf32> to vector<1x32xf32>
    %c0_322 = arith.constant 0 : index
    %c0_323 = arith.constant 0 : index
    %c0_324 = arith.constant 0 : index
    %395 = vector.load %arg28[%c0_322, %c0_323, %c0_324] : memref<1x1x32xf32, #tpu.memory_space<vmem>>, vector<1x1x32xf32>
    %396 = vector.shape_cast %395 : vector<1x1x32xf32> to vector<1x32xf32>
    %cst_325 = arith.constant dense<0.000000e+00> : vector<16xf32>
    %397 = vector.multi_reduction <add>, %392, %cst_325 [1] : vector<16x32xf32> to vector<16xf32>
    %398 = vector.shape_cast %397 : vector<16xf32> to vector<16x1xf32>
    %cst_326 = arith.constant 3.200000e+01 : f32
    %399 = vector.broadcast %cst_326 : f32 to vector<16x1xf32>
    %400 = arith.divf %398, %399 : vector<16x1xf32>
    %401 = vector.broadcast %400 : vector<16x1xf32> to vector<16x32xf32>
    %402 = arith.subf %392, %401 : vector<16x32xf32>
    %403 = arith.mulf %402, %402 : vector<16x32xf32>
    %cst_327 = arith.constant dense<0.000000e+00> : vector<16xf32>
    %404 = vector.multi_reduction <add>, %403, %cst_327 [1] : vector<16x32xf32> to vector<16xf32>
    %405 = vector.shape_cast %404 : vector<16xf32> to vector<16x1xf32>
    %cst_328 = arith.constant 3.200000e+01 : f32
    %406 = vector.broadcast %cst_328 : f32 to vector<16x1xf32>
    %407 = arith.divf %405, %406 : vector<16x1xf32>
    %408 = vector.broadcast %400 : vector<16x1xf32> to vector<16x32xf32>
    %409 = arith.subf %392, %408 : vector<16x32xf32>
    %cst_329 = arith.constant 9.99999974E-6 : f32
    %410 = vector.broadcast %cst_329 : f32 to vector<16x1xf32>
    %411 = arith.addf %407, %410 : vector<16x1xf32>
    %412 = math.rsqrt %411 : vector<16x1xf32>
    %413 = vector.broadcast %412 : vector<16x1xf32> to vector<16x32xf32>
    %414 = arith.mulf %409, %413 : vector<16x32xf32>
    %415 = vector.broadcast %394 : vector<1x32xf32> to vector<16x32xf32>
    %416 = arith.mulf %414, %415 : vector<16x32xf32>
    %417 = vector.broadcast %396 : vector<1x32xf32> to vector<16x32xf32>
    %418 = arith.addf %416, %417 : vector<16x32xf32>
    %c0_330 = arith.constant 0 : index
    %c0_331 = arith.constant 0 : index
    %c0_332 = arith.constant 0 : index
    %419 = vector.load %arg21[%c0_330, %c0_331, %c0_332] : memref<1x32x64xf32, #tpu.memory_space<vmem>>, vector<1x32x64xf32>
    %420 = vector.shape_cast %419 : vector<1x32x64xf32> to vector<32x64xf32>
    %cst_333 = arith.constant dense<0.000000e+00> : vector<16x64xf32>
    %421 = tpu.matmul %418, %420, %cst_333 {dimension_numbers = #tpu.dot_dimension_numbers<[1], [0], [0], [1], [0, 0, 1, 1], [], []>} : vector<16x32xf32>, vector<32x64xf32>, vector<16x64xf32> -> vector<16x64xf32>
    %c0_334 = arith.constant 0 : index
    %c0_335 = arith.constant 0 : index
    %c0_336 = arith.constant 0 : index
    %422 = vector.load %arg22[%c0_334, %c0_335, %c0_336] : memref<1x1x64xf32, #tpu.memory_space<vmem>>, vector<1x1x64xf32>
    %423 = vector.shape_cast %422 : vector<1x1x64xf32> to vector<1x64xf32>
    %424 = vector.broadcast %423 : vector<1x64xf32> to vector<16x64xf32>
    %425 = arith.addf %421, %424 : vector<16x64xf32>
    %cst_337 = arith.constant 0.000000e+00 : f32
    %426 = vector.broadcast %cst_337 : f32 to vector<16x64xf32>
    %427 = arith.maximumf %425, %426 : vector<16x64xf32>
    %c0_338 = arith.constant 0 : index
    %c0_339 = arith.constant 0 : index
    %c0_340 = arith.constant 0 : index
    %428 = vector.load %arg23[%c0_338, %c0_339, %c0_340] : memref<1x64x32xf32, #tpu.memory_space<vmem>>, vector<1x64x32xf32>
    %429 = vector.shape_cast %428 : vector<1x64x32xf32> to vector<64x32xf32>
    %cst_341 = arith.constant dense<0.000000e+00> : vector<16x32xf32>
    %430 = tpu.matmul %427, %429, %cst_341 {dimension_numbers = #tpu.dot_dimension_numbers<[1], [0], [0], [1], [0, 0, 1, 1], [], []>} : vector<16x64xf32>, vector<64x32xf32>, vector<16x32xf32> -> vector<16x32xf32>
    %c0_342 = arith.constant 0 : index
    %c0_343 = arith.constant 0 : index
    %c0_344 = arith.constant 0 : index
    %431 = vector.load %arg24[%c0_342, %c0_343, %c0_344] : memref<1x1x32xf32, #tpu.memory_space<vmem>>, vector<1x1x32xf32>
    %432 = vector.shape_cast %431 : vector<1x1x32xf32> to vector<1x32xf32>
    %433 = vector.broadcast %432 : vector<1x32xf32> to vector<16x32xf32>
    %434 = arith.addf %430, %433 : vector<16x32xf32>
    %435 = arith.addf %418, %434 : vector<16x32xf32>
    %c0_345 = arith.constant 0 : index
    %c0_346 = arith.constant 0 : index
    %c0_347 = arith.constant 0 : index
    %436 = vector.load %arg29[%c0_345, %c0_346, %c0_347] : memref<1x1x32xf32, #tpu.memory_space<vmem>>, vector<1x1x32xf32>
    %437 = vector.shape_cast %436 : vector<1x1x32xf32> to vector<1x32xf32>
    %c0_348 = arith.constant 0 : index
    %c0_349 = arith.constant 0 : index
    %c0_350 = arith.constant 0 : index
    %438 = vector.load %arg30[%c0_348, %c0_349, %c0_350] : memref<1x1x32xf32, #tpu.memory_space<vmem>>, vector<1x1x32xf32>
    %439 = vector.shape_cast %438 : vector<1x1x32xf32> to vector<1x32xf32>
    %cst_351 = arith.constant dense<0.000000e+00> : vector<16xf32>
    %440 = vector.multi_reduction <add>, %435, %cst_351 [1] : vector<16x32xf32> to vector<16xf32>
    %441 = vector.shape_cast %440 : vector<16xf32> to vector<16x1xf32>
    %cst_352 = arith.constant 3.200000e+01 : f32
    %442 = vector.broadcast %cst_352 : f32 to vector<16x1xf32>
    %443 = arith.divf %441, %442 : vector<16x1xf32>
    %444 = vector.broadcast %443 : vector<16x1xf32> to vector<16x32xf32>
    %445 = arith.subf %435, %444 : vector<16x32xf32>
    %446 = arith.mulf %445, %445 : vector<16x32xf32>
    %cst_353 = arith.constant dense<0.000000e+00> : vector<16xf32>
    %447 = vector.multi_reduction <add>, %446, %cst_353 [1] : vector<16x32xf32> to vector<16xf32>
    %448 = vector.shape_cast %447 : vector<16xf32> to vector<16x1xf32>
    %cst_354 = arith.constant 3.200000e+01 : f32
    %449 = vector.broadcast %cst_354 : f32 to vector<16x1xf32>
    %450 = arith.divf %448, %449 : vector<16x1xf32>
    %451 = vector.broadcast %443 : vector<16x1xf32> to vector<16x32xf32>
    %452 = arith.subf %435, %451 : vector<16x32xf32>
    %cst_355 = arith.constant 9.99999974E-6 : f32
    %453 = vector.broadcast %cst_355 : f32 to vector<16x1xf32>
    %454 = arith.addf %450, %453 : vector<16x1xf32>
    %455 = math.rsqrt %454 : vector<16x1xf32>
    %456 = vector.broadcast %455 : vector<16x1xf32> to vector<16x32xf32>
    %457 = arith.mulf %452, %456 : vector<16x32xf32>
    %458 = vector.broadcast %437 : vector<1x32xf32> to vector<16x32xf32>
    %459 = arith.mulf %457, %458 : vector<16x32xf32>
    %460 = vector.broadcast %439 : vector<1x32xf32> to vector<16x32xf32>
    %461 = arith.addf %459, %460 : vector<16x32xf32>
    %c0_356 = arith.constant 0 : index
    %c0_357 = arith.constant 0 : index
    %462 = vector.load %arg34[%c0_356, %c0_357] : memref<16x32xf32, #tpu.memory_space<vmem>>, vector<16x32xf32>
    tpu.vector_store %arg34[%c0_356, %c0_357], %461 {strides = array<i32>} : memref<16x32xf32, #tpu.memory_space<vmem>>, vector<16x32xf32>,
    %c1_i32 = arith.constant 1 : i32
    %463 = arith.cmpi eq, %arg0, %c1_i32 : i32
    %464 = arith.extui %463 : i1 to i32
    %c0_i32_358 = arith.constant 0 : i32
    %465 = arith.cmpi ne, %464, %c0_i32_358 : i32
    scf.if %465 {
      %c0_359 = arith.constant 0 : index
      %c0_360 = arith.constant 0 : index
      %466 = vector.load %arg31[%c0_359, %c0_360] : memref<1x32xf32, #tpu.memory_space<vmem>>, vector<1x32xf32>
      %c0_361 = arith.constant 0 : index
      %c0_362 = arith.constant 0 : index
      %467 = vector.load %arg32[%c0_361, %c0_362] : memref<1x32xf32, #tpu.memory_space<vmem>>, vector<1x32xf32>
      %cst_363 = arith.constant dense<0.000000e+00> : vector<16xf32>
      %468 = vector.multi_reduction <add>, %461, %cst_363 [1] : vector<16x32xf32> to vector<16xf32>
      %469 = vector.shape_cast %468 : vector<16xf32> to vector<16x1xf32>
      %cst_364 = arith.constant 3.200000e+01 : f32
      %470 = vector.broadcast %cst_364 : f32 to vector<16x1xf32>
      %471 = arith.divf %469, %470 : vector<16x1xf32>
      %472 = vector.broadcast %471 : vector<16x1xf32> to vector<16x32xf32>
      %473 = arith.subf %461, %472 : vector<16x32xf32>
      %474 = arith.mulf %473, %473 : vector<16x32xf32>
      %cst_365 = arith.constant dense<0.000000e+00> : vector<16xf32>
      %475 = vector.multi_reduction <add>, %474, %cst_365 [1] : vector<16x32xf32> to vector<16xf32>
      %476 = vector.shape_cast %475 : vector<16xf32> to vector<16x1xf32>
      %cst_366 = arith.constant 3.200000e+01 : f32
      %477 = vector.broadcast %cst_366 : f32 to vector<16x1xf32>
      %478 = arith.divf %476, %477 : vector<16x1xf32>
      %479 = vector.broadcast %471 : vector<16x1xf32> to vector<16x32xf32>
      %480 = arith.subf %461, %479 : vector<16x32xf32>
      %cst_367 = arith.constant 9.99999974E-6 : f32
      %481 = vector.broadcast %cst_367 : f32 to vector<16x1xf32>
      %482 = arith.addf %478, %481 : vector<16x1xf32>
      %483 = math.rsqrt %482 : vector<16x1xf32>
      %484 = vector.broadcast %483 : vector<16x1xf32> to vector<16x32xf32>
      %485 = arith.mulf %480, %484 : vector<16x32xf32>
      %486 = vector.broadcast %466 : vector<1x32xf32> to vector<16x32xf32>
      %487 = arith.mulf %485, %486 : vector<16x32xf32>
      %488 = vector.broadcast %467 : vector<1x32xf32> to vector<16x32xf32>
      %489 = arith.addf %487, %488 : vector<16x32xf32>
      %c0_368 = arith.constant 0 : index
      %c0_369 = arith.constant 0 : index
      %490 = vector.load %arg33[%c0_368, %c0_369] : memref<16x32xf32, #tpu.memory_space<vmem>>, vector<16x32xf32>
      tpu.vector_store %arg33[%c0_368, %c0_369], %489 {strides = array<i32>} : memref<16x32xf32, #tpu.memory_space<vmem>>, vector<16x32xf32>,
    } else {
    }
    return
  }
  func.func @transform_0(%arg0: i32) -> (i32, i32) {
    %c0_i32 = arith.constant 0 : i32
    %c0_i32_0 = arith.constant 0 : i32
    %c0_i32_1 = arith.constant 0 : i32
    return %c0_i32, %c0_i32_0 : i32, i32
  }
  func.func @transform_1(%arg0: i32) -> (i32, i32) {
    %c0_i32 = arith.constant 0 : i32
    %c0_i32_0 = arith.constant 0 : i32
    %c0_i32_1 = arith.constant 0 : i32
    return %c0_i32, %c0_i32_0 : i32, i32
  }
  func.func @transform_2(%arg0: i32) -> (i32, i32, i32) {
    %c0_i32 = arith.constant 0 : i32
    %c0_i32_0 = arith.constant 0 : i32
    %c0_i32_1 = arith.constant 0 : i32
    %c0_i32_2 = arith.constant 0 : i32
    return %c0_i32, %c0_i32_0, %c0_i32_1 : i32, i32, i32
  }
  func.func @transform_3(%arg0: i32) -> (i32, i32, i32) {
    %c0_i32 = arith.constant 0 : i32
    %c0_i32_0 = arith.constant 0 : i32
    %c0_i32_1 = arith.constant 0 : i32
    %c0_i32_2 = arith.constant 0 : i32
    return %c0_i32, %c0_i32_0, %c0_i32_1 : i32, i32, i32
  }
  func.func @transform_4(%arg0: i32) -> (i32, i32, i32, i32) {
    %c0_i32 = arith.constant 0 : i32
    %c0_i32_0 = arith.constant 0 : i32
    %c0_i32_1 = arith.constant 0 : i32
    %c0_i32_2 = arith.constant 0 : i32
    return %arg0, %c0_i32, %c0_i32_0, %c0_i32_1 : i32, i32, i32, i32
  }
  func.func @transform_5(%arg0: i32) -> (i32, i32, i32, i32) {
    %c0_i32 = arith.constant 0 : i32
    %c0_i32_0 = arith.constant 0 : i32
    %c0_i32_1 = arith.constant 0 : i32
    %c0_i32_2 = arith.constant 0 : i32
    return %arg0, %c0_i32, %c0_i32_0, %c0_i32_1 : i32, i32, i32, i32
  }
  func.func @transform_6(%arg0: i32) -> (i32, i32, i32, i32) {
    %c0_i32 = arith.constant 0 : i32
    %c0_i32_0 = arith.constant 0 : i32
    %c0_i32_1 = arith.constant 0 : i32
    %c0_i32_2 = arith.constant 0 : i32
    return %arg0, %c0_i32, %c0_i32_0, %c0_i32_1 : i32, i32, i32, i32
  }
  func.func @transform_7(%arg0: i32) -> (i32, i32, i32, i32) {
    %c0_i32 = arith.constant 0 : i32
    %c0_i32_0 = arith.constant 0 : i32
    %c0_i32_1 = arith.constant 0 : i32
    %c0_i32_2 = arith.constant 0 : i32
    return %arg0, %c0_i32, %c0_i32_0, %c0_i32_1 : i32, i32, i32, i32
  }
  func.func @transform_8(%arg0: i32) -> (i32, i32, i32, i32) {
    %c0_i32 = arith.constant 0 : i32
    %c0_i32_0 = arith.constant 0 : i32
    %c0_i32_1 = arith.constant 0 : i32
    %c0_i32_2 = arith.constant 0 : i32
    return %arg0, %c0_i32, %c0_i32_0, %c0_i32_1 : i32, i32, i32, i32
  }
  func.func @transform_9(%arg0: i32) -> (i32, i32, i32, i32) {
    %c0_i32 = arith.constant 0 : i32
    %c0_i32_0 = arith.constant 0 : i32
    %c0_i32_1 = arith.constant 0 : i32
    %c0_i32_2 = arith.constant 0 : i32
    return %arg0, %c0_i32, %c0_i32_0, %c0_i32_1 : i32, i32, i32, i32
  }
  func.func @transform_10(%arg0: i32) -> (i32, i32, i32, i32) {
    %c0_i32 = arith.constant 0 : i32
    %c0_i32_0 = arith.constant 0 : i32
    %c0_i32_1 = arith.constant 0 : i32
    %c0_i32_2 = arith.constant 0 : i32
    return %arg0, %c0_i32, %c0_i32_0, %c0_i32_1 : i32, i32, i32, i32
  }
  func.func @transform_11(%arg0: i32) -> (i32, i32, i32) {
    %c0_i32 = arith.constant 0 : i32
    %c0_i32_0 = arith.constant 0 : i32
    %c0_i32_1 = arith.constant 0 : i32
    return %arg0, %c0_i32, %c0_i32_0 : i32, i32, i32
  }
  func.func @transform_12(%arg0: i32) -> (i32, i32, i32, i32) {
    %c0_i32 = arith.constant 0 : i32
    %c0_i32_0 = arith.constant 0 : i32
    %c0_i32_1 = arith.constant 0 : i32
    %c0_i32_2 = arith.constant 0 : i32
    return %arg0, %c0_i32, %c0_i32_0, %c0_i32_1 : i32, i32, i32, i32
  }
  func.func @transform_13(%arg0: i32) -> (i32, i32, i32, i32) {
    %c0_i32 = arith.constant 0 : i32
    %c0_i32_0 = arith.constant 0 : i32
    %c0_i32_1 = arith.constant 0 : i32
    %c0_i32_2 = arith.constant 0 : i32
    return %arg0, %c0_i32, %c0_i32_0, %c0_i32_1 : i32, i32, i32, i32
  }
  func.func @transform_14(%arg0: i32) -> (i32, i32, i32, i32) {
    %c0_i32 = arith.constant 0 : i32
    %c0_i32_0 = arith.constant 0 : i32
    %c0_i32_1 = arith.constant 0 : i32
    %c0_i32_2 = arith.constant 0 : i32
    return %arg0, %c0_i32, %c0_i32_0, %c0_i32_1 : i32, i32, i32, i32
  }
  func.func @transform_15(%arg0: i32) -> (i32, i32, i32, i32) {
    %c0_i32 = arith.constant 0 : i32
    %c0_i32_0 = arith.constant 0 : i32
    %c0_i32_1 = arith.constant 0 : i32
    %c0_i32_2 = arith.constant 0 : i32
    return %arg0, %c0_i32, %c0_i32_0, %c0_i32_1 : i32, i32, i32, i32
  }
  func.func @transform_16(%arg0: i32) -> (i32, i32, i32, i32) {
    %c0_i32 = arith.constant 0 : i32
    %c0_i32_0 = arith.constant 0 : i32
    %c0_i32_1 = arith.constant 0 : i32
    %c0_i32_2 = arith.constant 0 : i32
    return %arg0, %c0_i32, %c0_i32_0, %c0_i32_1 : i32, i32, i32, i32
  }
  func.func @transform_17(%arg0: i32) -> (i32, i32, i32, i32) {
    %c0_i32 = arith.constant 0 : i32
    %c0_i32_0 = arith.constant 0 : i32
    %c0_i32_1 = arith.constant 0 : i32
    %c0_i32_2 = arith.constant 0 : i32
    return %arg0, %c0_i32, %c0_i32_0, %c0_i32_1 : i32, i32, i32, i32
  }
  func.func @transform_18(%arg0: i32) -> (i32, i32, i32, i32) {
    %c0_i32 = arith.constant 0 : i32
    %c0_i32_0 = arith.constant 0 : i32
    %c0_i32_1 = arith.constant 0 : i32
    %c0_i32_2 = arith.constant 0 : i32
    return %arg0, %c0_i32, %c0_i32_0, %c0_i32_1 : i32, i32, i32, i32
  }
  func.func @transform_19(%arg0: i32) -> (i32, i32, i32) {
    %c0_i32 = arith.constant 0 : i32
    %c0_i32_0 = arith.constant 0 : i32
    %c0_i32_1 = arith.constant 0 : i32
    return %arg0, %c0_i32, %c0_i32_0 : i32, i32, i32
  }
  func.func @transform_20(%arg0: i32) -> (i32, i32, i32) {
    %c0_i32 = arith.constant 0 : i32
    %c0_i32_0 = arith.constant 0 : i32
    %c0_i32_1 = arith.constant 0 : i32
    return %arg0, %c0_i32, %c0_i32_0 : i32, i32, i32
  }
  func.func @transform_21(%arg0: i32) -> (i32, i32, i32) {
    %c0_i32 = arith.constant 0 : i32
    %c0_i32_0 = arith.constant 0 : i32
    %c0_i32_1 = arith.constant 0 : i32
    return %arg0, %c0_i32, %c0_i32_0 : i32, i32, i32
  }
  func.func @transform_22(%arg0: i32) -> (i32, i32, i32) {
    %c0_i32 = arith.constant 0 : i32
    %c0_i32_0 = arith.constant 0 : i32
    %c0_i32_1 = arith.constant 0 : i32
    return %arg0, %c0_i32, %c0_i32_0 : i32, i32, i32
  }
  func.func @transform_23(%arg0: i32) -> (i32, i32, i32) {
    %c0_i32 = arith.constant 0 : i32
    %c0_i32_0 = arith.constant 0 : i32
    %c0_i32_1 = arith.constant 0 : i32
    return %arg0, %c0_i32, %c0_i32_0 : i32, i32, i32
  }
  func.func @transform_24(%arg0: i32) -> (i32, i32, i32) {
    %c0_i32 = arith.constant 0 : i32
    %c0_i32_0 = arith.constant 0 : i32
    %c0_i32_1 = arith.constant 0 : i32
    return %arg0, %c0_i32, %c0_i32_0 : i32, i32, i32
  }
  func.func @transform_25(%arg0: i32) -> (i32, i32, i32) {
    %c0_i32 = arith.constant 0 : i32
    %c0_i32_0 = arith.constant 0 : i32
    %c0_i32_1 = arith.constant 0 : i32
    return %arg0, %c0_i32, %c0_i32_0 : i32, i32, i32
  }
  func.func @transform_26(%arg0: i32) -> (i32, i32, i32) {
    %c0_i32 = arith.constant 0 : i32
    %c0_i32_0 = arith.constant 0 : i32
    %c0_i32_1 = arith.constant 0 : i32
    return %arg0, %c0_i32, %c0_i32_0 : i32, i32, i32
  }
  func.func @transform_27(%arg0: i32) -> (i32, i32, i32) {
    %c0_i32 = arith.constant 0 : i32
    %c0_i32_0 = arith.constant 0 : i32
    %c0_i32_1 = arith.constant 0 : i32
    return %arg0, %c0_i32, %c0_i32_0 : i32, i32, i32
  }
  func.func @transform_28(%arg0: i32) -> (i32, i32, i32) {
    %c0_i32 = arith.constant 0 : i32
    %c0_i32_0 = arith.constant 0 : i32
    %c0_i32_1 = arith.constant 0 : i32
    return %arg0, %c0_i32, %c0_i32_0 : i32, i32, i32
  }
  func.func @transform_29(%arg0: i32) -> (i32, i32, i32) {
    %c0_i32 = arith.constant 0 : i32
    %c0_i32_0 = arith.constant 0 : i32
    %c0_i32_1 = arith.constant 0 : i32
    return %arg0, %c0_i32, %c0_i32_0 : i32, i32, i32
  }
  func.func @transform_30(%arg0: i32) -> (i32, i32) {
    %c0_i32 = arith.constant 0 : i32
    %c0_i32_0 = arith.constant 0 : i32
    %c0_i32_1 = arith.constant 0 : i32
    return %c0_i32, %c0_i32_0 : i32, i32
  }
  func.func @transform_31(%arg0: i32) -> (i32, i32) {
    %c0_i32 = arith.constant 0 : i32
    %c0_i32_0 = arith.constant 0 : i32
    %c0_i32_1 = arith.constant 0 : i32
    return %c0_i32, %c0_i32_0 : i32, i32
  }
  func.func @transform_32(%arg0: i32) -> (i32, i32) {
    %c0_i32 = arith.constant 0 : i32
    %c0_i32_0 = arith.constant 0 : i32
    %c0_i32_1 = arith.constant 0 : i32
    return %c0_i32, %c0_i32_0 : i32, i32
  }
}

</mosaic_0001>

<bundles_post_ra>
// kernel: decoder_forward.1
= control target key start
LH: loop header
LB: loop body
LE: loop exit
PB: predicated region body
PF: predicated region fallthrough
CT: control target
= control target key end

     0   :  { %s8751_s6 = smov 1   ;;  %s8752_s10 = smov 2   ;;  %s9625_s0 = inlined_call_operand.smem [shape: u32[33], index: -1, kind: input, shape index: {}] }
   0x1   :  { %s8796_s5 = sld [smem:[%s9625_s0]]   ;;  %s8753_s14 = smov 3  }
   0x2   :  { %s8801_s9 = sld [smem:[%s9625_s0 + %s8751_s6]]   ;;  %s8754_s18 = smov 4  }
   0x3   :  { %s8806_s13 = sld [smem:[%s9625_s0 + %s8752_s10]]   ;;  %s8755_s22 = smov 5  }
   0x4   :  { %s8811_s17 = sld [smem:[%s9625_s0 + %s8753_s14]]   ;;  %s8756_s26 = smov 6  }
   0x5   :  { %s8816_s21 = sld [smem:[%s9625_s0 + %s8754_s18]]   ;;  %s8757_s30 = smov 7  }
   0x6   :  { %s8821_s25 = sld [smem:[%s9625_s0 + %s8755_s22]]   ;;  %s8758_s4 = smov 8  }
   0x7   :  { %9645 = sst [smem:[#allocation6_spill]] %s8796_s5  ;;  %s8759_s10 = smov 9  }
   0x8   :  { %9646 = sst [smem:[#allocation7_spill]] %s8801_s9  ;;  %s8760_s15 = smov 10  }
   0x9   :  { %9647 = sst [smem:[#allocation8_spill]] %s8806_s13  ;;  %s8761_s20 = smov 11  }
   0xa   :  { %9648 = sst [smem:[#allocation9_spill]] %s8811_s17  ;;  %s8763_s1 = smov 13  }
   0xb   :  { %9649 = sst [smem:[#allocation10_spill]] %s8816_s21  ;;  %s8764_s7 = smov 14  }
   0xc   :  { %9650 = sst [smem:[#allocation11_spill]] %s8821_s25  ;;  %s8766_s22 = smov 16  }
   0xd   :  { %s8826_s29 = sld [smem:[%s9625_s0 + %s8756_s26]]   ;;  %s8762_s26 = smov 12  }
   0xe   :  { %s8831_s3 = sld [smem:[%s9625_s0 + %s8757_s30]]   ;;  %s8767_s28 = smov 17  }
   0xf   :  { %s8836_s8 = sld [smem:[%s9625_s0 + %s8758_s4]]  }
  0x10   :  { %s8841_s14 = sld [smem:[%s9625_s0 + %s8759_s10]]  }
  0x11   :  { %s8846_s19 = sld [smem:[%s9625_s0 + %s8760_s15]]   ;;  %s8765_s15 = smov 15  }
  0x12   :  { %s8851_s24 = sld [smem:[%s9625_s0 + %s8761_s20]]  }
  0x13   :  { %9651 = sst [smem:[#allocation12_spill]] %s8826_s29 }
  0x14   :  { %9652 = sst [smem:[#allocation13_spill]] %s8831_s3 }
  0x15   :  { %9653 = sst [smem:[#allocation14_spill]] %s8836_s8 }
  0x16   :  { %9654 = sst [smem:[#allocation15_spill]] %s8841_s14 }
  0x17   :  { %9655 = sst [smem:[#allocation16_spill]] %s8846_s19 }
  0x18   :  { %9656 = sst [smem:[#allocation17_spill]] %s8851_s24 }
  0x19   :  { %s8856_s30 = sld [smem:[%s9625_s0 + %s8762_s26]]  }
  0x1a   :  { %s8861_s6 = sld [smem:[%s9625_s0 + %s8763_s1]]  }
  0x1b   :  { %s8866_s12 = sld [smem:[%s9625_s0 + %s8764_s7]]   ;;  %s8768_s7 = smov 18  }
  0x1c   :  { %s8871_s20 = sld [smem:[%s9625_s0 + %s8765_s15]]   ;;  %s8769_s15 = smov 19  }
  0x1d   :  { %s8876_s27 = sld [smem:[%s9625_s0 + %s8766_s22]]   ;;  %s8770_s22 = smov 20  }
  0x1e   :  { %s8881_s4 = sld [smem:[%s9625_s0 + %s8767_s28]]   ;;  %s8771_s28 = smov 21  }
  0x1f   :  { %9657 = sst [smem:[#allocation18_spill]] %s8856_s30 }
  0x20   :  { %9658 = sst [smem:[#allocation19_spill]] %s8861_s6 }
  0x21   :  { %9659 = sst [smem:[#allocation20_spill]] %s8866_s12 }
  0x22   :  { %9660 = sst [smem:[#allocation21_spill]] %s8871_s20 }
  0x23   :  { %9661 = sst [smem:[#allocation22_spill]] %s8876_s27 }
  0x24   :  { %s8886_s17 = sld [smem:[%s9625_s0 + %s8768_s7]]   ;;  %s8772_s7 = smov 22  }
  0x25   :  { %s8891_s9 = sld [smem:[%s9625_s0 + %s8769_s15]]   ;;  %s8773_s15 = smov 23  }
  0x26   :  { %s8896_s13 = sld [smem:[%s9625_s0 + %s8770_s22]]   ;;  %s8774_s22 = smov 24  }
  0x27   :  { %s8901_s5 = sld [smem:[%s9625_s0 + %s8771_s28]]   ;;  %s8775_s28 = smov 25  }
  0x2a   :  { %9662 = sst [smem:[#allocation23_spill]] %s8886_s17 }
  0x2b   :  { %9663 = sst [smem:[#allocation24_spill]] %s8891_s9 }
  0x2c   :  { %9664 = sst [smem:[#allocation25_spill]] %s8896_s13 }
  0x2d   :  { %9665 = sst [smem:[#allocation26_spill]] %s8901_s5 }
  0x2e   :  { %s8906_s17 = sld [smem:[%s9625_s0 + %s8772_s7]]   ;;  %s8776_s7 = smov 26  }
  0x2f   :  { %s8911_s9 = sld [smem:[%s9625_s0 + %s8773_s15]]   ;;  %s8777_s15 = smov 27  }
  0x30   :  { %s8916_s13 = sld [smem:[%s9625_s0 + %s8774_s22]]   ;;  %s8778_s22 = smov 28  }
  0x31   :  { %s8921_s5 = sld [smem:[%s9625_s0 + %s8775_s28]]   ;;  %s8779_s28 = smov 29  }
  0x34   :  { %9666 = sst [smem:[#allocation27_spill]] %s8906_s17 }
  0x35   :  { %9667 = sst [smem:[#allocation28_spill]] %s8911_s9 }
  0x36   :  { %9668 = sst [smem:[#allocation29_spill]] %s8916_s13 }
  0x37   :  { %9669 = sst [smem:[#allocation30_spill]] %s8921_s5 }
  0x38   :  { %s8926_s17 = sld [smem:[%s9625_s0 + %s8776_s7]]   ;;  %s8780_s7 = smov 30  }
  0x39   :  { %s8931_s9 = sld [smem:[%s9625_s0 + %s8777_s15]]   ;;  %s8781_s15 = smov 31  }
  0x3a   :  { %s8936_s13 = sld [smem:[%s9625_s0 + %s8778_s22]]   ;;  %s8782_s22 = smov 32  }
  0x3b   :  { %s8941_s5 = sld [smem:[%s9625_s0 + %s8779_s28]]  }
  0x3e   :  { %9670 = sst [smem:[#allocation31_spill]] %s8926_s17 }
  0x3f   :  { %9671 = sst [smem:[#allocation32_spill]] %s8931_s9 }
  0x40   :  { %9672 = sst [smem:[#allocation33_spill]] %s8936_s13 }
  0x41   :  { %s8946_s17 = sld [smem:[%s9625_s0 + %s8780_s7]]  }
  0x42   :  { %s8951_s9 = sld [smem:[%s9625_s0 + %s8781_s15]]  }
  0x43   :  { %s8956_s13 = sld [smem:[%s9625_s0 + %s8782_s22]]  }
  0x47   :  { %9673 = sst [smem:[#allocation34_spill]] %s8946_s17 }
  0x48   :  { %9674 = sst [smem:[#allocation35_spill]] %s8951_s9 }
  0x49   :  { %9675 = sst [smem:[#allocation36_spill]] %s8956_s13 }
  0x4a   :  { %70 = vsyncpa [#allocation4], 0  ;;  %s8958_s28 = smov 0  }
  0x4b LB: > { %9676 = sst [smem:[#allocation37_spill]] %s8749_s28  ;;  %s8964_s1 = sadd.s32 4294967295, %s8749_s28   ;;  %s8749_s28 = sphi %s8958_s28, %s76_s28  }
  0x4c   : > { %9677 = sst [smem:[#allocation38_spill]] %s8964_s1  ;;  %p7551_p0 = scmp.ge.s32.totalorder %s8749_s28, 1 }
  0x4d   : > { %p1115_p1 = scmp.lt.s32.totalorder %s8749_s28, 3 }
  0x4f   : > { %p1116_p2 = pnand %p7551_p0, %p1115_p1 }
  0x51   : > { %1119 = sbr.rel (%p1116_p2) target bundleno = 9509 (0x2525), region = 148 }
  0x56   : > { %s9678_s21 = sld [smem:[#allocation10_spill]]  ;;  %p1291_p3 = scmp.lt.s32.totalorder %s8964_s1, 1 }
  0x57   : > { %s9679_s25 = sld [smem:[#allocation11_spill]] }
  0x58   : > { %s9680_s29 = sld [smem:[#allocation12_spill]] }
  0x59   : > { %s9681_s3 = sld [smem:[#allocation13_spill]] }
  0x5a   : > { %s9682_s8 = sld [smem:[#allocation14_spill]] }
  0x5b   : > { %s9683_s14 = sld [smem:[#allocation15_spill]] }
  0x5c   : > { %s9685_s19 = sld [smem:[#allocation16_spill]] }
  0x5d   : > { %s9686_s30 = sld [smem:[#allocation18_spill]] }
  0x5e   : > { %s9687_s6 = sld [smem:[#allocation19_spill]] }
  0x5f   : > { %s9688_s12 = sld [smem:[#allocation20_spill]] }
  0x60   : > { %s9689_s20 = sld [smem:[#allocation21_spill]] }
  0x61   : > { %s8970_s0 = scalar_select %p1291_p3, %s8964_s1, 1 }
  0x62   : > { %s9690_s27 = sld [smem:[#allocation22_spill]] }
  0x63   : > { %s7832_s2 = sshll.u32 %s8970_s0, 7  ;;  %s7554_s7 = sshll.u32 %s8970_s0, 2 }
  0x64   : > { %s9691_s10 = sld [smem:[#allocation23_spill]]  ;;  %s8975_s11 = scalar_lea.vmem %s9678_s21, %s7832_s2 }
  0x65   : > { %9692 = sst [smem:[#allocation39_spill]] %s8975_s11  ;;  %s8978_s16 = scalar_lea.vmem %s9679_s25, %s7554_s7 }
  0x66   : > { %s9693_s15 = sld [smem:[#allocation24_spill]]  ;;  %s8981_s22 = scalar_lea.vmem %s9680_s29, %s7832_s2 }
  0x67   : > { %9694 = sst [smem:[#allocation40_spill]] %s8978_s16  ;;  %s8984_s26 = scalar_lea.vmem %s9681_s3, %s7554_s7 }
  0x68   : > { %s9695_s18 = sld [smem:[#allocation25_spill]]  ;;  %s8987_s28 = scalar_lea.vmem %s9682_s8, %s7832_s2 }
  0x69   : > { %9696 = sst [smem:[#allocation41_spill]] %s8981_s22  ;;  %s8990_s9 = scalar_lea.vmem %s9683_s14, %s7554_s7 }
  0x6a   : > { %s9697_s23 = sld [smem:[#allocation26_spill]]  ;;  %s7835_s17 = sshll.u32 %s8970_s0, 5 }
  0x6b   : > { %9698 = sst [smem:[#allocation42_spill]] %s8984_s26  ;;  %s8996_s29 = scalar_lea.vmem %s9685_s19, %s7835_s17 }
  0x6c   : > { %9699 = sst [smem:[#allocation43_spill]] %s8987_s28  ;;  %s8999_s3 = scalar_lea.vmem %s9686_s30, %s7832_s2 }
  0x6d   : > { %s9700_s13 = sld [smem:[#allocation27_spill]]  ;;  %s9002_s26 = scalar_lea.vmem %s9687_s6, %s7554_s7 }
  0x6e   : > { %9701 = sst [smem:[#allocation44_spill]] %s8990_s9  ;;  %s9005_s9 = scalar_lea.vmem %s9688_s12, %s7832_s2 }
  0x6f   : > { %s9702_s21 = sld [smem:[#allocation28_spill]]  ;;  %s9008_s28 = scalar_lea.vmem %s9689_s20, %s7554_s7 }
  0x70   : > { %s9703_s11 = sld [smem:[#allocation29_spill]]  ;;  %s9011_s25 = scalar_lea.vmem %s9690_s27, %s7832_s2 }
  0x71   : > { %s9704_s16 = sld [smem:[#allocation30_spill]]  ;;  %s9014_s19 = scalar_lea.vmem %s8881_s4, %s7554_s7 }
  0x72   : > { %9705 = sst [smem:[#allocation45_spill]] %s8996_s29  ;;  %s9017_s24 = scalar_lea.vmem %s9691_s10, %s7835_s17 }
  0x73   : > { %s9706_s22 = sld [smem:[#allocation31_spill]]  ;;  %s1360_s30 = scalar_lea.vmem %s9693_s15, %s8970_s0 }
  0x74   : > { %9707 = sst [smem:[#allocation46_spill]] %s8999_s3  ;;  %s9022_s3 = scalar_lea.vmem %s9695_s18, %s7835_s17 }
  0x75   : > { %s9708_s8 = sld [smem:[#allocation32_spill]]  ;;  %s1368_s29 = scalar_lea.vmem %s9697_s23, %s8970_s0 }
  0x76   : > { %9709 = sst [smem:[#allocation47_spill]] %s9002_s26  ;;  %s7841_s6 = sshll.u32 %s8970_s0, 6 }
  0x77   : > { %s9710_s14 = sld [smem:[#allocation33_spill]]  ;;  %s9028_s26 = scalar_lea.vmem %s9700_s13, %s7841_s6 }
  0x78   : > { %9711 = sst [smem:[#allocation48_spill]] %s9005_s9  ;;  %s1376_s1 = scalar_lea.vmem %s9702_s21, %s8970_s0 }
  0x79   : > { %9712 = sst [smem:[#allocation49_spill]] %s9008_s28  ;;  %s1379_s12 = scalar_lea.vmem %s9703_s11, %s8970_s0 }
  0x7a   : > { %9713 = sst [smem:[#allocation50_spill]] %s9011_s25  ;;  %s1382_s9 = scalar_lea.vmem %s9704_s16, %s8970_s0 }
  0x7b   : > { %s1385_s20 = scalar_lea.vmem %s9706_s22, %s8970_s0  ;;  %s1388_s28 = scalar_lea.vmem %s9708_s8, %s8970_s0 }
  0x7c   : > { %s1394_s27 = scalar_lea.vmem %s8941_s5, %s8970_s0  ;;  %s9714_s25 = sld [smem:[#allocation38_spill]] }
  0x7d   : > { %s1391_s2 = scalar_lea.vmem %s9710_s14, %s8970_s0 }
  0x82   : > { %p7578_p4 = scmp.ne.s32.totalorder %s9714_s25, 0 }
  0x83   : > { %s9715_s7 = sld [smem:[#allocation6_spill]] (!%p7578_p4) }
  0x84   : > { %1398 = sbr.rel (%p7578_p4) target bundleno = 139 (0x8b), region = 152 }
  0x89   : > { %v1399_v0 = vld [vmem:[%s9715_s7] sm:$0xff]  ;;  %vm1401_vm0 = vcmask 261120   ;;  %v1400_v1 = vld [vmem:[%s9715_s7 + $0x8] sm:$0xff] }
  0x8a   : > { %1402 = vst.msk [vmem:[#allocation2] sm:$0xff] %vm1401_vm0, %v1399_v0  ;;  %1403 = vst.msk [vmem:[#allocation2 + $0x8] sm:$0xff] %vm1401_vm0, %v1400_v1 }
  0x8b PF: > { %s9716_s13 = sld [smem:[#allocation41_spill]]  ;;  %vm1422_vm1 = vcmask 261120   ;;  %v8783_v16 = vmov 0.0   ;;  %vm8784_vm2 = vmmov 0   ;;  %vm1676_vm3 = vcmask 64512  }
  0x8c   : > { %s9717_s17 = sld [smem:[#allocation39_spill]]  ;;  %vm7018_vm4 = vcmask 523264  }
  0x8d   : > { %s9718_s21 = sld [smem:[#allocation43_spill]] }
  0x8e   : > { %s9719_s25 = sld [smem:[#allocation42_spill]] }
  0x8f   : > { %s9720_s8 = sld [smem:[#allocation40_spill]] }
  0x90   : > { %s9721_s14 = sld [smem:[#allocation44_spill]] }
  0x91   : > { %v1507_v2 = vld [vmem:[%s9716_s13 + $0x18] sm:$0xff]  ;;  %v1506_v4 = vld [vmem:[%s9716_s13 + $0x10] sm:$0xff]  ;;  %v1505_v6 = vld [vmem:[%s9716_s13 + $0x8] sm:$0xff]  ;;  %s9722_s6 = sld [smem:[#allocation8_spill]] }
  0x92   : > { %v1414_v3 = vld [vmem:[%s9717_s17 + $0x18] sm:$0xff]  ;;  %8101 = vmatprep.subr.mxu1 %v1507_v2  ;;  %v1413_v5 = vld [vmem:[%s9717_s17 + $0x10] sm:$0xff]  ;;  %v1412_v7 = vld [vmem:[%s9717_s17 + $0x8] sm:$0xff]  ;;  %s9723_s10 = sld [smem:[#allocation45_spill]] }
  0x93   : > { %8090 = vmatprep.subr.mxu0 %v1414_v3  ;;  %8102 = vmatpush3.msra.mxu1 %v1507_v2  ;;  %v1504_v8 = vld [vmem:[%s9716_s13] sm:$0xff]  ;;  %v9057_v11 = vld [vmem:[#allocation2 + $0x8] sm:$0xff]  ;;  %v1593_v12 = vld [vmem:[%s9718_s21 + $0x18] sm:$0xff]  ;;  %s9724_s11 = sld [smem:[#allocation17_spill]] }
  0x94   : > { %8091 = vmatpush3.msra.mxu0 %v1414_v3  ;;  %8103 = vmatprep.subr.mxu1 %v1506_v4  ;;  %v1411_v9 = vld [vmem:[%s9717_s17] sm:$0xff]  ;;  %v1592_v13 = vld [vmem:[%s9718_s21 + $0x10] sm:$0xff]  ;;  %v1591_v14 = vld [vmem:[%s9718_s21 + $0x8] sm:$0xff]  ;;  %s9726_s16 = sld [smem:[#allocation48_spill]] }
  0x95   : > { %8092 = vmatprep.subr.mxu0 %v1413_v5  ;;  %8104 = vmatpush3.msra.mxu1 %v1506_v4  ;;  %v9055_v10 = vld [vmem:[#allocation2] sm:$0xff]  ;;  %v7608_v61 = vld [vmem:[%s9716_s13 + $0x38] sm:$0xff]  ;;  %v7599_v63 = vld [vmem:[%s9717_s17 + $0x30] sm:$0xff]  ;;  %s9727_s18 = sld [smem:[#allocation46_spill]] }
  0x96   : > { %8093 = vmatpush3.msra.mxu0 %v1413_v5  ;;  %8105 = vmatprep.subr.mxu1 %v1505_v6  ;;  %v1590_v15 = vld [vmem:[%s9718_s21] sm:$0xff]  ;;  %v7600_v62 = vld [vmem:[%s9717_s17 + $0x38] sm:$0xff]  ;;  %v7598_v0 = vld [vmem:[%s9717_s17 + $0x28] sm:$0xff]  ;;  %s9728_s22 = sld [smem:[#allocation7_spill]] }
  0x97   : > { %8094 = vmatprep.subr.mxu0 %v1412_v7  ;;  %8106 = vmatpush3.msra.mxu1 %v1505_v6  ;;  %v7582_v17 = vld [vmem:[%s9719_s25] ss:$0 sm:$0xff]  ;;  %v9098_v39 = vld [vmem:[%s9722_s6 + $0x8] sm:$0xff]  ;;  %v7607_v5 = vld [vmem:[%s9716_s13 + $0x30] sm:$0xff] }
  0x98   : > { %8095 = vmatpush3.msra.mxu0 %v1412_v7  ;;  %8107 = vmatprep.subr.mxu1 %v1504_v8  ;;  %v7579_v18 = vld [vmem:[%s9720_s8] ss:$0 sm:$0xff]  ;;  %v7606_v7 = vld [vmem:[%s9716_s13 + $0x28] sm:$0xff] }
  0x99   : > { %8096 = vmatprep.subr.mxu0 %v1411_v9  ;;  %8108 = vmatpush3.msra.mxu1 %v1504_v8  ;;  %v7585_v27 = vld [vmem:[%s9721_s14] ss:$0 sm:$0xff]  ;;  %s9725_s15 = scalar_lea.vmem %s9724_s11, %s8970_s0 }
  0x9a   : > { %8109 = vmatprep.mubr.msk.f32.mxu1 %vm1422_vm1, %v9055_v10  ;;  %8097 = vmatpush3.msra.mxu0 %v1411_v9  ;;  %v9095_v35 = vld [vmem:[%s9722_s6] sm:$0xff] }
  0x9b   : > { %8098 = vmatprep.mubr.msk.f32.mxu0 %vm1422_vm1, %v9055_v10  ;;  %8110 = vmatmul.mubr.msk.f32.vlgmr.msra.gmra.mxu1 %vm1422_vm1, %v9057_v11  ;;  %v2001_v60 = vld [vmem:[%s9723_s10] sm:$0xff] }
  0x9c   : > { %8099 = vmatmul.mubr.msk.f32.vlgmr.msra.gmra.mxu0 %vm1422_vm1, %v9057_v11  ;;  %8112 = vmatprep.subr.mxu0 %v1593_v12  ;;  %v7597_v1 = vld [vmem:[%s9717_s17 + $0x20] sm:$0xff] }
  0x9d   : > { %8120 = vmatprep.mubr.msk.f32.mxu0 %vm1422_vm1, %v9055_v10  ;;  %8113 = vmatpush3.msra.mxu0 %v1593_v12  ;;  %v7605_v8 = vld [vmem:[%s9716_s13 + $0x20] sm:$0xff] }
  0x9e   : > { %8114 = vmatprep.subr.mxu0 %v1592_v13  ;;  %8128 = vmatprep.subr.mxu1 %v8783_v16 }
  0x9f   : > { %8115 = vmatpush3.msra.mxu0 %v1592_v13  ;;  %8130 = vmatprep.mubr.msk.f32.mxu1 %vm8784_vm2, %v8783_v16 }
  0xa0   : > { %8116 = vmatprep.subr.mxu0 %v1591_v14 }
  0xa1   : > { %8117 = vmatpush3.msra.mxu0 %v1591_v14 }
  0xa2   : > { %8118 = vmatprep.subr.mxu0 %v1590_v15 }
  0xa3   : > { %8119 = vmatpush3.msra.mxu0 %v1590_v15  ;;  %v7610_v15 = vld [vmem:[%s9719_s25 + $0x1] ss:$0 sm:$0xff] }
  0xa4   : > { %8121 = vmatmul.mubr.msk.f32.vlgmr.msra.gmra.mxu0 %vm1422_vm1, %v9057_v11  ;;  %8123 = vmatprep.subr.mxu0 %v8783_v16 }
  0xa5   : > { %8125 = vmatprep.mubr.msk.f32.mxu0 %vm8784_vm2, %v8783_v16 }
 0x15b   : > { %v8111_v19 = vpop.f32.mrf.mxu1 }
 0x15c   : > { %v8100_v20 = vpop.f32.mrf.mxu0  ;;  %v1587_v21 = vadd.f32 %v8111_v19, %v7582_v17 }
 0x15d   : > { %v1501_v22 = vadd.f32 %v8100_v20, %v7579_v18  ;;  %v1581_v23 = vpop.f32.mrf.mxu1 }
 0x15e   : > { %v1582_v24 = vadd.f32 %v7582_v17, %v1581_v23  ;;  %v1495_v25 = vpop.f32.mrf.mxu0  ;;  %8129 = vmatpush3.xpose.msk.msra.mxu1 %vm1676_vm3, %v1587_v21 }
 0x15f   : > { %8138 = vmatprep.subr.mxu1 %v8783_v16  ;;  %v1496_v26 = vadd.f32 %v7579_v18, %v1495_v25  ;;  %v7602_v18 = vld [vmem:[%s9720_s8 + $0x1] ss:$0 sm:$0xff]  ;;  %v7615_v25 = vld [vmem:[%s9718_s21 + $0x30] sm:$0xff] }
 0x160   : > { %8124 = vmatpush3.xpose.msk.msra.mxu0 %vm1676_vm3, %v1582_v24  ;;  %v7616_v24 = vld [vmem:[%s9718_s21 + $0x38] sm:$0xff] }
 0x161   : > { %8131 = vmatmul.mubr.msk.f32.vlgmr.msra.gmra.mxu1 %vm1676_vm3, %v1501_v22  ;;  %8133 = vmatprep.subr.mxu0 %v8783_v16 }
 0x162   : > { %8140 = vmatprep.mubr.msk.f32.mxu1 %vm8784_vm2, %v8783_v16 }
 0x163   : > { %8126 = vmatmul.mubr.msk.f32.vlgmr.msra.gmra.mxu0 %vm1676_vm3, %v1496_v26  ;;  %v7614_v26 = vld [vmem:[%s9718_s21 + $0x28] sm:$0xff] }
 0x164   : > { %8135 = vmatprep.mubr.msk.f32.mxu0 %vm8784_vm2, %v8783_v16  ;;  %v8122_v28 = vpop.f32.mrf.mxu0 }
 0x165   : > { %v1673_v29 = vadd.f32 %v8122_v28, %v7585_v27 }
 0x166   : > { %v1667_v30 = vpop.f32.mrf.mxu0 }
 0x167   : > { %v1668_v31 = vadd.f32 %v7585_v27, %v1667_v30  ;;  %8139 = vmatpush3.msra.mxu1 %v1673_v29  ;;  %v7613_v27 = vld [vmem:[%s9718_s21 + $0x20] sm:$0xff] }
 0x168   : > { %8148 = vmatprep.subr.mxu1 %v7600_v62 }
 0x169   : > { %8134 = vmatpush3.msra.mxu0 %v1668_v31 }
 0x16a   : > { %8143 = vmatprep.subr.mxu0 %v2001_v60 }
 0x221   : > { %v1825_v32 = vpop.f32.mrf.mxu1 }
 0x222   : > { %v1830_v36 = vmul.f32 0.35355338, %v1825_v32 }
 0x223   : > { %v1749_v33 = vpop.f32.mrf.mxu0  ;;  %v8132_v34 = vpop.f32.mrf.mxu1 }
 0x224   : > { %v1829_v37 = vmul.f32 0.35355338, %v1749_v33  ;;  %v1832_v42 = vadd.f32 %v1830_v36, %v9098_v39 }
 0x225   : > { %v8127_v38 = vpop.f32.mrf.mxu0 }
 0x226   : > { %v1831_v40 = vadd.f32 %v1829_v37, %v9095_v35  ;;  %v1836_v43 = vsel %vm1676_vm3, %v1832_v42, -inf }
 0x228   : > { %v1833_v41 = vsel %vm1676_vm3, %v1831_v40, -inf }
 0x229   : > { %1834 = vmax.xlane.f32.xlu0 %v1833_v41 }
 0x22d   : > { %1837 = vmax.xlane.f32.xlu0 %v1836_v43 }
 0x2b2   : > { %v1835_v44 = vpop.xlane.xlu0 %1834 }
 0x2b3   : > { %v1839_v45 = vsub.f32 %v1831_v40, %v1835_v44 }
 0x2b5   : > { %v1841_v46 = vmul.f32 1.442695, %v1839_v45 }
 0x2b6   : > { %v1838_v47 = vpop.xlane.xlu0 %1837 }
 0x2b7   : > { %8635 = vpow2.f32 %v1841_v46  ;;  %v1840_v48 = vsub.f32 %v1832_v42, %v1838_v47 }
 0x2b9   : > { %v1843_v49 = vmul.f32 1.442695, %v1840_v48 }
 0x2bb   : > { %8637 = vpow2.f32 %v1843_v49 }
 0x2c4   : > { %v8636_v50 = vpop.eup %8635 }
 0x2c5   : > { %v1845_v51 = vsel %vm1676_vm3, %v8636_v50, 0.0 }
 0x2c6   : > { %1846 = vadd.xlane.f32.xlu1 %v1845_v51  ;;  %v7618_v51 = vld [vmem:[%s9721_s14 + $0x1] ss:$0 sm:$0xff] }
 0x2c8   : > { %v8638_v52 = vpop.eup %8637 }
 0x2c9   : > { %v1848_v53 = vsel %vm1676_vm3, %v8638_v52, 0.0 }
 0x2ca   : > { %1849 = vadd.xlane.f32.xlu1 %v1848_v53 }
 0x34f   : > { %v1847_v54 = vpop.xlane.xlu1 %1846 }
 0x350   : > { %8639 = vrcp.f32 %v1847_v54 }
 0x353   : > { %v1850_v55 = vpop.xlane.xlu1 %1849 }
 0x354   : > { %8641 = vrcp.f32 %v1850_v55 }
 0x35d   : > { %v8640_v56 = vpop.eup %8639 }
 0x35e   : > { %v1853_v57 = vmul.f32 %v8640_v56, %v8636_v50 }
 0x360   : > { %8136 = vmatmul.mubr.msk.f32.vlgmr.msra.gmra.mxu0 %vm1676_vm3, %v1853_v57 }
 0x361   : > { %v8642_v58 = vpop.eup %8641  ;;  %8144 = vmatpush3.msra.mxu0 %v2001_v60 }
 0x362   : > { %v1854_v59 = vmul.f32 %v8642_v58, %v8638_v52  ;;  %8159 = vmatprep.subr.mxu0 %v7608_v61 }
 0x364   : > { %8141 = vmatmul.mubr.msk.f32.vlgmr.msra.gmra.mxu1 %vm1676_vm3, %v1854_v59 }
 0x365   : > { %8156 = vmatprep.mubr.msk.f32.mxu1 %vm1422_vm1, %v9055_v10  ;;  %8149 = vmatpush3.msra.mxu1 %v7600_v62  ;;  %v7641_v62 = vld [vmem:[%s9716_s13 + $0x58] sm:$0xff] }
 0x366   : > { %8150 = vmatprep.subr.mxu1 %v7599_v63 }
 0x367   : > { %8151 = vmatpush3.msra.mxu1 %v7599_v63  ;;  %v7633_v63 = vld [vmem:[%s9717_s17 + $0x58] sm:$0xff] }
 0x368   : > { %8152 = vmatprep.subr.mxu1 %v7598_v0 }
 0x369   : > { %8153 = vmatpush3.msra.mxu1 %v7598_v0  ;;  %v7632_v0 = vld [vmem:[%s9717_s17 + $0x50] sm:$0xff] }
 0x36a   : > { %8154 = vmatprep.subr.mxu1 %v7597_v1 }
 0x36b   : > { %8155 = vmatpush3.msra.mxu1 %v7597_v1  ;;  %v7631_v1 = vld [vmem:[%s9717_s17 + $0x48] sm:$0xff] }
 0x36c   : > { %8157 = vmatmul.mubr.msk.f32.vlgmr.msra.gmra.mxu1 %vm1422_vm1, %v9057_v11  ;;  %8170 = vmatprep.subr.mxu1 %v7616_v24 }
 0x36d   : > { %8178 = vmatprep.mubr.msk.f32.mxu1 %vm1422_vm1, %v9055_v10  ;;  %8171 = vmatpush3.msra.mxu1 %v7616_v24  ;;  %v7643_v24 = vld [vmem:[%s9719_s25 + $0x2] ss:$0 sm:$0xff] }
 0x36e   : > { %8172 = vmatprep.subr.mxu1 %v7615_v25 }
 0x36f   : > { %8173 = vmatpush3.msra.mxu1 %v7615_v25 }
 0x370   : > { %8174 = vmatprep.subr.mxu1 %v7614_v26 }
 0x371   : > { %8175 = vmatpush3.msra.mxu1 %v7614_v26  ;;  %v7635_v26 = vld [vmem:[%s9720_s8 + $0x2] ss:$0 sm:$0xff] }
 0x372   : > { %8176 = vmatprep.subr.mxu1 %v7613_v27 }
 0x373   : > { %8177 = vmatpush3.msra.mxu1 %v7613_v27 }
 0x374   : > { %8179 = vmatmul.mubr.msk.f32.vlgmr.msra.gmra.mxu1 %vm1422_vm1, %v9057_v11  ;;  %8191 = vmatprep.subr.mxu1 %v8783_v16 }
 0x375   : > { %8193 = vmatprep.mubr.msk.f32.mxu1 %vm8784_vm2, %v8783_v16 }
 0x420   : > { %v1924_v2 = vpop.f32.mrf.mxu0 }
 0x421   : > { %8145 = vmatprep.mubr.msk.f32.mxu0 %vm1676_vm3, %v1924_v2  ;;  %v7630_v2 = vld [vmem:[%s9717_s17 + $0x40] sm:$0xff] }
 0x422   : > { %v8137_v3 = vpop.f32.mrf.mxu0 }
 0x424   : > { %v1997_v4 = vpop.f32.mrf.mxu1 }
 0x425   : > { %8146 = vmatmul.mubr.msk.f32.vlgmr.msra.gmra.mxu0 %vm1676_vm3, %v1997_v4 }
 0x426   : > { %8160 = vmatpush3.msra.mxu0 %v7608_v61  ;;  %v8142_v6 = vpop.f32.mrf.mxu1  ;;  %8167 = vmatprep.mubr.msk.f32.mxu0 %vm1422_vm1, %v9055_v10  ;;  %v7627_v61 = vld [vmem:[%s9723_s10 + $0x8] sm:$0xff] }
 0x427   : > { %8161 = vmatprep.subr.mxu0 %v7607_v5  ;;  %v7640_v6 = vld [vmem:[%s9716_s13 + $0x50] sm:$0xff] }
 0x428   : > { %8162 = vmatpush3.msra.mxu0 %v7607_v5 }
 0x429   : > { %8163 = vmatprep.subr.mxu0 %v7606_v7 }
 0x42a   : > { %8164 = vmatpush3.msra.mxu0 %v7606_v7 }
 0x42b   : > { %8165 = vmatprep.subr.mxu0 %v7605_v8 }
 0x42c   : > { %8166 = vmatpush3.msra.mxu0 %v7605_v8  ;;  %v8158_v13 = vpop.f32.mrf.mxu1  ;;  %v7639_v8 = vld [vmem:[%s9716_s13 + $0x48] sm:$0xff] }
 0x42d   : > { %8168 = vmatmul.mubr.msk.f32.vlgmr.msra.gmra.mxu0 %vm1422_vm1, %v9057_v11  ;;  %8181 = vmatprep.subr.mxu0 %v8783_v16  ;;  %v2176_v23 = vadd.f32 %v8158_v13, %v7602_v18  ;;  %v7638_v13 = vld [vmem:[%s9716_s13 + $0x40] sm:$0xff] }
 0x42e   : > { %8183 = vmatprep.mubr.msk.f32.mxu0 %vm8784_vm2, %v8783_v16  ;;  %v2170_v20 = vpop.f32.mrf.mxu1 }
 0x42f   : > { %v2171_v21 = vadd.f32 %v7602_v18, %v2170_v20 }
 0x434   : > { %v8180_v50 = vpop.f32.mrf.mxu1 }
 0x435   : > { %v2352_v52 = vadd.f32 %v8180_v50, %v7618_v51 }
 0x436   : > { %v2346_v53 = vpop.f32.mrf.mxu1 }
 0x437   : > { %v2347_v54 = vadd.f32 %v7618_v51, %v2346_v53 }
 0x439   : > { %8192 = vmatpush3.msra.mxu1 %v2347_v54 }
 0x43a   : > { %8201 = vmatprep.subr.mxu1 %v7627_v61 }
 0x4e5   : > { %v9132_v9 = vpop.f32.mrf.mxu0 }
 0x4e7   : > { %v9134_v12 = vpop.f32.mrf.mxu0 }
 0x4ed   : > { %v8169_v14 = vpop.f32.mrf.mxu0 }
 0x4ee   : > { %v2264_v22 = vadd.f32 %v8169_v14, %v7610_v15  ;;  %v7596_v14 = vld [vmem:[%s9725_s15] ss:$0 sm:$0xff] }
 0x4ef   : > { %v2258_v17 = vpop.f32.mrf.mxu0  ;;  %v2089_v18 = vadd.f32 %v7596_v14, %v9134_v12 }
 0x4f0   : > { %v2259_v19 = vadd.f32 %v7610_v15, %v2258_v17  ;;  %v2090_v15 = vadd.f32 %v9132_v9, %v7596_v14 }
 0x4f2   : > { %8182 = vmatpush3.xpose.msk.msra.mxu0 %vm1676_vm3, %v2259_v19 }
 0x4f3   : > { %8186 = vmatprep.subr.mxu0 %v8783_v16 }
 0x4f5   : > { %8184 = vmatmul.mubr.msk.f32.vlgmr.msra.gmra.mxu0 %vm1676_vm3, %v2171_v21 }
 0x4f6   : > { %8187 = vmatpush3.xpose.msk.msra.mxu0 %vm1676_vm3, %v2264_v22  ;;  %8188 = vmatprep.mubr.msk.f32.mxu0 %vm8784_vm2, %v8783_v16 }
 0x4f7   : > { %8196 = vmatprep.subr.mxu0 %v8783_v16 }
 0x4f9   : > { %8189 = vmatmul.mubr.msk.f32.vlgmr.msra.gmra.mxu0 %vm1676_vm3, %v2176_v23 }
 0x4fa   : > { %8198 = vmatprep.mubr.msk.f32.mxu0 %vm8784_vm2, %v8783_v16  ;;  %8197 = vmatpush3.msra.mxu0 %v2352_v52 }
 0x4fb   : > { %8206 = vmatprep.subr.mxu0 %v7633_v63 }
 0x5b5   : > { %v2427_v28 = vpop.f32.mrf.mxu0 }
 0x5b6   : > { %v2507_v29 = vmul.f32 0.35355338, %v2427_v28 }
 0x5b7   : > { %v8185_v30 = vpop.f32.mrf.mxu0 }
 0x5b8   : > { %v2509_v31 = vadd.f32 %v2507_v29, %v9095_v35  ;;  %v7649_v30 = vld [vmem:[%s9718_s21 + $0x58] sm:$0xff] }
 0x5b9   : > { %v2503_v32 = vpop.f32.mrf.mxu0 }
 0x5ba   : > { %v2508_v33 = vmul.f32 0.35355338, %v2503_v32  ;;  %v2511_v34 = vsel %vm1676_vm3, %v2509_v31, -inf  ;;  %v7647_v32 = vld [vmem:[%s9718_s21 + $0x48] sm:$0xff] }
 0x5bb   : > { %2512 = vmax.xlane.f32.xlu0 %v2511_v34  ;;  %v8190_v36 = vpop.f32.mrf.mxu0 }
 0x5bc   : > { %v2510_v37 = vadd.f32 %v2508_v33, %v9098_v39  ;;  %v7646_v33 = vld [vmem:[%s9718_s21 + $0x40] sm:$0xff] }
 0x5be   : > { %v2514_v38 = vsel %vm1676_vm3, %v2510_v37, -inf }
 0x5bf   : > { %2515 = vmax.xlane.f32.xlu1 %v2514_v38 }
 0x644   : > { %v2513_v40 = vpop.xlane.xlu0 %2512 }
 0x645   : > { %v2517_v41 = vsub.f32 %v2509_v31, %v2513_v40  ;;  %v7648_v31 = vld [vmem:[%s9718_s21 + $0x50] sm:$0xff] }
 0x647   : > { %v2519_v42 = vmul.f32 1.442695, %v2517_v41 }
 0x648   : > { %v2516_v43 = vpop.xlane.xlu1 %2515 }
 0x649   : > { %8643 = vpow2.f32 %v2519_v42  ;;  %v2518_v44 = vsub.f32 %v2510_v37, %v2516_v43 }
 0x64b   : > { %v2521_v45 = vmul.f32 1.442695, %v2518_v44 }
 0x64d   : > { %8645 = vpow2.f32 %v2521_v45 }
 0x656   : > { %v8644_v46 = vpop.eup %8643 }
 0x657   : > { %v2523_v47 = vsel %vm1676_vm3, %v8644_v46, 0.0 }
 0x658   : > { %2524 = vadd.xlane.f32.xlu0 %v2523_v47 }
 0x65a   : > { %v8646_v48 = vpop.eup %8645 }
 0x65b   : > { %v2526_v49 = vsel %vm1676_vm3, %v8646_v48, 0.0 }
 0x65c   : > { %2527 = vadd.xlane.f32.xlu1 %v2526_v49 }
 0x6e1   : > { %v2525_v55 = vpop.xlane.xlu0 %2524 }
 0x6e2   : > { %8647 = vrcp.f32 %v2525_v55 }
 0x6e5   : > { %v2528_v56 = vpop.xlane.xlu1 %2527 }
 0x6e6   : > { %8649 = vrcp.f32 %v2528_v56 }
 0x6ef   : > { %v8648_v57 = vpop.eup %8647 }
 0x6f0   : > { %v2531_v58 = vmul.f32 %v8648_v57, %v8644_v46  ;;  %v7651_v57 = vld [vmem:[%s9721_s14 + $0x2] ss:$0 sm:$0xff] }
 0x6f2   : > { %8194 = vmatmul.mubr.msk.f32.vlgmr.msra.gmra.mxu1 %vm1676_vm3, %v2531_v58 }
 0x6f3   : > { %v8650_v59 = vpop.eup %8649  ;;  %8202 = vmatpush3.msra.mxu1 %v7627_v61 }
 0x6f4   : > { %v2532_v60 = vmul.f32 %v8650_v59, %v8646_v48  ;;  %8217 = vmatprep.subr.mxu1 %v7641_v62 }
 0x6f6   : > { %8199 = vmatmul.mubr.msk.f32.vlgmr.msra.gmra.mxu0 %vm1676_vm3, %v2532_v60 }
 0x6f7   : > { %8214 = vmatprep.mubr.msk.f32.mxu0 %vm1422_vm1, %v9055_v10  ;;  %8207 = vmatpush3.msra.mxu0 %v7633_v63 }
 0x6f8   : > { %8208 = vmatprep.subr.mxu0 %v7632_v0 }
 0x6f9   : > { %8209 = vmatpush3.msra.mxu0 %v7632_v0 }
 0x6fa   : > { %8210 = vmatprep.subr.mxu0 %v7631_v1 }
 0x6fb   : > { %8211 = vmatpush3.msra.mxu0 %v7631_v1 }
 0x6fc   : > { %8212 = vmatprep.subr.mxu0 %v7630_v2 }
 0x6fd   : > { %8213 = vmatpush3.msra.mxu0 %v7630_v2 }
 0x6fe   : > { %8215 = vmatmul.mubr.msk.f32.vlgmr.msra.gmra.mxu0 %vm1422_vm1, %v9057_v11  ;;  %8228 = vmatprep.subr.mxu0 %v7649_v30 }
 0x6ff   : > { %8236 = vmatprep.mubr.msk.f32.mxu0 %vm1422_vm1, %v9055_v10  ;;  %8229 = vmatpush3.msra.mxu0 %v7649_v30 }
 0x700   : > { %8230 = vmatprep.subr.mxu0 %v7648_v31 }
 0x701   : > { %8231 = vmatpush3.msra.mxu0 %v7648_v31 }
 0x702   : > { %8232 = vmatprep.subr.mxu0 %v7647_v32 }
 0x703   : > { %8233 = vmatpush3.msra.mxu0 %v7647_v32 }
 0x704   : > { %8234 = vmatprep.subr.mxu0 %v7646_v33 }
 0x705   : > { %8235 = vmatpush3.msra.mxu0 %v7646_v33  ;;  %v7682_v33 = vld [vmem:[%s9718_s21 + $0x78] sm:$0xff] }
 0x706   : > { %8237 = vmatmul.mubr.msk.f32.vlgmr.msra.gmra.mxu0 %vm1422_vm1, %v9057_v11  ;;  %8249 = vmatprep.subr.mxu0 %v8783_v16 }
 0x707   : > { %8251 = vmatprep.mubr.msk.f32.mxu0 %vm8784_vm2, %v8783_v16 }
 0x7b2   : > { %v2602_v3 = vpop.f32.mrf.mxu1 }
 0x7b3   : > { %8203 = vmatprep.mubr.msk.f32.mxu1 %vm1676_vm3, %v2602_v3  ;;  %v7660_v3 = vld [vmem:[%s9723_s10 + $0x10] sm:$0xff] }
 0x7b4   : > { %v8195_v4 = vpop.f32.mrf.mxu1 }
 0x7b5   : > { %v7674_v4 = vld [vmem:[%s9716_s13 + $0x78] sm:$0xff] }
 0x7b6   : > { %v2675_v5 = vpop.f32.mrf.mxu0 }
 0x7b7   : > { %8204 = vmatmul.mubr.msk.f32.vlgmr.msra.gmra.mxu1 %vm1676_vm3, %v2675_v5  ;;  %v7666_v5 = vld [vmem:[%s9717_s17 + $0x78] sm:$0xff] }
 0x7b8   : > { %8218 = vmatpush3.msra.mxu1 %v7641_v62  ;;  %v8200_v7 = vpop.f32.mrf.mxu0  ;;  %8225 = vmatprep.mubr.msk.f32.mxu1 %vm1422_vm1, %v9055_v10 }
 0x7b9   : > { %8219 = vmatprep.subr.mxu1 %v7640_v6  ;;  %v7664_v7 = vld [vmem:[%s9717_s17 + $0x68] sm:$0xff] }
 0x7ba   : > { %8220 = vmatpush3.msra.mxu1 %v7640_v6  ;;  %v7665_v6 = vld [vmem:[%s9717_s17 + $0x70] sm:$0xff] }
 0x7bb   : > { %8221 = vmatprep.subr.mxu1 %v7639_v8 }
 0x7bc   : > { %8222 = vmatpush3.msra.mxu1 %v7639_v8  ;;  %v7663_v8 = vld [vmem:[%s9717_s17 + $0x60] sm:$0xff]  ;;  %s9731_s17 = sld [smem:[#allocation49_spill]] }
 0x7bd   : > { %8223 = vmatprep.subr.mxu1 %v7638_v13 }
 0x7be   : > { %8224 = vmatpush3.msra.mxu1 %v7638_v13  ;;  %v8216_v22 = vpop.f32.mrf.mxu0 }
 0x7bf   : > { %8226 = vmatmul.mubr.msk.f32.vlgmr.msra.gmra.mxu1 %vm1422_vm1, %v9057_v11  ;;  %8239 = vmatprep.subr.mxu1 %v8783_v16  ;;  %v2849_v29 = vadd.f32 %v8216_v22, %v7635_v26  ;;  %v7671_v22 = vld [vmem:[%s9716_s13 + $0x60] sm:$0xff] }
 0x7c0   : > { %8241 = vmatprep.mubr.msk.f32.mxu1 %vm8784_vm2, %v8783_v16  ;;  %v2843_v28 = vpop.f32.mrf.mxu0 }
 0x7c1   : > { %v2844_v9 = vadd.f32 %v7635_v26, %v2843_v28 }
 0x7c6   : > { %v8238_v56 = vpop.f32.mrf.mxu0 }
 0x7c7   : > { %v3025_v58 = vadd.f32 %v8238_v56, %v7651_v57 }
 0x7c8   : > { %v3019_v59 = vpop.f32.mrf.mxu0 }
 0x7c9   : > { %v3020_v60 = vadd.f32 %v7651_v57, %v3019_v59 }
 0x7cb   : > { %8250 = vmatpush3.msra.mxu0 %v3020_v60 }
 0x7cc   : > { %8259 = vmatprep.subr.mxu0 %v7660_v3 }
 0x877   : > { %v8205_v17 = vpop.f32.mrf.mxu1 }
 0x878   : > { %v9195_v19 = vadd.f32 %v8205_v17, %v2090_v15  ;;  %v7673_v17 = vld [vmem:[%s9716_s13 + $0x70] sm:$0xff] }
 0x879   : > { %v2753_v20 = vpop.f32.mrf.mxu1 }
 0x87a   : > { %v9197_v21 = vadd.f32 %v2753_v20, %v2089_v18  ;;  %v7672_v20 = vld [vmem:[%s9716_s13 + $0x68] sm:$0xff] }
 0x87f   : > { %v8227_v23 = vpop.f32.mrf.mxu1 }
 0x880   : > { %v2937_v12 = vadd.f32 %v8227_v23, %v7643_v24 }
 0x881   : > { %v2931_v25 = vpop.f32.mrf.mxu1 }
 0x882   : > { %v2932_v27 = vadd.f32 %v7643_v24, %v2931_v25 }
 0x884   : > { %8240 = vmatpush3.xpose.msk.msra.mxu1 %vm1676_vm3, %v2932_v27 }
 0x885   : > { %8244 = vmatprep.subr.mxu1 %v8783_v16 }
 0x887   : > { %8242 = vmatmul.mubr.msk.f32.vlgmr.msra.gmra.mxu1 %vm1676_vm3, %v2844_v9  ;;  %v7676_v9 = vld [vmem:[%s9719_s25 + $0x3] ss:$0 sm:$0xff] }
 0x888   : > { %8245 = vmatpush3.xpose.msk.msra.mxu1 %vm1676_vm3, %v2937_v12  ;;  %8246 = vmatprep.mubr.msk.f32.mxu1 %vm8784_vm2, %v8783_v16 }
 0x889   : > { %8254 = vmatprep.subr.mxu1 %v8783_v16 }
 0x88b   : > { %8247 = vmatmul.mubr.msk.f32.vlgmr.msra.gmra.mxu1 %vm1676_vm3, %v2849_v29  ;;  %v7668_v29 = vld [vmem:[%s9720_s8 + $0x3] ss:$0 sm:$0xff] }
 0x88c   : > { %8256 = vmatprep.mubr.msk.f32.mxu1 %vm8784_vm2, %v8783_v16  ;;  %8255 = vmatpush3.msra.mxu1 %v3025_v58  ;;  %v7684_v58 = vld [vmem:[%s9721_s14 + $0x3] ss:$0 sm:$0xff] }
 0x88d   : > { %8264 = vmatprep.subr.mxu1 %v7666_v5 }
 0x947   : > { %v3100_v34 = vpop.f32.mrf.mxu1 }
 0x948   : > { %v3180_v36 = vmul.f32 0.35355338, %v3100_v34  ;;  %v7681_v34 = vld [vmem:[%s9718_s21 + $0x70] sm:$0xff] }
 0x949   : > { %v8243_v37 = vpop.f32.mrf.mxu1 }
 0x94a   : > { %v3182_v38 = vadd.f32 %v3180_v36, %v9095_v35  ;;  %v7680_v36 = vld [vmem:[%s9718_s21 + $0x68] sm:$0xff]  ;;  %v7679_v37 = vld [vmem:[%s9718_s21 + $0x60] sm:$0xff]  ;;  %s9732_s21 = sld [smem:[#allocation47_spill]] }
 0x94b   : > { %v3176_v40 = vpop.f32.mrf.mxu1 }
 0x94c   : > { %v3181_v41 = vmul.f32 0.35355338, %v3176_v40  ;;  %v3184_v42 = vsel %vm1676_vm3, %v3182_v38, -inf }
 0x94d   : > { %3185 = vmax.xlane.f32.xlu0 %v3184_v42  ;;  %v8248_v43 = vpop.f32.mrf.mxu1 }
 0x94e   : > { %v3183_v44 = vadd.f32 %v3181_v41, %v9098_v39 }
 0x950   : > { %v3187_v45 = vsel %vm1676_vm3, %v3183_v44, -inf }
 0x951   : > { %3188 = vmax.xlane.f32.xlu1 %v3187_v45 }
 0x9d6   : > { %v3186_v46 = vpop.xlane.xlu0 %3185 }
 0x9d7   : > { %v3190_v47 = vsub.f32 %v3182_v38, %v3186_v46 }
 0x9d9   : > { %v3192_v48 = vmul.f32 1.442695, %v3190_v47 }
 0x9da   : > { %v3189_v49 = vpop.xlane.xlu1 %3188 }
 0x9db   : > { %8651 = vpow2.f32 %v3192_v48  ;;  %v3191_v50 = vsub.f32 %v3183_v44, %v3189_v49 }
 0x9dd   : > { %v3194_v51 = vmul.f32 1.442695, %v3191_v50 }
 0x9df   : > { %8653 = vpow2.f32 %v3194_v51 }
 0x9e8   : > { %v8652_v52 = vpop.eup %8651 }
 0x9e9   : > { %v3196_v53 = vsel %vm1676_vm3, %v8652_v52, 0.0 }
 0x9ea   : > { %3197 = vadd.xlane.f32.xlu0 %v3196_v53 }
 0x9ec   : > { %v8654_v54 = vpop.eup %8653 }
 0x9ed   : > { %v3199_v55 = vsel %vm1676_vm3, %v8654_v54, 0.0 }
 0x9ee   : > { %3200 = vadd.xlane.f32.xlu1 %v3199_v55 }
 0xa73   : > { %v3198_v61 = vpop.xlane.xlu0 %3197 }
 0xa74   : > { %8655 = vrcp.f32 %v3198_v61 }
 0xa77   : > { %v3201_v62 = vpop.xlane.xlu1 %3200 }
 0xa78   : > { %8657 = vrcp.f32 %v3201_v62 }
 0xa81   : > { %v8656_v63 = vpop.eup %8655 }
 0xa82   : > { %v3204_v0 = vmul.f32 %v8656_v63, %v8652_v52 }
 0xa84   : > { %8252 = vmatmul.mubr.msk.f32.vlgmr.msra.gmra.mxu0 %vm1676_vm3, %v3204_v0 }
 0xa85   : > { %v8658_v1 = vpop.eup %8657  ;;  %8260 = vmatpush3.msra.mxu0 %v7660_v3 }
 0xa86   : > { %v3205_v2 = vmul.f32 %v8658_v1, %v8654_v54  ;;  %8275 = vmatprep.subr.mxu0 %v7674_v4 }
 0xa88   : > { %8257 = vmatmul.mubr.msk.f32.vlgmr.msra.gmra.mxu1 %vm1676_vm3, %v3205_v2 }
 0xa89   : > { %8272 = vmatprep.mubr.msk.f32.mxu1 %vm1422_vm1, %v9055_v10  ;;  %8265 = vmatpush3.msra.mxu1 %v7666_v5 }
 0xa8a   : > { %8266 = vmatprep.subr.mxu1 %v7665_v6 }
 0xa8b   : > { %8267 = vmatpush3.msra.mxu1 %v7665_v6 }
 0xa8c   : > { %8268 = vmatprep.subr.mxu1 %v7664_v7 }
 0xa8d   : > { %8269 = vmatpush3.msra.mxu1 %v7664_v7 }
 0xa8e   : > { %8270 = vmatprep.subr.mxu1 %v7663_v8 }
 0xa8f   : > { %8271 = vmatpush3.msra.mxu1 %v7663_v8 }
 0xa90   : > { %8273 = vmatmul.mubr.msk.f32.vlgmr.msra.gmra.mxu1 %vm1422_vm1, %v9057_v11  ;;  %8286 = vmatprep.subr.mxu1 %v7682_v33 }
 0xa91   : > { %8294 = vmatprep.mubr.msk.f32.mxu1 %vm1422_vm1, %v9055_v10  ;;  %8287 = vmatpush3.msra.mxu1 %v7682_v33  ;;  %v4162_v33 = vld [vmem:[%s9727_s18 + $0x10] sm:$0xff] }
 0xa92   : > { %8288 = vmatprep.subr.mxu1 %v7681_v34 }
 0xa93   : > { %8289 = vmatpush3.msra.mxu1 %v7681_v34  ;;  %v9307_v34 = vld [vmem:[%s9728_s22] sm:$0xff] }
 0xa94   : > { %8290 = vmatprep.subr.mxu1 %v7680_v36 }
 0xa95   : > { %8291 = vmatpush3.msra.mxu1 %v7680_v36  ;;  %v9310_v36 = vld [vmem:[%s9728_s22 + $0x8] sm:$0xff] }
 0xa96   : > { %8292 = vmatprep.subr.mxu1 %v7679_v37 }
 0xa97   : > { %8293 = vmatpush3.msra.mxu1 %v7679_v37  ;;  %v4161_v37 = vld [vmem:[%s9727_s18 + $0x8] sm:$0xff] }
 0xa98   : > { %8295 = vmatmul.mubr.msk.f32.vlgmr.msra.gmra.mxu1 %vm1422_vm1, %v9057_v11  ;;  %8307 = vmatprep.subr.mxu1 %v8783_v16 }
 0xa99   : > { %8309 = vmatprep.mubr.msk.f32.mxu1 %vm8784_vm2, %v8783_v16 }
 0xb44   : > { %v3275_v13 = vpop.f32.mrf.mxu0 }
 0xb45   : > { %8261 = vmatprep.mubr.msk.f32.mxu0 %vm1676_vm3, %v3275_v13 }
 0xb46   : > { %v8253_v14 = vpop.f32.mrf.mxu0 }
 0xb48   : > { %v3348_v15 = vpop.f32.mrf.mxu1 }
 0xb49   : > { %8262 = vmatmul.mubr.msk.f32.vlgmr.msra.gmra.mxu0 %vm1676_vm3, %v3348_v15 }
 0xb4a   : > { %8276 = vmatpush3.msra.mxu0 %v7674_v4  ;;  %v8258_v18 = vpop.f32.mrf.mxu1  ;;  %8283 = vmatprep.mubr.msk.f32.mxu0 %vm1422_vm1, %v9055_v10  ;;  %v7693_v4 = vld [vmem:[%s9723_s10 + $0x18] sm:$0xff] }
 0xb4b   : > { %8277 = vmatprep.subr.mxu0 %v7673_v17 }
 0xb4c   : > { %8278 = vmatpush3.msra.mxu0 %v7673_v17 }
 0xb4d   : > { %8279 = vmatprep.subr.mxu0 %v7672_v20 }
 0xb4e   : > { %8280 = vmatpush3.msra.mxu0 %v7672_v20 }
 0xb4f   : > { %8281 = vmatprep.subr.mxu0 %v7671_v22 }
 0xb50   : > { %8282 = vmatpush3.msra.mxu0 %v7671_v22  ;;  %v8274_v27 = vpop.f32.mrf.mxu1 }
 0xb51   : > { %8284 = vmatmul.mubr.msk.f32.vlgmr.msra.gmra.mxu0 %vm1422_vm1, %v9057_v11  ;;  %8297 = vmatprep.subr.mxu0 %v8783_v16 }
 0xb52   : > { %8299 = vmatprep.mubr.msk.f32.mxu0 %vm8784_vm2, %v8783_v16  ;;  %v3516_v31 = vpop.f32.mrf.mxu1 }
 0xb53   : > { %v3517_v32 = vadd.f32 %v7668_v29, %v3516_v31  ;;  %v4254_v31 = vld [vmem:[%s9726_s16 + $0x10] sm:$0xff] }
 0xc09   : > { %v8263_v23 = vpop.f32.mrf.mxu0 }
 0xc0a   : > { %v9254_v24 = vadd.f32 %v8263_v23, %v9195_v19 }
 0xc0b   : > { %v3426_v25 = vpop.f32.mrf.mxu0 }
 0xc0c   : > { %v9257_v26 = vadd.f32 %v3426_v25, %v9197_v21  ;;  %v3522_v21 = vadd.f32 %v8274_v27, %v7668_v29 }
 0xc11   : > { %v8285_v28 = vpop.f32.mrf.mxu0 }
 0xc12   : > { %v3610_v19 = vadd.f32 %v8285_v28, %v7676_v9 }
 0xc13   : > { %v3604_v12 = vpop.f32.mrf.mxu0 }
 0xc14   : > { %v3605_v30 = vadd.f32 %v7676_v9, %v3604_v12 }
 0xc16   : > { %8298 = vmatpush3.xpose.msk.msra.mxu0 %vm1676_vm3, %v3605_v30  ;;  %v4255_v30 = vld [vmem:[%s9726_s16 + $0x18] sm:$0xff] }
 0xc17   : > { %8302 = vmatprep.subr.mxu0 %v8783_v16 }
 0xc19   : > { %8300 = vmatmul.mubr.msk.f32.vlgmr.msra.gmra.mxu0 %vm1676_vm3, %v3517_v32  ;;  %v4253_v32 = vld [vmem:[%s9726_s16 + $0x8] sm:$0xff] }
 0xc1a   : > { %8303 = vmatpush3.xpose.msk.msra.mxu0 %vm1676_vm3, %v3610_v19  ;;  %8304 = vmatprep.mubr.msk.f32.mxu0 %vm8784_vm2, %v8783_v16  ;;  %v4163_v19 = vld [vmem:[%s9727_s18 + $0x18] sm:$0xff] }
 0xc1b   : > { %8312 = vmatprep.subr.mxu0 %v8783_v16 }
 0xc1d   : > { %8305 = vmatmul.mubr.msk.f32.vlgmr.msra.gmra.mxu0 %vm1676_vm3, %v3522_v21  ;;  %v4252_v21 = vld [vmem:[%s9726_s16] sm:$0xff] }
 0xc1e   : > { %8314 = vmatprep.mubr.msk.f32.mxu0 %vm8784_vm2, %v8783_v16 }
 0xcd9   : > { %v3773_v38 = vpop.f32.mrf.mxu0 }
 0xcda   : > { %v3853_v40 = vmul.f32 0.35355338, %v3773_v38  ;;  %v4160_v38 = vld [vmem:[%s9727_s18] sm:$0xff] }
 0xcdb   : > { %v8301_v41 = vpop.f32.mrf.mxu0 }
 0xcdc   : > { %v3855_v42 = vadd.f32 %v3853_v40, %v9095_v35 }
 0xcdd   : > { %v3849_v43 = vpop.f32.mrf.mxu0 }
 0xcde   : > { %v3854_v44 = vmul.f32 0.35355338, %v3849_v43  ;;  %v3857_v45 = vsel %vm1676_vm3, %v3855_v42, -inf }
 0xcdf   : > { %3858 = vmax.xlane.f32.xlu0 %v3857_v45  ;;  %v8306_v46 = vpop.f32.mrf.mxu0 }
 0xce0   : > { %v3856_v47 = vadd.f32 %v3854_v44, %v9098_v39  ;;  %v8296_v39 = vpop.f32.mrf.mxu1 }
 0xce1   : > { %v3698_v59 = vadd.f32 %v8296_v39, %v7684_v58 }
 0xce2   : > { %v3860_v48 = vsel %vm1676_vm3, %v3856_v47, -inf  ;;  %v3692_v60 = vpop.f32.mrf.mxu1 }
 0xce3   : > { %3861 = vmax.xlane.f32.xlu1 %v3860_v48  ;;  %v3693_v61 = vadd.f32 %v7684_v58, %v3692_v60  ;;  %8313 = vmatpush3.msra.mxu0 %v3698_v59  ;;  %v7696_v48 = vld [vmem:[%s1379_s12] ss:$0 sm:$0xff]  ;;  %s9733_s12 = sld [smem:[#allocation50_spill]] }
 0xce4   : > { %8322 = vmatprep.subr.mxu0 %v4163_v19  ;;  %v7698_v60 = vld [vmem:[%s9732_s21] ss:$0 sm:$0xff] }
 0xce5   : > { %8308 = vmatpush3.msra.mxu1 %v3693_v61 }
 0xce6   : > { %8317 = vmatprep.subr.mxu1 %v7693_v4 }
 0xd68   : > { %v3859_v49 = vpop.xlane.xlu0 %3858 }
 0xd69   : > { %v3863_v50 = vsub.f32 %v3855_v42, %v3859_v49 }
 0xd6b   : > { %v3865_v51 = vmul.f32 1.442695, %v3863_v50 }
 0xd6c   : > { %v3862_v52 = vpop.xlane.xlu1 %3861 }
 0xd6d   : > { %8659 = vpow2.f32 %v3865_v51  ;;  %v3864_v53 = vsub.f32 %v3856_v47, %v3862_v52  ;;  %v7697_v52 = vld [vmem:[%s1382_s9] ss:$0 sm:$0xff]  ;;  %s9734_s9 = sld [smem:[#allocation9_spill]] }
 0xd6f   : > { %v3867_v54 = vmul.f32 1.442695, %v3864_v53 }
 0xd71   : > { %8661 = vpow2.f32 %v3867_v54 }
 0xd7a   : > { %v8660_v35 = vpop.eup %8659 }
 0xd7b   : > { %v3869_v55 = vsel %vm1676_vm3, %v8660_v35, 0.0 }
 0xd7c   : > { %3870 = vadd.xlane.f32.xlu0 %v3869_v55  ;;  %v7701_v55 = vld [vmem:[%s9731_s17] ss:$0 sm:$0xff] }
 0xd7e   : > { %v8662_v56 = vpop.eup %8661 }
 0xd7f   : > { %v3872_v57 = vsel %vm1676_vm3, %v8662_v56, 0.0 }
 0xd80   : > { %3873 = vadd.xlane.f32.xlu1 %v3872_v57 }
 0xe05   : > { %v3871_v62 = vpop.xlane.xlu0 %3870 }
 0xe06   : > { %8663 = vrcp.f32 %v3871_v62 }
 0xe09   : > { %v3874_v63 = vpop.xlane.xlu1 %3873 }
 0xe0a   : > { %8665 = vrcp.f32 %v3874_v63 }
 0xe13   : > { %v8664_v0 = vpop.eup %8663 }
 0xe14   : > { %v3877_v1 = vmul.f32 %v8664_v0, %v8660_v35  ;;  %v4347_v0 = vld [vmem:[%s9733_s12 + $0x18] sm:$0xff] }
 0xe16   : > { %8310 = vmatmul.mubr.msk.f32.vlgmr.msra.gmra.mxu1 %vm1676_vm3, %v3877_v1  ;;  %v4346_v1 = vld [vmem:[%s9733_s12 + $0x10] sm:$0xff] }
 0xe17   : > { %v8666_v2 = vpop.eup %8665  ;;  %8318 = vmatpush3.msra.mxu1 %v7693_v4 }
 0xe18   : > { %v3878_v3 = vmul.f32 %v8666_v2, %v8662_v56  ;;  %8333 = vmatprep.subr.mxu1 %v4255_v30  ;;  %v4345_v2 = vld [vmem:[%s9733_s12 + $0x8] sm:$0xff] }
 0xe1a   : > { %8315 = vmatmul.mubr.msk.f32.vlgmr.msra.gmra.mxu0 %vm1676_vm3, %v3878_v3  ;;  %v4344_v3 = vld [vmem:[%s9733_s12] sm:$0xff] }
 0xe1b   : > { %8323 = vmatpush3.msra.mxu0 %v4163_v19 }
 0xe1c   : > { %8324 = vmatprep.subr.mxu0 %v4162_v33 }
 0xe1d   : > { %8325 = vmatpush3.msra.mxu0 %v4162_v33 }
 0xe1e   : > { %8326 = vmatprep.subr.mxu0 %v4161_v37 }
 0xe1f   : > { %8327 = vmatpush3.msra.mxu0 %v4161_v37 }
 0xe20   : > { %8328 = vmatprep.subr.mxu0 %v4160_v38 }
 0xe21   : > { %8329 = vmatpush3.msra.mxu0 %v4160_v38 }
 0xe22   : > { %8344 = vmatprep.subr.mxu0 %v4347_v0 }
 0xed6   : > { %v3948_v5 = vpop.f32.mrf.mxu1 }
 0xed7   : > { %8319 = vmatprep.mubr.msk.f32.mxu1 %vm1676_vm3, %v3948_v5  ;;  %v9359_v5 = vld [vmem:[%s9734_s9] sm:$0xff] }
 0xed8   : > { %v8311_v6 = vpop.f32.mrf.mxu1 }
 0xeda   : > { %v4021_v7 = vpop.f32.mrf.mxu0 }
 0xedb   : > { %8320 = vmatmul.mubr.msk.f32.vlgmr.msra.gmra.mxu1 %vm1676_vm3, %v4021_v7 }
 0xedc   : > { %v8316_v8 = vpop.f32.mrf.mxu0  ;;  %8334 = vmatpush3.msra.mxu1 %v4255_v30  ;;  %8341 = vmatprep.mubr.msk.f32.mxu1 %vm1422_vm1, %v9307_v34  ;;  %v7704_v30 = vld [vmem:[%s9014_s19] ss:$0 sm:$0xff] }
 0xedd   : > { %8335 = vmatprep.subr.mxu1 %v4254_v31 }
 0xede   : > { %8336 = vmatpush3.msra.mxu1 %v4254_v31 }
 0xedf   : > { %8337 = vmatprep.subr.mxu1 %v4253_v32 }
 0xee0   : > { %8338 = vmatpush3.msra.mxu1 %v4253_v32 }
 0xee1   : > { %8339 = vmatprep.subr.mxu1 %v4252_v21 }
 0xee2   : > { %8340 = vmatpush3.msra.mxu1 %v4252_v21  ;;  %v7719_v21 = vld [vmem:[%s9727_s18 + $0x38] sm:$0xff] }
 0xee3   : > { %8342 = vmatmul.mubr.msk.f32.vlgmr.msra.gmra.mxu1 %vm1422_vm1, %v9310_v36  ;;  %8355 = vmatprep.subr.mxu1 %v8783_v16 }
 0xee4   : > { %8357 = vmatprep.mubr.msk.f32.mxu1 %vm8784_vm2, %v8783_v16 }
 0xf9b   : > { %v8321_v13 = vpop.f32.mrf.mxu1 }
 0xf9c   : > { %v4109_v14 = vadd.f32 %v8321_v13, %v9254_v24 }
 0xf9d   : > { %v4099_v15 = vpop.f32.mrf.mxu1 }
 0xf9e   : > { %v4108_v17 = vadd.f32 %v4099_v15, %v9257_v26  ;;  %v4111_v18 = vadd.f32 %v4109_v14, %v9057_v11  ;;  %v9363_v14 = vld [vmem:[%s9734_s9 + $0x8] sm:$0xff] }
 0xfa0   : > { %v4117_v20 = vsel %vm1422_vm1, %v4111_v18, 0.0  ;;  %v4110_v22 = vadd.f32 %v4108_v17, %v9055_v10 }
 0xfa1   : > { %4118 = vadd.xlane.f32.xlu1 %v4117_v20 }
 0xfa2   : > { %v4114_v23 = vsel %vm1422_vm1, %v4110_v22, 0.0 }
 0xfa3   : > { %4115 = vadd.xlane.f32.xlu0 %v4114_v23  ;;  %v8343_v56 = vpop.f32.mrf.mxu1 }
 0xfa4   : > { %v4341_v57 = vadd.f32 %v8343_v56, %v7701_v55 }
 0xfa5   : > { %v4335_v39 = vpop.f32.mrf.mxu1 }
 0xfa6   : > { %v4336_v58 = vadd.f32 %v7701_v55, %v4335_v39  ;;  %v7724_v55 = vld [vmem:[%s9726_s16 + $0x20] sm:$0xff] }
 0xfa8   : > { %8356 = vmatpush3.xpose.msk.msra.mxu1 %vm1676_vm3, %v4336_v58 }
 0xfa9   : > { %8360 = vmatprep.subr.mxu1 %v8783_v16 }
0x102a   : > { %v4119_v25 = vpop.xlane.xlu1 %4118 }
0x102b   : > { %v4122_v27 = vmul.f32 0.03125, %v4119_v25 }
0x102c   : > { %v4116_v28 = vpop.xlane.xlu0 %4115 }
0x102d   : > { %v4124_v24 = vsub.f32 %v4111_v18, %v4122_v27  ;;  %v4121_v9 = vmul.f32 0.03125, %v4116_v28 }
0x102f   : > { %v4123_v26 = vsub.f32 %v4110_v22, %v4121_v9  ;;  %v4126_v12 = vmul.f32 %v4124_v24, %v4124_v24 }
0x1031   : > { %v4130_v11 = vsel %vm1422_vm1, %v4126_v12, 0.0  ;;  %v4125_v29 = vmul.f32 %v4123_v26, %v4123_v26 }
0x1032   : > { %4131 = vadd.xlane.f32.xlu1 %v4130_v11 }
0x1033   : > { %v4127_v10 = vsel %vm1422_vm1, %v4125_v29, 0.0 }
0x1034   : > { %4128 = vadd.xlane.f32.xlu0 %v4127_v10 }
0x10bb   : > { %v4132_v40 = vpop.xlane.xlu1 %4131 }
0x10bc   : > { %v4134_v41 = vmul.f32 0.03125, %v4132_v40 }
0x10bd   : > { %v4129_v42 = vpop.xlane.xlu0 %4128 }
0x10be   : > { %v4136_v43 = vadd.f32 1e-05, %v4134_v41  ;;  %v4133_v44 = vmul.f32 0.03125, %v4129_v42 }
0x10c0   : > { %8667 = vrsqrt.f32 %v4136_v43  ;;  %v4135_v45 = vadd.f32 1e-05, %v4133_v44  ;;  %v7718_v43 = vld [vmem:[%s9727_s18 + $0x30] sm:$0xff]  ;;  %v7717_v44 = vld [vmem:[%s9727_s18 + $0x28] sm:$0xff] }
0x10c2   : > { %8669 = vrsqrt.f32 %v4135_v45  ;;  %v7716_v45 = vld [vmem:[%s9727_s18 + $0x20] sm:$0xff] }
0x10cd   : > { %v8668_v46 = vpop.eup %8667 }
0x10ce   : > { %v4140_v47 = vmul.f32 %v8668_v46, %v4124_v24  ;;  %v4754_v46 = vld [vmem:[%s9017_s24] sm:$0xff] }
0x10cf   : > { %v8670_v49 = vpop.eup %8669 }
0x10d0   : > { %v4139_v50 = vmul.f32 %v8670_v49, %v4123_v26  ;;  %v4148_v51 = vmul.f32 %v7696_v48, %v4140_v47  ;;  %v7727_v47 = vld [vmem:[%s9726_s16 + $0x38] sm:$0xff] }
0x10d2   : > { %v4147_v53 = vmul.f32 %v7696_v48, %v4139_v50  ;;  %v9329_v35 = vadd.f32 %v7697_v52, %v4148_v51  ;;  %v7726_v51 = vld [vmem:[%s9726_s16 + $0x30] sm:$0xff] }
0x10d4   : > { %v9327_v54 = vadd.f32 %v7697_v52, %v4147_v53  ;;  %v7725_v53 = vld [vmem:[%s9726_s16 + $0x28] sm:$0xff] }
0x10d6   : > { %8330 = vmatprep.mubr.msk.f32.mxu0 %vm1422_vm1, %v9327_v54 }
0x10d7   : > { %8331 = vmatmul.mubr.msk.f32.vlgmr.msra.gmra.mxu0 %vm1422_vm1, %v9329_v35 }
0x10d8   : > { %8352 = vmatprep.mubr.msk.f32.mxu0 %vm1422_vm1, %v9307_v34  ;;  %8345 = vmatpush3.msra.mxu0 %v4347_v0 }
0x10d9   : > { %8346 = vmatprep.subr.mxu0 %v4346_v1 }
0x10da   : > { %8347 = vmatpush3.msra.mxu0 %v4346_v1 }
0x10db   : > { %8348 = vmatprep.subr.mxu0 %v4345_v2 }
0x10dc   : > { %8349 = vmatpush3.msra.mxu0 %v4345_v2 }
0x10dd   : > { %8350 = vmatprep.subr.mxu0 %v4344_v3 }
0x10de   : > { %8351 = vmatpush3.msra.mxu0 %v4344_v3  ;;  %v7735_v3 = vld [vmem:[%s9733_s12 + $0x38] sm:$0xff] }
0x10df   : > { %8353 = vmatmul.mubr.msk.f32.vlgmr.msra.gmra.mxu0 %vm1422_vm1, %v9310_v36  ;;  %8365 = vmatprep.subr.mxu0 %v8783_v16 }
0x10e0   : > { %8367 = vmatprep.mubr.msk.f32.mxu0 %vm8784_vm2, %v8783_v16 }
0x1197   : > { %v8332_v59 = vpop.f32.mrf.mxu0 }
0x1198   : > { %v4249_v63 = vadd.f32 %v8332_v59, %v7698_v60  ;;  %v7729_v59 = vld [vmem:[%s9731_s17 + $0x1] ss:$0 sm:$0xff] }
0x1199   : > { %v4243_v61 = vpop.f32.mrf.mxu0 }
0x119a   : > { %v4244_v62 = vadd.f32 %v7698_v60, %v4243_v61 }
0x119c   : > { %8358 = vmatmul.mubr.msk.f32.vlgmr.msra.gmra.mxu1 %vm1676_vm3, %v4244_v62 }
0x119d   : > { %8361 = vmatpush3.xpose.msk.msra.mxu1 %vm1676_vm3, %v4341_v57  ;;  %8362 = vmatprep.mubr.msk.f32.mxu1 %vm8784_vm2, %v8783_v16 }
0x119e   : > { %8370 = vmatprep.subr.mxu1 %v8783_v16 }
0x119f   : > { %v8354_v10 = vpop.f32.mrf.mxu0 }
0x11a0   : > { %8363 = vmatmul.mubr.msk.f32.vlgmr.msra.gmra.mxu1 %vm1676_vm3, %v4249_v63  ;;  %v4427_v31 = vadd.f32 %v8354_v10, %v7704_v30  ;;  %v7721_v63 = vld [vmem:[%s9732_s21 + $0x1] ss:$0 sm:$0xff] }
0x11a1   : > { %8372 = vmatprep.mubr.msk.f32.mxu1 %vm8784_vm2, %v8783_v16  ;;  %v4421_v32 = vpop.f32.mrf.mxu0 }
0x11a2   : > { %v4422_v19 = vadd.f32 %v7704_v30, %v4421_v32  ;;  %8371 = vmatpush3.msra.mxu1 %v4427_v31 }
0x11a3   : > { %8380 = vmatprep.subr.mxu1 %v7719_v21 }
0x11a4   : > { %8366 = vmatpush3.msra.mxu0 %v4422_v19  ;;  %v7737_v19 = vld [vmem:[%s9014_s19 + $0x1] ss:$0 sm:$0xff] }
0x11a5   : > { %8375 = vmatprep.subr.mxu0 %v4754_v46 }
0x125c   : > { %v4502_v4 = vpop.f32.mrf.mxu1 }
0x125d   : > { %v4582_v6 = vmul.f32 0.35355338, %v4502_v4  ;;  %v7734_v4 = vld [vmem:[%s9733_s12 + $0x30] sm:$0xff] }
0x125e   : > { %v8359_v7 = vpop.f32.mrf.mxu1 }
0x125f   : > { %v4584_v8 = vadd.f32 %v4582_v6, %v9359_v5  ;;  %v7733_v6 = vld [vmem:[%s9733_s12 + $0x28] sm:$0xff]  ;;  %v7732_v7 = vld [vmem:[%s9733_s12 + $0x20] sm:$0xff] }
0x1260   : > { %v4578_v13 = vpop.f32.mrf.mxu1 }
0x1261   : > { %v4583_v15 = vmul.f32 0.35355338, %v4578_v13  ;;  %v4586_v17 = vsel %vm1676_vm3, %v4584_v8, -inf }
0x1262   : > { %4587 = vmax.xlane.f32.xlu0 %v4586_v17  ;;  %v8364_v18 = vpop.f32.mrf.mxu1 }
0x1263   : > { %v4585_v20 = vadd.f32 %v4583_v15, %v9363_v14 }
0x1265   : > { %v4589_v22 = vsel %vm1676_vm3, %v4585_v20, -inf }
0x1266   : > { %4590 = vmax.xlane.f32.xlu1 %v4589_v22 }
0x12eb   : > { %v4588_v23 = vpop.xlane.xlu0 %4587 }
0x12ec   : > { %v4592_v25 = vsub.f32 %v4584_v8, %v4588_v23 }
0x12ee   : > { %v4594_v27 = vmul.f32 1.442695, %v4592_v25 }
0x12ef   : > { %v4591_v28 = vpop.xlane.xlu1 %4590 }
0x12f0   : > { %8671 = vpow2.f32 %v4594_v27  ;;  %v4593_v24 = vsub.f32 %v4585_v20, %v4591_v28 }
0x12f2   : > { %v4596_v9 = vmul.f32 1.442695, %v4593_v24 }
0x12f4   : > { %8673 = vpow2.f32 %v4596_v9 }
0x12fd   : > { %v8672_v26 = vpop.eup %8671 }
0x12fe   : > { %v4598_v12 = vsel %vm1676_vm3, %v8672_v26, 0.0 }
0x12ff   : > { %4599 = vadd.xlane.f32.xlu0 %v4598_v12 }
0x1301   : > { %v8674_v11 = vpop.eup %8673 }
0x1302   : > { %v4601_v29 = vsel %vm1676_vm3, %v8674_v11, 0.0 }
0x1303   : > { %4602 = vadd.xlane.f32.xlu1 %v4601_v29 }
0x1388   : > { %v4600_v33 = vpop.xlane.xlu0 %4599 }
0x1389   : > { %8675 = vrcp.f32 %v4600_v33 }
0x138c   : > { %v4603_v37 = vpop.xlane.xlu1 %4602 }
0x138d   : > { %8677 = vrcp.f32 %v4603_v37 }
0x1396   : > { %v8676_v38 = vpop.eup %8675 }
0x1397   : > { %v4606_v40 = vmul.f32 %v8676_v38, %v8672_v26  ;;  %v7752_v38 = vld [vmem:[%s9727_s18 + $0x58] sm:$0xff] }
0x1399   : > { %8368 = vmatmul.mubr.msk.f32.vlgmr.msra.gmra.mxu0 %vm1676_vm3, %v4606_v40 }
0x139a   : > { %v8678_v41 = vpop.eup %8677  ;;  %8376 = vmatpush3.msra.mxu0 %v4754_v46  ;;  %v7751_v46 = vld [vmem:[%s9727_s18 + $0x50] sm:$0xff] }
0x139b   : > { %v4607_v42 = vmul.f32 %v8678_v41, %v8674_v11  ;;  %8391 = vmatprep.subr.mxu0 %v7727_v47 }
0x139d   : > { %8373 = vmatmul.mubr.msk.f32.vlgmr.msra.gmra.mxu1 %vm1676_vm3, %v4607_v42 }
0x139e   : > { %8381 = vmatpush3.msra.mxu1 %v7719_v21  ;;  %8388 = vmatprep.mubr.msk.f32.mxu1 %vm1422_vm1, %v9327_v54 }
0x139f   : > { %8382 = vmatprep.subr.mxu1 %v7718_v43 }
0x13a0   : > { %8383 = vmatpush3.msra.mxu1 %v7718_v43 }
0x13a1   : > { %8384 = vmatprep.subr.mxu1 %v7717_v44 }
0x13a2   : > { %8385 = vmatpush3.msra.mxu1 %v7717_v44 }
0x13a3   : > { %8386 = vmatprep.subr.mxu1 %v7716_v45 }
0x13a4   : > { %8387 = vmatpush3.msra.mxu1 %v7716_v45 }
0x13a5   : > { %8389 = vmatmul.mubr.msk.f32.vlgmr.msra.gmra.mxu1 %vm1422_vm1, %v9329_v35  ;;  %8402 = vmatprep.subr.mxu1 %v7735_v3 }
0x13a6   : > { %8410 = vmatprep.mubr.msk.f32.mxu1 %vm1422_vm1, %v9307_v34  ;;  %8403 = vmatpush3.msra.mxu1 %v7735_v3 }
0x13a7   : > { %8404 = vmatprep.subr.mxu1 %v7734_v4 }
0x13a8   : > { %8405 = vmatpush3.msra.mxu1 %v7734_v4 }
0x13a9   : > { %8406 = vmatprep.subr.mxu1 %v7733_v6 }
0x13aa   : > { %8407 = vmatpush3.msra.mxu1 %v7733_v6  ;;  %v7762_v6 = vld [vmem:[%s9731_s17 + $0x2] ss:$0 sm:$0xff] }
0x13ab   : > { %8408 = vmatprep.subr.mxu1 %v7732_v7 }
0x13ac   : > { %8409 = vmatpush3.msra.mxu1 %v7732_v7 }
0x13ad   : > { %8411 = vmatmul.mubr.msk.f32.vlgmr.msra.gmra.mxu1 %vm1422_vm1, %v9310_v36  ;;  %8423 = vmatprep.subr.mxu1 %v8783_v16 }
0x13ae   : > { %8425 = vmatprep.mubr.msk.f32.mxu1 %vm8784_vm2, %v8783_v16 }
0x1459   : > { %v4677_v48 = vpop.f32.mrf.mxu0 }
0x145a   : > { %8377 = vmatprep.mubr.msk.f32.mxu0 %vm1676_vm3, %v4677_v48  ;;  %v7749_v48 = vld [vmem:[%s9727_s18 + $0x40] sm:$0xff] }
0x145b   : > { %v8369_v49 = vpop.f32.mrf.mxu0 }
0x145c   : > { %v7746_v49 = vld [vmem:[%s9017_s24 + $0x8] sm:$0xff] }
0x145d   : > { %v4750_v50 = vpop.f32.mrf.mxu1 }
0x145e   : > { %8378 = vmatmul.mubr.msk.f32.vlgmr.msra.gmra.mxu0 %vm1676_vm3, %v4750_v50  ;;  %v7760_v50 = vld [vmem:[%s9726_s16 + $0x58] sm:$0xff] }
0x145f   : > { %8392 = vmatpush3.msra.mxu0 %v7727_v47  ;;  %v8374_v52 = vpop.f32.mrf.mxu1  ;;  %8399 = vmatprep.mubr.msk.f32.mxu0 %vm1422_vm1, %v9307_v34  ;;  %v7750_v47 = vld [vmem:[%s9727_s18 + $0x48] sm:$0xff] }
0x1460   : > { %8393 = vmatprep.subr.mxu0 %v7726_v51 }
0x1461   : > { %8394 = vmatpush3.msra.mxu0 %v7726_v51 }
0x1462   : > { %8395 = vmatprep.subr.mxu0 %v7725_v53 }
0x1463   : > { %8396 = vmatpush3.msra.mxu0 %v7725_v53 }
0x1464   : > { %8397 = vmatprep.subr.mxu0 %v7724_v55 }
0x1465   : > { %8398 = vmatpush3.msra.mxu0 %v7724_v55  ;;  %v8390_v39 = vpop.f32.mrf.mxu1  ;;  %v7759_v55 = vld [vmem:[%s9726_s16 + $0x50] sm:$0xff] }
0x1466   : > { %8400 = vmatmul.mubr.msk.f32.vlgmr.msra.gmra.mxu0 %vm1422_vm1, %v9310_v36  ;;  %8413 = vmatprep.subr.mxu0 %v8783_v16  ;;  %v4929_v2 = vadd.f32 %v8390_v39, %v7721_v63 }
0x1467   : > { %8415 = vmatprep.mubr.msk.f32.mxu0 %vm8784_vm2, %v8783_v16  ;;  %v4923_v61 = vpop.f32.mrf.mxu1 }
0x1468   : > { %v4924_v0 = vadd.f32 %v7721_v63, %v4923_v61 }
0x146d   : > { %v8412_v32 = vpop.f32.mrf.mxu1 }
0x146e   : > { %v5105_v21 = vadd.f32 %v8412_v32, %v7737_v19 }
0x146f   : > { %v5099_v33 = vpop.f32.mrf.mxu1 }
0x1470   : > { %v5100_v37 = vadd.f32 %v7737_v19, %v5099_v33 }
0x1472   : > { %8424 = vmatpush3.msra.mxu1 %v5100_v37 }
0x1473   : > { %8433 = vmatprep.subr.mxu1 %v7746_v49 }
0x151e   : > { %v9397_v56 = vpop.f32.mrf.mxu0 }
0x1520   : > { %v9399_v57 = vpop.f32.mrf.mxu0 }
0x1526   : > { %v8401_v58 = vpop.f32.mrf.mxu0 }
0x1527   : > { %v5017_v1 = vadd.f32 %v8401_v58, %v7729_v59  ;;  %v7758_v58 = vld [vmem:[%s9726_s16 + $0x48] sm:$0xff] }
0x1528   : > { %v5011_v60 = vpop.f32.mrf.mxu0 }
0x1529   : > { %v5012_v62 = vadd.f32 %v7729_v59, %v5011_v60  ;;  %v7757_v59 = vld [vmem:[%s9726_s16 + $0x40] sm:$0xff] }
0x152a   : > { %v7715_v60 = vld [vmem:[%s1360_s30] ss:$0 sm:$0xff] }
0x152b   : > { %8414 = vmatpush3.xpose.msk.msra.mxu0 %vm1676_vm3, %v5012_v62  ;;  %v4843_v61 = vadd.f32 %v9397_v56, %v7715_v60  ;;  %v4842_v63 = vadd.f32 %v7715_v60, %v9399_v57  ;;  %v7793_v60 = vld [vmem:[%s9726_s16 + $0x78] sm:$0xff] }
0x152c   : > { %8418 = vmatprep.subr.mxu0 %v8783_v16 }
0x152e   : > { %8416 = vmatmul.mubr.msk.f32.vlgmr.msra.gmra.mxu0 %vm1676_vm3, %v4924_v0 }
0x152f   : > { %8419 = vmatpush3.xpose.msk.msra.mxu0 %vm1676_vm3, %v5017_v1  ;;  %8420 = vmatprep.mubr.msk.f32.mxu0 %vm8784_vm2, %v8783_v16 }
0x1530   : > { %8428 = vmatprep.subr.mxu0 %v8783_v16 }
0x1532   : > { %8421 = vmatmul.mubr.msk.f32.vlgmr.msra.gmra.mxu0 %vm1676_vm3, %v4929_v2 }
0x1533   : > { %8430 = vmatprep.mubr.msk.f32.mxu0 %vm8784_vm2, %v8783_v16  ;;  %8429 = vmatpush3.msra.mxu0 %v5105_v21 }
0x1534   : > { %8438 = vmatprep.subr.mxu0 %v7752_v38 }
0x15ee   : > { %v5180_v8 = vpop.f32.mrf.mxu0 }
0x15ef   : > { %v5260_v13 = vmul.f32 0.35355338, %v5180_v8 }
0x15f0   : > { %v8417_v15 = vpop.f32.mrf.mxu0 }
0x15f1   : > { %v5262_v17 = vadd.f32 %v5260_v13, %v9359_v5  ;;  %v7754_v15 = vld [vmem:[%s9732_s21 + $0x2] ss:$0 sm:$0xff] }
0x15f2   : > { %v5256_v18 = vpop.f32.mrf.mxu0 }
0x15f3   : > { %v5261_v20 = vmul.f32 0.35355338, %v5256_v18  ;;  %v5264_v22 = vsel %vm1676_vm3, %v5262_v17, -inf  ;;  %v7768_v18 = vld [vmem:[%s9733_s12 + $0x58] sm:$0xff] }
0x15f4   : > { %5265 = vmax.xlane.f32.xlu0 %v5264_v22  ;;  %v8422_v23 = vpop.f32.mrf.mxu0  ;;  %v7766_v22 = vld [vmem:[%s9733_s12 + $0x48] sm:$0xff] }
0x15f5   : > { %v5263_v25 = vadd.f32 %v5261_v20, %v9363_v14  ;;  %v7767_v20 = vld [vmem:[%s9733_s12 + $0x50] sm:$0xff]  ;;  %v7765_v23 = vld [vmem:[%s9733_s12 + $0x40] sm:$0xff] }
0x15f7   : > { %v5267_v27 = vsel %vm1676_vm3, %v5263_v25, -inf }
0x15f8   : > { %5268 = vmax.xlane.f32.xlu1 %v5267_v27 }
0x167d   : > { %v5266_v28 = vpop.xlane.xlu0 %5265 }
0x167e   : > { %v5270_v24 = vsub.f32 %v5262_v17, %v5266_v28 }
0x1680   : > { %v5272_v9 = vmul.f32 1.442695, %v5270_v24 }
0x1681   : > { %v5269_v26 = vpop.xlane.xlu1 %5268 }
0x1682   : > { %8679 = vpow2.f32 %v5272_v9  ;;  %v5271_v12 = vsub.f32 %v5263_v25, %v5269_v26 }
0x1684   : > { %v5274_v11 = vmul.f32 1.442695, %v5271_v12 }
0x1686   : > { %8681 = vpow2.f32 %v5274_v11 }
0x168f   : > { %v8680_v29 = vpop.eup %8679 }
0x1690   : > { %v5276_v10 = vsel %vm1676_vm3, %v8680_v29, 0.0 }
0x1691   : > { %5277 = vadd.xlane.f32.xlu0 %v5276_v10 }
0x1693   : > { %v8682_v30 = vpop.eup %8681 }
0x1694   : > { %v5279_v31 = vsel %vm1676_vm3, %v8682_v30, 0.0 }
0x1695   : > { %5280 = vadd.xlane.f32.xlu1 %v5279_v31 }
0x171a   : > { %v5278_v40 = vpop.xlane.xlu0 %5277 }
0x171b   : > { %8683 = vrcp.f32 %v5278_v40 }
0x171e   : > { %v5281_v41 = vpop.xlane.xlu1 %5280 }
0x171f   : > { %8685 = vrcp.f32 %v5281_v41 }
0x1728   : > { %v8684_v42 = vpop.eup %8683 }
0x1729   : > { %v5284_v43 = vmul.f32 %v8684_v42, %v8680_v29 }
0x172b   : > { %8426 = vmatmul.mubr.msk.f32.vlgmr.msra.gmra.mxu1 %vm1676_vm3, %v5284_v43  ;;  %v7770_v43 = vld [vmem:[%s9014_s19 + $0x2] ss:$0 sm:$0xff] }
0x172c   : > { %v8686_v44 = vpop.eup %8685  ;;  %8434 = vmatpush3.msra.mxu1 %v7746_v49 }
0x172d   : > { %v5285_v45 = vmul.f32 %v8686_v44, %v8682_v30  ;;  %8449 = vmatprep.subr.mxu1 %v7760_v50 }
0x172f   : > { %8431 = vmatmul.mubr.msk.f32.vlgmr.msra.gmra.mxu0 %vm1676_vm3, %v5285_v45 }
0x1730   : > { %8439 = vmatpush3.msra.mxu0 %v7752_v38  ;;  %8446 = vmatprep.mubr.msk.f32.mxu0 %vm1422_vm1, %v9327_v54 }
0x1731   : > { %8440 = vmatprep.subr.mxu0 %v7751_v46 }
0x1732   : > { %8441 = vmatpush3.msra.mxu0 %v7751_v46 }
0x1733   : > { %8442 = vmatprep.subr.mxu0 %v7750_v47 }
0x1734   : > { %8443 = vmatpush3.msra.mxu0 %v7750_v47  ;;  %v7785_v47 = vld [vmem:[%s9727_s18 + $0x78] sm:$0xff] }
0x1735   : > { %8444 = vmatprep.subr.mxu0 %v7749_v48 }
0x1736   : > { %8445 = vmatpush3.msra.mxu0 %v7749_v48 }
0x1737   : > { %8447 = vmatmul.mubr.msk.f32.vlgmr.msra.gmra.mxu0 %vm1422_vm1, %v9329_v35  ;;  %8460 = vmatprep.subr.mxu0 %v7768_v18 }
0x1738   : > { %8468 = vmatprep.mubr.msk.f32.mxu0 %vm1422_vm1, %v9307_v34  ;;  %8461 = vmatpush3.msra.mxu0 %v7768_v18 }
0x1739   : > { %8462 = vmatprep.subr.mxu0 %v7767_v20 }
0x173a   : > { %8463 = vmatpush3.msra.mxu0 %v7767_v20 }
0x173b   : > { %8464 = vmatprep.subr.mxu0 %v7766_v22 }
0x173c   : > { %8465 = vmatpush3.msra.mxu0 %v7766_v22  ;;  %v7787_v22 = vld [vmem:[%s9732_s21 + $0x3] ss:$0 sm:$0xff] }
0x173d   : > { %8466 = vmatprep.subr.mxu0 %v7765_v23 }
0x173e   : > { %8467 = vmatpush3.msra.mxu0 %v7765_v23 }
0x173f   : > { %8469 = vmatmul.mubr.msk.f32.vlgmr.msra.gmra.mxu0 %vm1422_vm1, %v9310_v36  ;;  %8481 = vmatprep.subr.mxu0 %v8783_v16 }
0x1740   : > { %8483 = vmatprep.mubr.msk.f32.mxu0 %vm8784_vm2, %v8783_v16 }
0x17eb   : > { %v5355_v51 = vpop.f32.mrf.mxu1 }
0x17ec   : > { %8435 = vmatprep.mubr.msk.f32.mxu1 %vm1676_vm3, %v5355_v51 }
0x17ed   : > { %v8427_v52 = vpop.f32.mrf.mxu1 }
0x17ef   : > { %v5428_v53 = vpop.f32.mrf.mxu0 }
0x17f0   : > { %8436 = vmatmul.mubr.msk.f32.vlgmr.msra.gmra.mxu1 %vm1676_vm3, %v5428_v53 }
0x17f1   : > { %8450 = vmatpush3.msra.mxu1 %v7760_v50  ;;  %v8432_v39 = vpop.f32.mrf.mxu0  ;;  %8457 = vmatprep.mubr.msk.f32.mxu1 %vm1422_vm1, %v9307_v34 }
0x17f2   : > { %8451 = vmatprep.subr.mxu1 %v7759_v55  ;;  %v7783_v39 = vld [vmem:[%s9727_s18 + $0x68] sm:$0xff] }
0x17f3   : > { %8452 = vmatpush3.msra.mxu1 %v7759_v55  ;;  %v7784_v55 = vld [vmem:[%s9727_s18 + $0x70] sm:$0xff] }
0x17f4   : > { %8453 = vmatprep.subr.mxu1 %v7758_v58 }
0x17f5   : > { %8454 = vmatpush3.msra.mxu1 %v7758_v58  ;;  %v7782_v58 = vld [vmem:[%s9727_s18 + $0x60] sm:$0xff] }
0x17f6   : > { %8455 = vmatprep.subr.mxu1 %v7757_v59 }
0x17f7   : > { %8456 = vmatpush3.msra.mxu1 %v7757_v59  ;;  %v8448_v3 = vpop.f32.mrf.mxu0  ;;  %v7779_v59 = vld [vmem:[%s9017_s24 + $0x10] sm:$0xff] }
0x17f8   : > { %8458 = vmatmul.mubr.msk.f32.vlgmr.msra.gmra.mxu1 %vm1422_vm1, %v9310_v36  ;;  %8471 = vmatprep.subr.mxu1 %v8783_v16  ;;  %v5602_v17 = vadd.f32 %v8448_v3, %v7754_v15 }
0x17f9   : > { %8473 = vmatprep.mubr.msk.f32.mxu1 %vm8784_vm2, %v8783_v16  ;;  %v5596_v8 = vpop.f32.mrf.mxu0 }
0x17fa   : > { %v5597_v56 = vadd.f32 %v7754_v15, %v5596_v8 }
0x17ff   : > { %v8470_v42 = vpop.f32.mrf.mxu0 }
0x1800   : > { %v5778_v44 = vadd.f32 %v8470_v42, %v7770_v43 }
0x1801   : > { %v5772_v45 = vpop.f32.mrf.mxu0 }
0x1802   : > { %v5773_v46 = vadd.f32 %v7770_v43, %v5772_v45  ;;  %v7803_v43 = vld [vmem:[%s9014_s19 + $0x3] ss:$0 sm:$0xff] }
0x1804   : > { %8482 = vmatpush3.msra.mxu0 %v5773_v46 }
0x1805   : > { %8491 = vmatprep.subr.mxu0 %v7779_v59 }
0x18b0   : > { %v8437_v62 = vpop.f32.mrf.mxu1 }
0x18b1   : > { %v9460_v0 = vadd.f32 %v8437_v62, %v4843_v61 }
0x18b2   : > { %v5506_v1 = vpop.f32.mrf.mxu1 }
0x18b3   : > { %v9462_v2 = vadd.f32 %v5506_v1, %v4842_v63  ;;  %v7792_v1 = vld [vmem:[%s9726_s16 + $0x70] sm:$0xff] }
0x18b8   : > { %v8459_v4 = vpop.f32.mrf.mxu1 }
0x18b9   : > { %v5690_v57 = vadd.f32 %v8459_v4, %v7762_v6  ;;  %v7791_v4 = vld [vmem:[%s9726_s16 + $0x68] sm:$0xff] }
0x18ba   : > { %v5684_v7 = vpop.f32.mrf.mxu1 }
0x18bb   : > { %v5685_v13 = vadd.f32 %v7762_v6, %v5684_v7  ;;  %v7790_v6 = vld [vmem:[%s9726_s16 + $0x60] sm:$0xff] }
0x18bd   : > { %8472 = vmatpush3.xpose.msk.msra.mxu1 %vm1676_vm3, %v5685_v13 }
0x18be   : > { %8476 = vmatprep.subr.mxu1 %v8783_v16 }
0x18c0   : > { %8474 = vmatmul.mubr.msk.f32.vlgmr.msra.gmra.mxu1 %vm1676_vm3, %v5597_v56 }
0x18c1   : > { %8477 = vmatpush3.xpose.msk.msra.mxu1 %vm1676_vm3, %v5690_v57  ;;  %8478 = vmatprep.mubr.msk.f32.mxu1 %vm8784_vm2, %v8783_v16  ;;  %v7795_v57 = vld [vmem:[%s9731_s17 + $0x3] ss:$0 sm:$0xff] }
0x18c2   : > { %8486 = vmatprep.subr.mxu1 %v8783_v16 }
0x18c4   : > { %8479 = vmatmul.mubr.msk.f32.vlgmr.msra.gmra.mxu1 %vm1676_vm3, %v5602_v17 }
0x18c5   : > { %8488 = vmatprep.mubr.msk.f32.mxu1 %vm8784_vm2, %v8783_v16  ;;  %8487 = vmatpush3.msra.mxu1 %v5778_v44 }
0x18c6   : > { %8496 = vmatprep.subr.mxu1 %v7785_v47 }
0x1980   : > { %v5853_v25 = vpop.f32.mrf.mxu1 }
0x1981   : > { %v5933_v27 = vmul.f32 0.35355338, %v5853_v25  ;;  %v7801_v25 = vld [vmem:[%s9733_s12 + $0x78] sm:$0xff] }
0x1982   : > { %v8475_v28 = vpop.f32.mrf.mxu1 }
0x1983   : > { %v5935_v24 = vadd.f32 %v5933_v27, %v9359_v5  ;;  %v7800_v27 = vld [vmem:[%s9733_s12 + $0x70] sm:$0xff]  ;;  %v7799_v28 = vld [vmem:[%s9733_s12 + $0x68] sm:$0xff] }
0x1984   : > { %v5929_v9 = vpop.f32.mrf.mxu1 }
0x1985   : > { %v5934_v26 = vmul.f32 0.35355338, %v5929_v9  ;;  %v5937_v12 = vsel %vm1676_vm3, %v5935_v24, -inf }
0x1986   : > { %5938 = vmax.xlane.f32.xlu0 %v5937_v12  ;;  %v8480_v11 = vpop.f32.mrf.mxu1 }
0x1987   : > { %v5936_v29 = vadd.f32 %v5934_v26, %v9363_v14 }
0x1989   : > { %v5940_v10 = vsel %vm1676_vm3, %v5936_v29, -inf }
0x198a   : > { %5941 = vmax.xlane.f32.xlu1 %v5940_v10 }
0x1a0f   : > { %v5939_v30 = vpop.xlane.xlu0 %5938 }
0x1a10   : > { %v5943_v31 = vsub.f32 %v5935_v24, %v5939_v30  ;;  %v7798_v24 = vld [vmem:[%s9733_s12 + $0x60] sm:$0xff] }
0x1a12   : > { %v5945_v32 = vmul.f32 1.442695, %v5943_v31 }
0x1a13   : > { %v5942_v19 = vpop.xlane.xlu1 %5941 }
0x1a14   : > { %8687 = vpow2.f32 %v5945_v32  ;;  %v5944_v21 = vsub.f32 %v5936_v29, %v5942_v19 }
0x1a16   : > { %v5947_v33 = vmul.f32 1.442695, %v5944_v21 }
0x1a18   : > { %8689 = vpow2.f32 %v5947_v33 }
0x1a21   : > { %v8688_v37 = vpop.eup %8687 }
0x1a22   : > { %v5949_v38 = vsel %vm1676_vm3, %v8688_v37, 0.0 }
0x1a23   : > { %5950 = vadd.xlane.f32.xlu0 %v5949_v38 }
0x1a25   : > { %v8690_v40 = vpop.eup %8689 }
0x1a26   : > { %v5952_v41 = vsel %vm1676_vm3, %v8690_v40, 0.0 }
0x1a27   : > { %5953 = vadd.xlane.f32.xlu1 %v5952_v41 }
0x1aac   : > { %v5951_v48 = vpop.xlane.xlu0 %5950 }
0x1aad   : > { %8691 = vrcp.f32 %v5951_v48 }
0x1ab0   : > { %v5954_v49 = vpop.xlane.xlu1 %5953 }
0x1ab1   : > { %8693 = vrcp.f32 %v5954_v49 }
0x1aba   : > { %v8692_v50 = vpop.eup %8691 }
0x1abb   : > { %v5957_v51 = vmul.f32 %v8692_v50, %v8688_v37 }
0x1abd   : > { %8484 = vmatmul.mubr.msk.f32.vlgmr.msra.gmra.mxu0 %vm1676_vm3, %v5957_v51 }
0x1abe   : > { %v8694_v52 = vpop.eup %8693  ;;  %8492 = vmatpush3.msra.mxu0 %v7779_v59 }
0x1abf   : > { %v5958_v53 = vmul.f32 %v8694_v52, %v8690_v40  ;;  %8507 = vmatprep.subr.mxu0 %v7793_v60 }
0x1ac1   : > { %8489 = vmatmul.mubr.msk.f32.vlgmr.msra.gmra.mxu1 %vm1676_vm3, %v5958_v53  ;;  %v7812_v53 = vld [vmem:[%s9017_s24 + $0x18] sm:$0xff] }
0x1ac2   : > { %8497 = vmatpush3.msra.mxu1 %v7785_v47  ;;  %8504 = vmatprep.mubr.msk.f32.mxu1 %vm1422_vm1, %v9327_v54 }
0x1ac3   : > { %8498 = vmatprep.subr.mxu1 %v7784_v55 }
0x1ac4   : > { %8499 = vmatpush3.msra.mxu1 %v7784_v55 }
0x1ac5   : > { %8500 = vmatprep.subr.mxu1 %v7783_v39 }
0x1ac6   : > { %8501 = vmatpush3.msra.mxu1 %v7783_v39 }
0x1ac7   : > { %8502 = vmatprep.subr.mxu1 %v7782_v58 }
0x1ac8   : > { %8503 = vmatpush3.msra.mxu1 %v7782_v58 }
0x1ac9   : > { %8505 = vmatmul.mubr.msk.f32.vlgmr.msra.gmra.mxu1 %vm1422_vm1, %v9329_v35  ;;  %8518 = vmatprep.subr.mxu1 %v7801_v25 }
0x1aca   : > { %8526 = vmatprep.mubr.msk.f32.mxu1 %vm1422_vm1, %v9307_v34  ;;  %8519 = vmatpush3.msra.mxu1 %v7801_v25  ;;  %v7008_v25 = vld [vmem:[%s9028_s26 + $0x28] sm:$0xff] }
0x1acb   : > { %8520 = vmatprep.subr.mxu1 %v7800_v27 }
0x1acc   : > { %8521 = vmatpush3.msra.mxu1 %v7800_v27  ;;  %v7007_v27 = vld [vmem:[%s9028_s26 + $0x20] sm:$0xff] }
0x1acd   : > { %8522 = vmatprep.subr.mxu1 %v7799_v28 }
0x1ace   : > { %8523 = vmatpush3.msra.mxu1 %v7799_v28 }
0x1acf   : > { %8524 = vmatprep.subr.mxu1 %v7798_v24 }
0x1ad0   : > { %8525 = vmatpush3.msra.mxu1 %v7798_v24 }
0x1ad1   : > { %8527 = vmatmul.mubr.msk.f32.vlgmr.msra.gmra.mxu1 %vm1422_vm1, %v9310_v36  ;;  %8539 = vmatprep.subr.mxu1 %v8783_v16 }
0x1ad2   : > { %8541 = vmatprep.mubr.msk.f32.mxu1 %vm8784_vm2, %v8783_v16 }
0x1b7d   : > { %v6028_v61 = vpop.f32.mrf.mxu0 }
0x1b7e   : > { %8493 = vmatprep.mubr.msk.f32.mxu0 %vm1676_vm3, %v6028_v61 }
0x1b7f   : > { %v8485_v62 = vpop.f32.mrf.mxu0 }
0x1b81   : > { %v6101_v63 = vpop.f32.mrf.mxu1 }
0x1b82   : > { %8494 = vmatmul.mubr.msk.f32.vlgmr.msra.gmra.mxu0 %vm1676_vm3, %v6101_v63 }
0x1b83   : > { %8508 = vmatpush3.msra.mxu0 %v7793_v60  ;;  %v8490_v3 = vpop.f32.mrf.mxu1  ;;  %8515 = vmatprep.mubr.msk.f32.mxu0 %vm1422_vm1, %v9307_v34 }
0x1b84   : > { %8509 = vmatprep.subr.mxu0 %v7792_v1 }
0x1b85   : > { %8510 = vmatpush3.msra.mxu0 %v7792_v1 }
0x1b86   : > { %8511 = vmatprep.subr.mxu0 %v7791_v4 }
0x1b87   : > { %8512 = vmatpush3.msra.mxu0 %v7791_v4 }
0x1b88   : > { %8513 = vmatprep.subr.mxu0 %v7790_v6 }
0x1b89   : > { %8514 = vmatpush3.msra.mxu0 %v7790_v6  ;;  %v8506_v15 = vpop.f32.mrf.mxu1 }
0x1b8a   : > { %8516 = vmatmul.mubr.msk.f32.vlgmr.msra.gmra.mxu0 %vm1422_vm1, %v9310_v36  ;;  %8529 = vmatprep.subr.mxu0 %v8783_v16 }
0x1b8b   : > { %8531 = vmatprep.mubr.msk.f32.mxu0 %vm8784_vm2, %v8783_v16  ;;  %v6269_v18 = vpop.f32.mrf.mxu1 }
0x1b8c   : > { %v6270_v23 = vadd.f32 %v7787_v22, %v6269_v18  ;;  %v6912_v18 = vld [vmem:[%s9022_s3 + $0x18] sm:$0xff] }
0x1c42   : > { %v8495_v7 = vpop.f32.mrf.mxu0 }
0x1c43   : > { %v9519_v34 = vadd.f32 %v8495_v7, %v9460_v0 }
0x1c44   : > { %v6179_v8 = vpop.f32.mrf.mxu0 }
0x1c45   : > { %v9522_v13 = vadd.f32 %v6179_v8, %v9462_v2  ;;  %v6275_v2 = vadd.f32 %v8506_v15, %v7787_v22  ;;  %v6910_v22 = vld [vmem:[%s9022_s3 + $0x8] sm:$0xff] }
0x1c4a   : > { %v8517_v56 = vpop.f32.mrf.mxu0 }
0x1c4b   : > { %v6363_v0 = vadd.f32 %v8517_v56, %v7795_v57 }
0x1c4c   : > { %v6357_v17 = vpop.f32.mrf.mxu0 }
0x1c4d   : > { %v6358_v20 = vadd.f32 %v7795_v57, %v6357_v17 }
0x1c4f   : > { %8530 = vmatpush3.xpose.msk.msra.mxu0 %vm1676_vm3, %v6358_v20  ;;  %v6911_v20 = vld [vmem:[%s9022_s3 + $0x10] sm:$0xff] }
0x1c50   : > { %8534 = vmatprep.subr.mxu0 %v8783_v16 }
0x1c52   : > { %8532 = vmatmul.mubr.msk.f32.vlgmr.msra.gmra.mxu0 %vm1676_vm3, %v6270_v23  ;;  %v6909_v23 = vld [vmem:[%s9022_s3] sm:$0xff] }
0x1c53   : > { %8535 = vmatpush3.xpose.msk.msra.mxu0 %vm1676_vm3, %v6363_v0  ;;  %8536 = vmatprep.mubr.msk.f32.mxu0 %vm8784_vm2, %v8783_v16  ;;  %v7010_v0 = vld [vmem:[%s9028_s26 + $0x38] sm:$0xff] }
0x1c54   : > { %8544 = vmatprep.subr.mxu0 %v8783_v16 }
0x1c56   : > { %8537 = vmatmul.mubr.msk.f32.vlgmr.msra.gmra.mxu0 %vm1676_vm3, %v6275_v2  ;;  %v7009_v2 = vld [vmem:[%s9028_s26 + $0x30] sm:$0xff] }
0x1c57   : > { %8546 = vmatprep.mubr.msk.f32.mxu0 %vm8784_vm2, %v8783_v16 }
0x1d12   : > { %v6526_v9 = vpop.f32.mrf.mxu0 }
0x1d13   : > { %v6606_v26 = vmul.f32 0.35355338, %v6526_v9 }
0x1d14   : > { %v8533_v12 = vpop.f32.mrf.mxu0 }
0x1d15   : > { %v6608_v11 = vadd.f32 %v6606_v26, %v9359_v5 }
0x1d16   : > { %v6602_v29 = vpop.f32.mrf.mxu0 }
0x1d17   : > { %v6607_v10 = vmul.f32 0.35355338, %v6602_v29  ;;  %v6610_v30 = vsel %vm1676_vm3, %v6608_v11, -inf }
0x1d18   : > { %6611 = vmax.xlane.f32.xlu0 %v6610_v30  ;;  %v8538_v31 = vpop.f32.mrf.mxu0 }
0x1d19   : > { %v6609_v32 = vadd.f32 %v6607_v10, %v9363_v14  ;;  %v8528_v14 = vpop.f32.mrf.mxu1  ;;  %v7815_v10 = vld [vmem:[%s1385_s20] ss:$0 sm:$0xff]  ;;  %s9741_s20 = sld [smem:[#allocation38_spill]] }
0x1d1a   : > { %v6451_v44 = vadd.f32 %v8528_v14, %v7803_v43 }
0x1d1b   : > { %v6613_v36 = vsel %vm1676_vm3, %v6609_v32, -inf  ;;  %v6445_v45 = vpop.f32.mrf.mxu1 }
0x1d1c   : > { %6614 = vmax.xlane.f32.xlu1 %v6613_v36  ;;  %v6446_v46 = vadd.f32 %v7803_v43, %v6445_v45  ;;  %8545 = vmatpush3.msra.mxu0 %v6451_v44 }
0x1d1d   : > { %8554 = vmatprep.subr.mxu0 %v6912_v18 }
0x1d1e   : > { %8540 = vmatpush3.msra.mxu1 %v6446_v46 }
0x1d1f   : > { %8549 = vmatprep.subr.mxu1 %v7812_v53  ;;  %p7825_p5 = scmp.ne.s32.totalorder %s9741_s20, 1 }
0x1da1   : > { %v6612_v19 = vpop.xlane.xlu0 %6611 }
0x1da2   : > { %v6616_v21 = vsub.f32 %v6608_v11, %v6612_v19  ;;  %v7816_v19 = vld [vmem:[%s1388_s28] ss:$0 sm:$0xff]  ;;  %s9743_s28 = sld [smem:[#allocation35_spill]] (!%p7825_p5) }
0x1da4   : > { %v6618_v16 = vmul.f32 1.442695, %v6616_v21 }
0x1da5   : > { %v6615_v33 = vpop.xlane.xlu1 %6614 }
0x1da6   : > { %8695 = vpow2.f32 %v6618_v16  ;;  %v6617_v37 = vsub.f32 %v6609_v32, %v6615_v33 }
0x1da8   : > { %v6620_v38 = vmul.f32 1.442695, %v6617_v37  ;;  %v7006_v37 = vld [vmem:[%s9028_s26 + $0x18] sm:$0xff] }
0x1daa   : > { %8697 = vpow2.f32 %v6620_v38  ;;  %v7005_v38 = vld [vmem:[%s9028_s26 + $0x10] sm:$0xff] }
0x1db3   : > { %v8696_v5 = vpop.eup %8695 }
0x1db4   : > { %v6622_v40 = vsel %vm1676_vm3, %v8696_v5, 0.0 }
0x1db5   : > { %6623 = vadd.xlane.f32.xlu0 %v6622_v40  ;;  %v7003_v40 = vld [vmem:[%s9028_s26] sm:$0xff] }
0x1db7   : > { %v8698_v41 = vpop.eup %8697 }
0x1db8   : > { %v6625_v42 = vsel %vm1676_vm3, %v8698_v41, 0.0 }
0x1db9   : > { %6626 = vadd.xlane.f32.xlu1 %v6625_v42 }
0x1e3e   : > { %v6624_v47 = vpop.xlane.xlu0 %6623 }
0x1e3f   : > { %8699 = vrcp.f32 %v6624_v47  ;;  %v7820_v47 = vld [vmem:[%s1376_s1] ss:$0 sm:$0xff] }
0x1e42   : > { %v6627_v48 = vpop.xlane.xlu1 %6626 }
0x1e43   : > { %8701 = vrcp.f32 %v6627_v48 }
0x1e4c   : > { %v8700_v49 = vpop.eup %8699 }
0x1e4d   : > { %v6630_v50 = vmul.f32 %v8700_v49, %v8696_v5  ;;  %v7004_v5 = vld [vmem:[%s9028_s26 + $0x8] sm:$0xff] }
0x1e4f   : > { %8542 = vmatmul.mubr.msk.f32.vlgmr.msra.gmra.mxu1 %vm1676_vm3, %v6630_v50 }
0x1e50   : > { %v8702_v51 = vpop.eup %8701  ;;  %8550 = vmatpush3.msra.mxu1 %v7812_v53 }
0x1e51   : > { %v6631_v52 = vmul.f32 %v8702_v51, %v8698_v41  ;;  %8565 = vmatprep.subr.mxu1 %v7010_v0  ;;  %v7817_v41 = vld [vmem:[%s1368_s29] ss:$0 sm:$0xff] }
0x1e53   : > { %8547 = vmatmul.mubr.msk.f32.vlgmr.msra.gmra.mxu0 %vm1676_vm3, %v6631_v52 }
0x1e54   : > { %8555 = vmatpush3.msra.mxu0 %v6912_v18  ;;  %v7824_v18 = vld [vmem:[%s1394_s27] ss:$0 sm:$0xff]  ;;  %s9742_s27 = sld [smem:[#allocation34_spill]] (!%p7825_p5) }
0x1e55   : > { %8556 = vmatprep.subr.mxu0 %v6911_v20 }
0x1e56   : > { %8557 = vmatpush3.msra.mxu0 %v6911_v20 }
0x1e57   : > { %8558 = vmatprep.subr.mxu0 %v6910_v22 }
0x1e58   : > { %8559 = vmatpush3.msra.mxu0 %v6910_v22 }
0x1e59   : > { %8560 = vmatprep.subr.mxu0 %v6909_v23 }
0x1e5a   : > { %8561 = vmatpush3.msra.mxu0 %v6909_v23 }
0x1f0f   : > { %v6701_v55 = vpop.f32.mrf.mxu1 }
0x1f10   : > { %8551 = vmatprep.mubr.msk.f32.mxu1 %vm1676_vm3, %v6701_v55 }
0x1f11   : > { %v8543_v39 = vpop.f32.mrf.mxu1 }
0x1f13   : > { %v6774_v58 = vpop.f32.mrf.mxu0 }
0x1f14   : > { %8552 = vmatmul.mubr.msk.f32.vlgmr.msra.gmra.mxu1 %vm1676_vm3, %v6774_v58 }
0x1f15   : > { %v8548_v59 = vpop.f32.mrf.mxu0  ;;  %8566 = vmatpush3.msra.mxu1 %v7010_v0 }
0x1f16   : > { %8567 = vmatprep.subr.mxu1 %v7009_v2 }
0x1f17   : > { %8568 = vmatpush3.msra.mxu1 %v7009_v2 }
0x1f18   : > { %8569 = vmatprep.subr.mxu1 %v7008_v25 }
0x1f19   : > { %8570 = vmatpush3.msra.mxu1 %v7008_v25 }
0x1f1a   : > { %8571 = vmatprep.subr.mxu1 %v7007_v27 }
0x1f1b   : > { %8572 = vmatpush3.msra.mxu1 %v7007_v27 }
0x1f1c   : > { %8573 = vmatprep.subr.mxu1 %v7006_v37 }
0x1f1d   : > { %8574 = vmatpush3.msra.mxu1 %v7006_v37 }
0x1f1e   : > { %8575 = vmatprep.subr.mxu1 %v7005_v38 }
0x1f1f   : > { %8576 = vmatpush3.msra.mxu1 %v7005_v38 }
0x1f20   : > { %8577 = vmatprep.subr.mxu1 %v7004_v5 }
0x1f21   : > { %8578 = vmatpush3.msra.mxu1 %v7004_v5 }
0x1f22   : > { %8579 = vmatprep.subr.mxu1 %v7003_v40 }
0x1f23   : > { %8580 = vmatpush3.msra.mxu1 %v7003_v40 }
0x1fd4   : > { %v8553_v60 = vpop.f32.mrf.mxu1 }
0x1fd5   : > { %v6862_v61 = vadd.f32 %v8553_v60, %v9519_v34 }
0x1fd6   : > { %v6852_v62 = vpop.f32.mrf.mxu1 }
0x1fd7   : > { %v6861_v63 = vadd.f32 %v6852_v62, %v9522_v13  ;;  %v6864_v1 = vadd.f32 %v6862_v61, %v9329_v35 }
0x1fd9   : > { %v6870_v3 = vsel %vm1422_vm1, %v6864_v1, 0.0  ;;  %v6863_v4 = vadd.f32 %v6861_v63, %v9327_v54 }
0x1fda   : > { %6871 = vadd.xlane.f32.xlu1 %v6870_v3 }
0x1fdb   : > { %v6867_v6 = vsel %vm1422_vm1, %v6863_v4, 0.0 }
0x1fdc   : > { %6868 = vadd.xlane.f32.xlu0 %v6867_v6 }
0x2063   : > { %v6872_v7 = vpop.xlane.xlu1 %6871 }
0x2064   : > { %v6874_v8 = vmul.f32 0.03125, %v6872_v7 }
0x2065   : > { %v6869_v15 = vpop.xlane.xlu0 %6868 }
0x2066   : > { %v6876_v34 = vsub.f32 %v6864_v1, %v6874_v8  ;;  %v6873_v56 = vmul.f32 0.03125, %v6869_v15 }
0x2068   : > { %v6875_v13 = vsub.f32 %v6863_v4, %v6873_v56  ;;  %v6878_v57 = vmul.f32 %v6876_v34, %v6876_v34 }
0x206a   : > { %v6882_v35 = vsel %vm1422_vm1, %v6878_v57, 0.0  ;;  %v6877_v17 = vmul.f32 %v6875_v13, %v6875_v13 }
0x206b   : > { %6883 = vadd.xlane.f32.xlu1 %v6882_v35  ;;  %v7823_v35 = vld [vmem:[%s1391_s2] ss:$0 sm:$0xff] }
0x206c   : > { %v6879_v54 = vsel %vm1422_vm1, %v6877_v17, 0.0 }
0x206d   : > { %6880 = vadd.xlane.f32.xlu0 %v6879_v54 }
0x20f4   : > { %v6884_v28 = vpop.xlane.xlu1 %6883 }
0x20f5   : > { %v6886_v24 = vmul.f32 0.03125, %v6884_v28 }
0x20f6   : > { %v6881_v9 = vpop.xlane.xlu0 %6880 }
0x20f7   : > { %v6888_v26 = vadd.f32 1e-05, %v6886_v24  ;;  %v6885_v12 = vmul.f32 0.03125, %v6881_v9 }
0x20f9   : > { %8703 = vrsqrt.f32 %v6888_v26  ;;  %v6887_v11 = vadd.f32 1e-05, %v6885_v12 }
0x20fb   : > { %8705 = vrsqrt.f32 %v6887_v11 }
0x2106   : > { %v8704_v29 = vpop.eup %8703 }
0x2107   : > { %v6892_v30 = vmul.f32 %v8704_v29, %v6876_v34 }
0x2108   : > { %v8706_v31 = vpop.eup %8705 }
0x2109   : > { %v6891_v32 = vmul.f32 %v8706_v31, %v6875_v13  ;;  %v6900_v36 = vmul.f32 %v7815_v10, %v6892_v30 }
0x210b   : > { %v6899_v21 = vmul.f32 %v7815_v10, %v6891_v32  ;;  %v6908_v33 = vadd.f32 %v7816_v19, %v6900_v36 }
0x210d   : > { %v6907_v16 = vadd.f32 %v7816_v19, %v6899_v21 }
0x210f   : > { %8562 = vmatprep.mubr.msk.f32.mxu0 %vm1422_vm1, %v6907_v16 }
0x2110   : > { %8563 = vmatmul.mubr.msk.f32.vlgmr.msra.gmra.mxu0 %vm1422_vm1, %v6908_v33 }
0x21d0   : > { %v8564_v42 = vpop.f32.mrf.mxu0 }
0x21d1   : > { %v6998_v14 = vadd.f32 %v8564_v42, %v7817_v41 }
0x21d2   : > { %v6992_v43 = vpop.f32.mrf.mxu0 }
0x21d3   : > { %v6993_v44 = vadd.f32 %v7817_v41, %v6992_v43  ;;  %v7002_v46 = vmax.f32 %v6998_v14, 0.0 }
0x21d5   : > { %v7001_v45 = vmax.f32 %v6993_v44, 0.0 }
0x21d7   : > { %8581 = vmatprep.mubr.msk.f32.mxu1 %vm7018_vm4, %v7001_v45 }
0x21d8   : > { %8582 = vmatmul.mubr.msk.f32.vlgmr.msra.gmra.mxu1 %vm7018_vm4, %v7002_v46 }
0x2298   : > { %v8583_v48 = vpop.f32.mrf.mxu1 }
0x2299   : > { %v7097_v49 = vadd.f32 %v8583_v48, %v7820_v47 }
0x229a   : > { %v7091_v50 = vpop.f32.mrf.mxu1 }
0x229b   : > { %v7092_v51 = vadd.f32 %v7820_v47, %v7091_v50  ;;  %v7101_v52 = vadd.f32 %v7097_v49, %v6908_v33 }
0x229d   : > { %v7107_v53 = vsel %vm1422_vm1, %v7101_v52, 0.0  ;;  %v7100_v55 = vadd.f32 %v7092_v51, %v6907_v16 }
0x229e   : > { %7108 = vadd.xlane.f32.xlu1 %v7107_v53 }
0x229f   : > { %v7104_v39 = vsel %vm1422_vm1, %v7100_v55, 0.0 }
0x22a0   : > { %7105 = vadd.xlane.f32.xlu0 %v7104_v39 }
0x2327   : > { %v7109_v58 = vpop.xlane.xlu1 %7108 }
0x2328   : > { %v7111_v59 = vmul.f32 0.03125, %v7109_v58 }
0x2329   : > { %v7106_v60 = vpop.xlane.xlu0 %7105 }
0x232a   : > { %v7113_v61 = vsub.f32 %v7101_v52, %v7111_v59  ;;  %v7110_v62 = vmul.f32 0.03125, %v7106_v60 }
0x232c   : > { %v7112_v63 = vsub.f32 %v7100_v55, %v7110_v62  ;;  %v7115_v1 = vmul.f32 %v7113_v61, %v7113_v61 }
0x232e   : > { %v7119_v3 = vsel %vm1422_vm1, %v7115_v1, 0.0  ;;  %v7114_v4 = vmul.f32 %v7112_v63, %v7112_v63 }
0x232f   : > { %7120 = vadd.xlane.f32.xlu1 %v7119_v3 }
0x2330   : > { %v7116_v6 = vsel %vm1422_vm1, %v7114_v4, 0.0 }
0x2331   : > { %7117 = vadd.xlane.f32.xlu0 %v7116_v6 }
0x23b8   : > { %v7121_v7 = vpop.xlane.xlu1 %7120 }
0x23b9   : > { %v7123_v8 = vmul.f32 0.03125, %v7121_v7 }
0x23ba   : > { %v7118_v15 = vpop.xlane.xlu0 %7117 }
0x23bb   : > { %v7125_v34 = vadd.f32 1e-05, %v7123_v8  ;;  %v7122_v56 = vmul.f32 0.03125, %v7118_v15 }
0x23bd   : > { %8707 = vrsqrt.f32 %v7125_v34  ;;  %v7124_v13 = vadd.f32 1e-05, %v7122_v56 }
0x23bf   : > { %8709 = vrsqrt.f32 %v7124_v13 }
0x23ca   : > { %v8708_v57 = vpop.eup %8707 }
0x23cb   : > { %v7129_v17 = vmul.f32 %v8708_v57, %v7113_v61 }
0x23cc   : > { %v8710_v54 = vpop.eup %8709 }
0x23cd   : > { %v7137_v20 = vmul.f32 %v7823_v35, %v7129_v17  ;;  %v7128_v22 = vmul.f32 %v8710_v54, %v7112_v63 }
0x23cf   : > { %v7145_v23 = vadd.f32 %v7824_v18, %v7137_v20  ;;  %v7136_v0 = vmul.f32 %v7823_v35, %v7128_v22  ;;  %7151 = sbr.rel (%p7825_p5) target bundleno = 9485 (0x250d), region = 156 }
0x23d1   : > { %7147 = vst.msk [vmem:[#allocation2 + $0x8] sm:$0xff] %vm1422_vm1, %v7145_v23  ;;  %v7144_v2 = vadd.f32 %v7824_v18, %v7136_v0 }
0x23d3   : > { %7146 = vst.msk [vmem:[#allocation2] sm:$0xff] %vm1422_vm1, %v7144_v2 }
0x23d4   : > { %v7154_v25 = vsel %vm1422_vm1, %v7144_v2, 0.0  ;;  %v7157_v27 = vsel %vm1422_vm1, %v7145_v23, 0.0  ;;  %v7826_v38 = vld [vmem:[%s9742_s27] ss:$0 sm:$0xff] }
0x23d5   : > { %7155 = vadd.xlane.f32.xlu0 %v7154_v25  ;;  %v7827_v40 = vld [vmem:[%s9743_s28] ss:$0 sm:$0xff] }
0x23d9   : > { %7158 = vadd.xlane.f32.xlu0 %v7157_v27 }
0x245e   : > { %v7156_v28 = vpop.xlane.xlu0 %7155 }
0x245f   : > { %v7160_v24 = vmul.f32 0.03125, %v7156_v28 }
0x2461   : > { %v7162_v9 = vsub.f32 %v7144_v2, %v7160_v24 }
0x2462   : > { %v7159_v26 = vpop.xlane.xlu0 %7158 }
0x2463   : > { %v7161_v12 = vmul.f32 0.03125, %v7159_v26  ;;  %v7164_v11 = vmul.f32 %v7162_v9, %v7162_v9 }
0x2465   : > { %v7163_v29 = vsub.f32 %v7145_v23, %v7161_v12  ;;  %v7166_v10 = vsel %vm1422_vm1, %v7164_v11, 0.0 }
0x2466   : > { %7167 = vadd.xlane.f32.xlu1 %v7166_v10 }
0x2467   : > { %v7165_v30 = vmul.f32 %v7163_v29, %v7163_v29 }
0x2469   : > { %v7169_v31 = vsel %vm1422_vm1, %v7165_v30, 0.0 }
0x246a   : > { %7170 = vadd.xlane.f32.xlu1 %v7169_v31 }
0x24ef   : > { %v7168_v32 = vpop.xlane.xlu1 %7167 }
0x24f0   : > { %v7172_v36 = vmul.f32 0.03125, %v7168_v32 }
0x24f2   : > { %v7174_v19 = vadd.f32 1e-05, %v7172_v36 }
0x24f3   : > { %v7171_v21 = vpop.xlane.xlu1 %7170 }
0x24f4   : > { %8711 = vrsqrt.f32 %v7174_v19  ;;  %v7173_v16 = vmul.f32 0.03125, %v7171_v21 }
0x24f6   : > { %v7175_v33 = vadd.f32 1e-05, %v7173_v16 }
0x24f8   : > { %8713 = vrsqrt.f32 %v7175_v33 }
0x2501   : > { %v8712_v37 = vpop.eup %8711 }
0x2502   : > { %v7178_v5 = vmul.f32 %v8712_v37, %v7162_v9 }
0x2504   : > { %v7186_v41 = vmul.f32 %v7826_v38, %v7178_v5 }
0x2505   : > { %v8714_v42 = vpop.eup %8713 }
0x2506   : > { %v7194_v14 = vadd.f32 %v7827_v40, %v7186_v41  ;;  %v7179_v43 = vmul.f32 %v8714_v42, %v7163_v29 }
0x2508   : > { %7196 = vst.msk [vmem:[#allocation3] sm:$0xff] %vm1422_vm1, %v7194_v14  ;;  %v7187_v44 = vmul.f32 %v7826_v38, %v7179_v43 }
0x250a   : > { %v7195_v45 = vadd.f32 %v7827_v40, %v7187_v44 }
0x250c   : > { %7197 = vst.msk [vmem:[#allocation3 + $0x8] sm:$0xff] %vm1422_vm1, %v7195_v45 }
0x250d PF: > { %s9744_s1 = sld [smem:[#allocation38_spill]]  ;;  %s8785_s0 = smov [#allocation3]  }
0x250e   : > { %s7204_s26 = sshll.u32 %s8785_s0, 4  ;;  %s7205_s26 = int_to_ptr.vmem [resolvable:$true] %s7204_s26 }
0x250f   : > { %s8715_s2 = scalar_lea.vmem %s7205_s26, 256  ;;  %p8722_p10 = scmp.lt.s32.totalorder %s7205_s26, %s7205_s26 }
0x2510   : > { %p8716_p7 = scmp.ne.s32.totalorder %s7205_s26, %s8715_s2  ;;  %p8723_p11 = scmp.lt.s32.totalorder %s8715_s2, %s8715_s2 }
0x2512   : > { %p8724_p12 = por %p8723_p11, %p8722_p10 }
0x2513   : > { %p8588_p6 = scmp.eq.s32.totalorder %s9744_s1, 1 }
0x2515   : > { %p8717_p8 = pnand %p8716_p7, %p8588_p6 }
0x2517   : > { %p8718_p9 = pneg %p8717_p8 }
0x2519   : > { %p8725_p13 = pnand %p8724_p12, %p8718_p9 }
0x251b   : > { %8728 = shalt.err (!%p8725_p13)
}
0x251c   : > { %s8786_s8 = smov 128   ;;  %s9745_s14 = sld [smem:[#allocation36_spill]] }
0x251d   : > { %s8787_s10 = smov 8  }
0x2522   : > { %8585 = dma.vmem_to_hbm [thread:$0]  (%p8588_p6), %s7205_s26, 256, %s9745_s14, [#allocation4], %s8786_s8, %s8786_s8, %s8787_s10  }
0x2523   : > { %8744 = dma.done.wait (%p8588_p6), [#allocation4], 256  }
0x2524   : > { %8746 = vsyncadd (%p8588_p6), [#allocation4], 4294967040 }
0x2525 PF: > { %s9746_s11 = sld [smem:[#allocation37_spill]] }
0x252b   : > { %s76_s28 = sadd.s32 1, %s9746_s11  }
0x252c   : > { %p73_p0 = scmp.ge.s32.totalorder %s76_s28, 4  }
0x252e   :  { %75 = sbr.rel (!%p73_p0) target bundleno = 75 (0x4b), region = 332 }
0x2533   :  { %7220 = vsyncpa [#allocation4], 1 }
0x2534   :  { %7222 = vsyncpa [#allocation4 + $0x1], 1 }

</bundles_post_ra>
